<compile_context>
chip_gen: v5e
topology: v5e:2x2
jax: 0.10.0
libtpu: 0.0.40
codegen_flags: <defaults>
</compile_context>

<pallas_src>
import functools
import math

import jax
import jax.numpy as jnp
from jax.experimental import pallas as pl
from jax.experimental.pallas import tpu as pltpu

# ----------------------------- config (small) -------------------------------
B = 2          # batch
C_LAT = 4      # latent channels
H = W = 16     # latent spatial
S = 8          # text sequence length
D = 32         # cross-attention / model hidden dim
T_TOK = 4      # number of palette tokens
P_DIM = 12     # palette feature dim (4 colors x RGB)
EPS = 1e-5


# ----------------------- fused IP-Adapter UNet kernel -----------------------
def _ip_adapter_fused_kernel(
        lat_ref, temb_ref, ehs_ref, pal_ref,
        pp_w_ref, pp_b_ref, pp_g_ref, pp_beta_ref,
        cin_w_ref, cin_b_ref,
        t1_w_ref, t1_b_ref, t2_w_ref, t2_b_ref,
        wq_ref, wkv_ref, wo_ref, ln_g_ref, ln_b_ref,
        cout_w_ref, cout_b_ref,
        o_ref,
        e_scratch,                       # VMEM (S + T_TOK, D): [text | palette]
        *, scale):
    b = pl.program_id(0)

    # ---- palette_proj: ONE (1,P)x(P,T*D) matmul, then per-token LayerNorm ----
    pal_b = pal_ref[pl.ds(b, 1), :]                                   # (1, P)
    p_flat = jnp.dot(pal_b, pp_w_ref[...],
                     preferred_element_type=jnp.float32) + pp_b_ref[...]  # (1, T*D)

    # ehs = cat([text_tokens, palette_tokens], dim=1) assembled in VMEM:
    # text rows first, then each palette token row (static lane slice of the
    # single matmul result -> avoids an in-kernel (1,T*D)->(T,D) relayout).
    e_scratch[:S, :] = ehs_ref[0]                                     # (S, D)
    for tok in range(T_TOK):                                          # T_TOK=4, unrolled
        row = p_flat[:, tok * D:(tok + 1) * D]                        # (1, D)
        mu = jnp.mean(row, axis=-1, keepdims=True)
        var = jnp.mean(jnp.square(row - mu), axis=-1, keepdims=True)
        row = (row - mu) * jax.lax.rsqrt(var + EPS)
        e_scratch[pl.ds(S + tok, 1), :] = row * pp_g_ref[...] + pp_beta_ref[...]
    e = e_scratch[...]                                                # (S+T, D)

    # ---- timestep MLP (SiLU) on this batch's sinusoidal embedding ----
    temb_b = temb_ref[pl.ds(b, 1), :]                                 # (1, D)
    temb_b = jnp.dot(temb_b, t1_w_ref[...],
                     preferred_element_type=jnp.float32) + t1_b_ref[...]
    temb_b = temb_b * jax.nn.sigmoid(temb_b)
    temb_b = jnp.dot(temb_b, t2_w_ref[...],
                     preferred_element_type=jnp.float32) + t2_b_ref[...]   # (1, D)

    # ---- conv_in (1x1) on NCHW-flat latents + SiLU + temb add ----
    x_chw = lat_ref[0]                                                # (C, HW)
    h_chw = jnp.dot(cin_w_ref[...], x_chw,
                    preferred_element_type=jnp.float32)               # (D, HW)
    h_tok = h_chw.T                                                   # (HW, D) in VMEM
    h_tok = h_tok + cin_b_ref[...]
    h_tok = h_tok * jax.nn.sigmoid(h_tok)
    h_tok = h_tok + temb_b                                            # broadcast (1, D)

    # ---- LayerNorm + cross-attention (+ residual) ----
    mu = jnp.mean(h_tok, axis=-1, keepdims=True)
    var = jnp.mean(jnp.square(h_tok - mu), axis=-1, keepdims=True)
    xn = (h_tok - mu) * jax.lax.rsqrt(var + EPS)
    xn = xn * ln_g_ref[...] + ln_b_ref[...]

    q = jnp.dot(xn, wq_ref[...], preferred_element_type=jnp.float32)  # (HW, D)
    kv = jnp.dot(e, wkv_ref[...], preferred_element_type=jnp.float32) # (S+T, 2D)
    k = kv[:, :D]
    v = kv[:, D:]

    # s = q @ k.T  (NT contraction)
    s = jax.lax.dot_general(q, k, (((1,), (1,)), ((), ())),
                            preferred_element_type=jnp.float32) * scale   # (HW, S+T)
    s = s - jnp.max(s, axis=-1, keepdims=True)
    p = jnp.exp(s)
    p = p * pl.reciprocal(jnp.sum(p, axis=-1, keepdims=True), approx=True)

    a = jnp.dot(p, v, preferred_element_type=jnp.float32)             # (HW, D)
    attn = jnp.dot(a, wo_ref[...], preferred_element_type=jnp.float32)
    h_res = h_tok + attn                                              # residual (pre-LN)

    # ---- conv_out (1x1), emitted lane-dense in NCHW-flat (C, HW) layout ----
    out = jax.lax.dot_general(cout_w_ref[...], h_res,                 # (C,D)x(HW,D)^T
                              (((1,), (1,)), ((), ())),
                              preferred_element_type=jnp.float32)     # (C, HW)
    out = out + cout_b_ref[...]                                       # (C, 1) bcast
    o_ref[0] = out.astype(o_ref.dtype)


def _spec_full(shape):
    n = len(shape)
    return pl.BlockSpec(shape, lambda b, _n=n: (0,) * _n)


def _spec_batched(shape):
    n = len(shape)
    return pl.BlockSpec((1,) + tuple(shape[1:]),
                        lambda b, _n=n: (b,) + (0,) * (_n - 1))


def unet_fused(lat, temb, ehs, palette, params):
    Bn, C, HW = lat.shape
    kernel = functools.partial(_ip_adapter_fused_kernel, scale=1.0 / math.sqrt(D))
    return pl.pallas_call(
        kernel,
        out_shape=jax.ShapeDtypeStruct((Bn, C, HW), jnp.float32),
        grid=(Bn,),
        in_specs=[
            _spec_batched(lat.shape),                  # (1, C, HW)
            _spec_full(temb.shape),                    # (B, D)
            _spec_batched(ehs.shape),                  # (1, S, D)
            _spec_full(palette.shape),                 # (B, P)
            _spec_full(params["pp_w"].shape),          # (P, T*D)
            _spec_full(params["pp_b"].shape),          # (1, T*D)
            _spec_full(params["pp_g"].shape),          # (1, D)
            _spec_full(params["pp_beta"].shape),       # (1, D)
            _spec_full(params["conv_in_w"].shape),     # (D, C)
            _spec_full(params["conv_in_b"].shape),     # (1, D)
            _spec_full(params["t1_w"].shape),          # (D, D)
            _spec_full(params["t1_b"].shape),          # (1, D)
            _spec_full(params["t2_w"].shape),          # (D, D)
            _spec_full(params["t2_b"].shape),          # (1, D)
            _spec_full(params["wq"].shape),            # (D, D)
            _spec_full(params["wkv"].shape),           # (D, 2D)  fused K|V
            _spec_full(params["wo"].shape),            # (D, D)
            _spec_full(params["ln_g"].shape),          # (1, D)
            _spec_full(params["ln_b"].shape),          # (1, D)
            _spec_full(params["conv_out_w"].shape),    # (C, D)
            _spec_full(params["conv_out_b"].shape),    # (C, 1)
        ],
        out_specs=_spec_batched((Bn, C, HW)),
        scratch_shapes=[pltpu.VMEM((S + T_TOK, D), jnp.float32)],
        compiler_params=pltpu.CompilerParams(
            dimension_semantics=("parallel",)),
    )(lat, temb, ehs, palette,
      params["pp_w"], params["pp_b"], params["pp_g"], params["pp_beta"],
      params["conv_in_w"], params["conv_in_b"],
      params["t1_w"], params["t1_b"], params["t2_w"], params["t2_b"],
      params["wq"], params["wkv"], params["wo"],
      params["ln_g"], params["ln_b"],
      params["conv_out_w"], params["conv_out_b"])


# ----------------------------- glue (plain JAX) ------------------------------
def timestep_embedding(t, dim):
    # [cos, sin] ordering (diffusers default is sin-then-cos; irrelevant for a
    # stand-in).  Tiny (B x D) op, kept in XLA; the timestep MLP is in-kernel.
    half = dim // 2
    freqs = jnp.exp(-math.log(10000.0) *
                    jnp.arange(half, dtype=jnp.float32) / half)
    args = t.astype(jnp.float32)[:, None] * freqs[None, :]
    return jnp.concatenate([jnp.cos(args), jnp.sin(args)], axis=-1)


def init_params(key):
    ks = jax.random.split(key, 10)
    s = 0.02
    return dict(
        pp_w=jax.random.normal(ks[0], (P_DIM, T_TOK * D), jnp.float32) * s,
        pp_b=jnp.zeros((1, T_TOK * D), jnp.float32),
        pp_g=jnp.ones((1, D), jnp.float32),
        pp_beta=jnp.zeros((1, D), jnp.float32),
        conv_in_w=jax.random.normal(ks[1], (D, C_LAT), jnp.float32) * s,  # (out,in)
        conv_in_b=jnp.zeros((1, D), jnp.float32),
        t1_w=jax.random.normal(ks[2], (D, D), jnp.float32) * s,
        t1_b=jnp.zeros((1, D), jnp.float32),
        t2_w=jax.random.normal(ks[3], (D, D), jnp.float32) * s,
        t2_b=jnp.zeros((1, D), jnp.float32),
        wq=jax.random.normal(ks[4], (D, D), jnp.float32) * s,
        wkv=jax.random.normal(ks[5], (D, 2 * D), jnp.float32) * s,       # [Wk | Wv]
        wo=jax.random.normal(ks[6], (D, D), jnp.float32) * s,
        ln_g=jnp.ones((1, D), jnp.float32),
        ln_b=jnp.zeros((1, D), jnp.float32),
        conv_out_w=jax.random.normal(ks[7], (C_LAT, D), jnp.float32) * s,  # (out,in)
        conv_out_b=jnp.zeros((C_LAT, 1), jnp.float32),
    )


@jax.jit
def ip_adapter_forward(params, noisy_latents, timesteps,
                       encoder_hidden_states, palette):
    # IPAdapter.forward: palette_proj + concat + unet, all inside ONE fused
    # Pallas kernel.  Only free reshapes (no transposes) happen in the wrapper.
    b, c, h, w = noisy_latents.shape
    lat = noisy_latents.reshape(b, c, h * w)            # NCHW-flat, free reshape
    temb = timestep_embedding(timesteps, D)             # (B, D) sinusoid
    out = unet_fused(lat, temb, encoder_hidden_states, palette, params)
    return out.reshape(b, c, h, w)                      # NCHW, free reshape


if __name__ == "__main__":
    key = jax.random.PRNGKey(0)
    k_in, k_p = jax.random.split(key)
    k1, k2, k3, k4 = jax.random.split(k_in, 4)

    noisy_latents = jax.random.normal(k1, (B, C_LAT, H, W), jnp.float32)
    timesteps = jax.random.randint(k2, (B,), 0, 1000, jnp.int32)
    encoder_hidden_states = jax.random.normal(k3, (B, S, D), jnp.float32)
    palette = jax.random.uniform(k4, (B, P_DIM), jnp.float32)

    params = init_params(k_p)

    noise_pred = ip_adapter_forward(params, noisy_latents, timesteps,
                                    encoder_hidden_states, palette)
    jax.block_until_ready(noise_pred)
    assert noise_pred.shape == (B, C_LAT, H, W)
    assert bool(jnp.all(jnp.isfinite(noise_pred)))
    print("KERNEL_OK")
</pallas_src>

<mosaic_0001>
module attributes {stable_mosaic.version = 11 : i64} {
  func.func @_ip_adapter_fused_kernel(%arg0: i32, %arg1: memref<1x4x256xf32, #tpu.memory_space<vmem>>, %arg2: memref<2x32xf32, #tpu.memory_space<vmem>>, %arg3: memref<1x8x32xf32, #tpu.memory_space<vmem>>, %arg4: memref<2x12xf32, #tpu.memory_space<vmem>>, %arg5: memref<12x128xf32, #tpu.memory_space<vmem>>, %arg6: memref<1x128xf32, #tpu.memory_space<vmem>>, %arg7: memref<1x32xf32, #tpu.memory_space<vmem>>, %arg8: memref<1x32xf32, #tpu.memory_space<vmem>>, %arg9: memref<32x4xf32, #tpu.memory_space<vmem>>, %arg10: memref<1x32xf32, #tpu.memory_space<vmem>>, %arg11: memref<32x32xf32, #tpu.memory_space<vmem>>, %arg12: memref<1x32xf32, #tpu.memory_space<vmem>>, %arg13: memref<32x32xf32, #tpu.memory_space<vmem>>, %arg14: memref<1x32xf32, #tpu.memory_space<vmem>>, %arg15: memref<32x32xf32, #tpu.memory_space<vmem>>, %arg16: memref<32x64xf32, #tpu.memory_space<vmem>>, %arg17: memref<32x32xf32, #tpu.memory_space<vmem>>, %arg18: memref<1x32xf32, #tpu.memory_space<vmem>>, %arg19: memref<1x32xf32, #tpu.memory_space<vmem>>, %arg20: memref<4x32xf32, #tpu.memory_space<vmem>>, %arg21: memref<4x1xf32, #tpu.memory_space<vmem>>, %arg22: memref<1x4x256xf32, #tpu.memory_space<vmem>>, %arg23: memref<12x32xf32, #tpu.memory_space<vmem>>) attributes {dimension_semantics = [#tpu.dimension_semantics<parallel>], iteration_bounds = array<i64: 2>, scalar_prefetch = 0 : i64, scratch_operands = 1 : i64, tpu.core_type = #tpu.core_type<tc>, window_params = [{transform_indices = @transform_0, window_bounds = array<i64: 1, 4, 256>}, {pipeline_mode = #tpu.pipeline_mode<synchronous>, transform_indices = @transform_1, window_bounds = array<i64: 2, 32>}, {transform_indices = @transform_2, window_bounds = array<i64: 1, 8, 32>}, {pipeline_mode = #tpu.pipeline_mode<synchronous>, transform_indices = @transform_3, window_bounds = array<i64: 2, 12>}, {pipeline_mode = #tpu.pipeline_mode<synchronous>, transform_indices = @transform_4, window_bounds = array<i64: 12, 128>}, {pipeline_mode = #tpu.pipeline_mode<synchronous>, transform_indices = @transform_5, window_bounds = array<i64: 1, 128>}, {pipeline_mode = #tpu.pipeline_mode<synchronous>, transform_indices = @transform_6, window_bounds = array<i64: 1, 32>}, {pipeline_mode = #tpu.pipeline_mode<synchronous>, transform_indices = @transform_7, window_bounds = array<i64: 1, 32>}, {pipeline_mode = #tpu.pipeline_mode<synchronous>, transform_indices = @transform_8, window_bounds = array<i64: 32, 4>}, {pipeline_mode = #tpu.pipeline_mode<synchronous>, transform_indices = @transform_9, window_bounds = array<i64: 1, 32>}, {pipeline_mode = #tpu.pipeline_mode<synchronous>, transform_indices = @transform_10, window_bounds = array<i64: 32, 32>}, {pipeline_mode = #tpu.pipeline_mode<synchronous>, transform_indices = @transform_11, window_bounds = array<i64: 1, 32>}, {pipeline_mode = #tpu.pipeline_mode<synchronous>, transform_indices = @transform_12, window_bounds = array<i64: 32, 32>}, {pipeline_mode = #tpu.pipeline_mode<synchronous>, transform_indices = @transform_13, window_bounds = array<i64: 1, 32>}, {pipeline_mode = #tpu.pipeline_mode<synchronous>, transform_indices = @transform_14, window_bounds = array<i64: 32, 32>}, {pipeline_mode = #tpu.pipeline_mode<synchronous>, transform_indices = @transform_15, window_bounds = array<i64: 32, 64>}, {pipeline_mode = #tpu.pipeline_mode<synchronous>, transform_indices = @transform_16, window_bounds = array<i64: 32, 32>}, {pipeline_mode = #tpu.pipeline_mode<synchronous>, transform_indices = @transform_17, window_bounds = array<i64: 1, 32>}, {pipeline_mode = #tpu.pipeline_mode<synchronous>, transform_indices = @transform_18, window_bounds = array<i64: 1, 32>}, {pipeline_mode = #tpu.pipeline_mode<synchronous>, transform_indices = @transform_19, window_bounds = array<i64: 4, 32>}, {pipeline_mode = #tpu.pipeline_mode<synchronous>, transform_indices = @transform_20, window_bounds = array<i64: 4, 1>}, {transform_indices = @transform_21, window_bounds = array<i64: 1, 4, 256>}]} {
    %0 = arith.index_cast %arg0 : i32 to index
    %c0 = arith.constant 0 : index
    %1 = vector.load %arg4[%0, %c0] : memref<2x12xf32, #tpu.memory_space<vmem>>, vector<1x12xf32>
    %c0_0 = arith.constant 0 : index
    %c0_1 = arith.constant 0 : index
    %2 = vector.load %arg5[%c0_0, %c0_1] : memref<12x128xf32, #tpu.memory_space<vmem>>, vector<12x128xf32>
    %cst = arith.constant dense<0.000000e+00> : vector<1x128xf32>
    %3 = tpu.matmul %1, %2, %cst {dimension_numbers = #tpu.dot_dimension_numbers<[1], [0], [0], [1], [0, 0, 1, 1], [], []>} : vector<1x12xf32>, vector<12x128xf32>, vector<1x128xf32> -> vector<1x128xf32>
    %c0_2 = arith.constant 0 : index
    %c0_3 = arith.constant 0 : index
    %4 = vector.load %arg6[%c0_2, %c0_3] : memref<1x128xf32, #tpu.memory_space<vmem>>, vector<1x128xf32>
    %5 = arith.addf %3, %4 : vector<1x128xf32>
    %c0_4 = arith.constant 0 : index
    %c0_5 = arith.constant 0 : index
    %c0_6 = arith.constant 0 : index
    %6 = vector.load %arg3[%c0_4, %c0_5, %c0_6] : memref<1x8x32xf32, #tpu.memory_space<vmem>>, vector<1x8x32xf32>
    %7 = vector.shape_cast %6 : vector<1x8x32xf32> to vector<8x32xf32>
    %c0_7 = arith.constant 0 : index
    %c0_8 = arith.constant 0 : index
    %8 = vector.load %arg23[%c0_7, %c0_8] : memref<12x32xf32, #tpu.memory_space<vmem>>, vector<8x32xf32>
    tpu.vector_store %arg23[%c0_7, %c0_8], %7 {strides = array<i32>} : memref<12x32xf32, #tpu.memory_space<vmem>>, vector<8x32xf32>,
    %9 = vector.extract_strided_slice %5 {offsets = [0, 0], sizes = [1, 32], strides = [1, 1]} : vector<1x128xf32> to vector<1x32xf32>
    %cst_9 = arith.constant dense<0.000000e+00> : vector<1xf32>
    %10 = vector.multi_reduction <add>, %9, %cst_9 [1] : vector<1x32xf32> to vector<1xf32>
    %11 = vector.shape_cast %10 : vector<1xf32> to vector<1x1xf32>
    %cst_10 = arith.constant 3.200000e+01 : f32
    %12 = vector.broadcast %cst_10 : f32 to vector<1x1xf32>
    %13 = arith.divf %11, %12 : vector<1x1xf32>
    %14 = vector.broadcast %13 : vector<1x1xf32> to vector<1x32xf32>
    %15 = arith.subf %9, %14 : vector<1x32xf32>
    %16 = arith.mulf %15, %15 : vector<1x32xf32>
    %cst_11 = arith.constant dense<0.000000e+00> : vector<1xf32>
    %17 = vector.multi_reduction <add>, %16, %cst_11 [1] : vector<1x32xf32> to vector<1xf32>
    %18 = vector.shape_cast %17 : vector<1xf32> to vector<1x1xf32>
    %cst_12 = arith.constant 3.200000e+01 : f32
    %19 = vector.broadcast %cst_12 : f32 to vector<1x1xf32>
    %20 = arith.divf %18, %19 : vector<1x1xf32>
    %21 = vector.broadcast %13 : vector<1x1xf32> to vector<1x32xf32>
    %22 = arith.subf %9, %21 : vector<1x32xf32>
    %cst_13 = arith.constant 9.99999974E-6 : f32
    %23 = vector.broadcast %cst_13 : f32 to vector<1x1xf32>
    %24 = arith.addf %20, %23 : vector<1x1xf32>
    %25 = math.rsqrt %24 : vector<1x1xf32>
    %26 = vector.broadcast %25 : vector<1x1xf32> to vector<1x32xf32>
    %27 = arith.mulf %22, %26 : vector<1x32xf32>
    %c0_14 = arith.constant 0 : index
    %c0_15 = arith.constant 0 : index
    %28 = vector.load %arg7[%c0_14, %c0_15] : memref<1x32xf32, #tpu.memory_space<vmem>>, vector<1x32xf32>
    %29 = arith.mulf %27, %28 : vector<1x32xf32>
    %c0_16 = arith.constant 0 : index
    %c0_17 = arith.constant 0 : index
    %30 = vector.load %arg8[%c0_16, %c0_17] : memref<1x32xf32, #tpu.memory_space<vmem>>, vector<1x32xf32>
    %31 = arith.addf %29, %30 : vector<1x32xf32>
    %c8 = arith.constant 8 : index
    %c0_18 = arith.constant 0 : index
    %32 = vector.load %arg23[%c8, %c0_18] : memref<12x32xf32, #tpu.memory_space<vmem>>, vector<1x32xf32>
    tpu.vector_store %arg23[%c8, %c0_18], %31 {strides = array<i32>} : memref<12x32xf32, #tpu.memory_space<vmem>>, vector<1x32xf32>,
    %33 = vector.extract_strided_slice %5 {offsets = [0, 32], sizes = [1, 32], strides = [1, 1]} : vector<1x128xf32> to vector<1x32xf32>
    %cst_19 = arith.constant dense<0.000000e+00> : vector<1xf32>
    %34 = vector.multi_reduction <add>, %33, %cst_19 [1] : vector<1x32xf32> to vector<1xf32>
    %35 = vector.shape_cast %34 : vector<1xf32> to vector<1x1xf32>
    %cst_20 = arith.constant 3.200000e+01 : f32
    %36 = vector.broadcast %cst_20 : f32 to vector<1x1xf32>
    %37 = arith.divf %35, %36 : vector<1x1xf32>
    %38 = vector.broadcast %37 : vector<1x1xf32> to vector<1x32xf32>
    %39 = arith.subf %33, %38 : vector<1x32xf32>
    %40 = arith.mulf %39, %39 : vector<1x32xf32>
    %cst_21 = arith.constant dense<0.000000e+00> : vector<1xf32>
    %41 = vector.multi_reduction <add>, %40, %cst_21 [1] : vector<1x32xf32> to vector<1xf32>
    %42 = vector.shape_cast %41 : vector<1xf32> to vector<1x1xf32>
    %cst_22 = arith.constant 3.200000e+01 : f32
    %43 = vector.broadcast %cst_22 : f32 to vector<1x1xf32>
    %44 = arith.divf %42, %43 : vector<1x1xf32>
    %45 = vector.broadcast %37 : vector<1x1xf32> to vector<1x32xf32>
    %46 = arith.subf %33, %45 : vector<1x32xf32>
    %cst_23 = arith.constant 9.99999974E-6 : f32
    %47 = vector.broadcast %cst_23 : f32 to vector<1x1xf32>
    %48 = arith.addf %44, %47 : vector<1x1xf32>
    %49 = math.rsqrt %48 : vector<1x1xf32>
    %50 = vector.broadcast %49 : vector<1x1xf32> to vector<1x32xf32>
    %51 = arith.mulf %46, %50 : vector<1x32xf32>
    %c0_24 = arith.constant 0 : index
    %c0_25 = arith.constant 0 : index
    %52 = vector.load %arg7[%c0_24, %c0_25] : memref<1x32xf32, #tpu.memory_space<vmem>>, vector<1x32xf32>
    %53 = arith.mulf %51, %52 : vector<1x32xf32>
    %c0_26 = arith.constant 0 : index
    %c0_27 = arith.constant 0 : index
    %54 = vector.load %arg8[%c0_26, %c0_27] : memref<1x32xf32, #tpu.memory_space<vmem>>, vector<1x32xf32>
    %55 = arith.addf %53, %54 : vector<1x32xf32>
    %c9 = arith.constant 9 : index
    %c0_28 = arith.constant 0 : index
    %56 = vector.load %arg23[%c9, %c0_28] : memref<12x32xf32, #tpu.memory_space<vmem>>, vector<1x32xf32>
    tpu.vector_store %arg23[%c9, %c0_28], %55 {strides = array<i32>} : memref<12x32xf32, #tpu.memory_space<vmem>>, vector<1x32xf32>,
    %57 = vector.extract_strided_slice %5 {offsets = [0, 64], sizes = [1, 32], strides = [1, 1]} : vector<1x128xf32> to vector<1x32xf32>
    %cst_29 = arith.constant dense<0.000000e+00> : vector<1xf32>
    %58 = vector.multi_reduction <add>, %57, %cst_29 [1] : vector<1x32xf32> to vector<1xf32>
    %59 = vector.shape_cast %58 : vector<1xf32> to vector<1x1xf32>
    %cst_30 = arith.constant 3.200000e+01 : f32
    %60 = vector.broadcast %cst_30 : f32 to vector<1x1xf32>
    %61 = arith.divf %59, %60 : vector<1x1xf32>
    %62 = vector.broadcast %61 : vector<1x1xf32> to vector<1x32xf32>
    %63 = arith.subf %57, %62 : vector<1x32xf32>
    %64 = arith.mulf %63, %63 : vector<1x32xf32>
    %cst_31 = arith.constant dense<0.000000e+00> : vector<1xf32>
    %65 = vector.multi_reduction <add>, %64, %cst_31 [1] : vector<1x32xf32> to vector<1xf32>
    %66 = vector.shape_cast %65 : vector<1xf32> to vector<1x1xf32>
    %cst_32 = arith.constant 3.200000e+01 : f32
    %67 = vector.broadcast %cst_32 : f32 to vector<1x1xf32>
    %68 = arith.divf %66, %67 : vector<1x1xf32>
    %69 = vector.broadcast %61 : vector<1x1xf32> to vector<1x32xf32>
    %70 = arith.subf %57, %69 : vector<1x32xf32>
    %cst_33 = arith.constant 9.99999974E-6 : f32
    %71 = vector.broadcast %cst_33 : f32 to vector<1x1xf32>
    %72 = arith.addf %68, %71 : vector<1x1xf32>
    %73 = math.rsqrt %72 : vector<1x1xf32>
    %74 = vector.broadcast %73 : vector<1x1xf32> to vector<1x32xf32>
    %75 = arith.mulf %70, %74 : vector<1x32xf32>
    %c0_34 = arith.constant 0 : index
    %c0_35 = arith.constant 0 : index
    %76 = vector.load %arg7[%c0_34, %c0_35] : memref<1x32xf32, #tpu.memory_space<vmem>>, vector<1x32xf32>
    %77 = arith.mulf %75, %76 : vector<1x32xf32>
    %c0_36 = arith.constant 0 : index
    %c0_37 = arith.constant 0 : index
    %78 = vector.load %arg8[%c0_36, %c0_37] : memref<1x32xf32, #tpu.memory_space<vmem>>, vector<1x32xf32>
    %79 = arith.addf %77, %78 : vector<1x32xf32>
    %c10 = arith.constant 10 : index
    %c0_38 = arith.constant 0 : index
    %80 = vector.load %arg23[%c10, %c0_38] : memref<12x32xf32, #tpu.memory_space<vmem>>, vector<1x32xf32>
    tpu.vector_store %arg23[%c10, %c0_38], %79 {strides = array<i32>} : memref<12x32xf32, #tpu.memory_space<vmem>>, vector<1x32xf32>,
    %81 = vector.extract_strided_slice %5 {offsets = [0, 96], sizes = [1, 32], strides = [1, 1]} : vector<1x128xf32> to vector<1x32xf32>
    %cst_39 = arith.constant dense<0.000000e+00> : vector<1xf32>
    %82 = vector.multi_reduction <add>, %81, %cst_39 [1] : vector<1x32xf32> to vector<1xf32>
    %83 = vector.shape_cast %82 : vector<1xf32> to vector<1x1xf32>
    %cst_40 = arith.constant 3.200000e+01 : f32
    %84 = vector.broadcast %cst_40 : f32 to vector<1x1xf32>
    %85 = arith.divf %83, %84 : vector<1x1xf32>
    %86 = vector.broadcast %85 : vector<1x1xf32> to vector<1x32xf32>
    %87 = arith.subf %81, %86 : vector<1x32xf32>
    %88 = arith.mulf %87, %87 : vector<1x32xf32>
    %cst_41 = arith.constant dense<0.000000e+00> : vector<1xf32>
    %89 = vector.multi_reduction <add>, %88, %cst_41 [1] : vector<1x32xf32> to vector<1xf32>
    %90 = vector.shape_cast %89 : vector<1xf32> to vector<1x1xf32>
    %cst_42 = arith.constant 3.200000e+01 : f32
    %91 = vector.broadcast %cst_42 : f32 to vector<1x1xf32>
    %92 = arith.divf %90, %91 : vector<1x1xf32>
    %93 = vector.broadcast %85 : vector<1x1xf32> to vector<1x32xf32>
    %94 = arith.subf %81, %93 : vector<1x32xf32>
    %cst_43 = arith.constant 9.99999974E-6 : f32
    %95 = vector.broadcast %cst_43 : f32 to vector<1x1xf32>
    %96 = arith.addf %92, %95 : vector<1x1xf32>
    %97 = math.rsqrt %96 : vector<1x1xf32>
    %98 = vector.broadcast %97 : vector<1x1xf32> to vector<1x32xf32>
    %99 = arith.mulf %94, %98 : vector<1x32xf32>
    %c0_44 = arith.constant 0 : index
    %c0_45 = arith.constant 0 : index
    %100 = vector.load %arg7[%c0_44, %c0_45] : memref<1x32xf32, #tpu.memory_space<vmem>>, vector<1x32xf32>
    %101 = arith.mulf %99, %100 : vector<1x32xf32>
    %c0_46 = arith.constant 0 : index
    %c0_47 = arith.constant 0 : index
    %102 = vector.load %arg8[%c0_46, %c0_47] : memref<1x32xf32, #tpu.memory_space<vmem>>, vector<1x32xf32>
    %103 = arith.addf %101, %102 : vector<1x32xf32>
    %c11 = arith.constant 11 : index
    %c0_48 = arith.constant 0 : index
    %104 = vector.load %arg23[%c11, %c0_48] : memref<12x32xf32, #tpu.memory_space<vmem>>, vector<1x32xf32>
    tpu.vector_store %arg23[%c11, %c0_48], %103 {strides = array<i32>} : memref<12x32xf32, #tpu.memory_space<vmem>>, vector<1x32xf32>,
    %c0_49 = arith.constant 0 : index
    %c0_50 = arith.constant 0 : index
    %105 = vector.load %arg23[%c0_49, %c0_50] : memref<12x32xf32, #tpu.memory_space<vmem>>, vector<12x32xf32>
    %106 = arith.index_cast %arg0 : i32 to index
    %c0_51 = arith.constant 0 : index
    %107 = vector.load %arg2[%106, %c0_51] : memref<2x32xf32, #tpu.memory_space<vmem>>, vector<1x32xf32>
    %c0_52 = arith.constant 0 : index
    %c0_53 = arith.constant 0 : index
    %108 = vector.load %arg11[%c0_52, %c0_53] : memref<32x32xf32, #tpu.memory_space<vmem>>, vector<32x32xf32>
    %cst_54 = arith.constant dense<0.000000e+00> : vector<1x32xf32>
    %109 = tpu.matmul %107, %108, %cst_54 {dimension_numbers = #tpu.dot_dimension_numbers<[1], [0], [0], [1], [0, 0, 1, 1], [], []>} : vector<1x32xf32>, vector<32x32xf32>, vector<1x32xf32> -> vector<1x32xf32>
    %c0_55 = arith.constant 0 : index
    %c0_56 = arith.constant 0 : index
    %110 = vector.load %arg12[%c0_55, %c0_56] : memref<1x32xf32, #tpu.memory_space<vmem>>, vector<1x32xf32>
    %111 = arith.addf %109, %110 : vector<1x32xf32>
    %112 = arith.negf %111 : vector<1x32xf32>
    %113 = math.exp %112 : vector<1x32xf32>
    %cst_57 = arith.constant 1.000000e+00 : f32
    %114 = vector.broadcast %cst_57 : f32 to vector<1x32xf32>
    %115 = arith.addf %114, %113 : vector<1x32xf32>
    %116 = arith.divf %114, %115 : vector<1x32xf32>
    %117 = arith.mulf %111, %116 : vector<1x32xf32>
    %c0_58 = arith.constant 0 : index
    %c0_59 = arith.constant 0 : index
    %118 = vector.load %arg13[%c0_58, %c0_59] : memref<32x32xf32, #tpu.memory_space<vmem>>, vector<32x32xf32>
    %cst_60 = arith.constant dense<0.000000e+00> : vector<1x32xf32>
    %119 = tpu.matmul %117, %118, %cst_60 {dimension_numbers = #tpu.dot_dimension_numbers<[1], [0], [0], [1], [0, 0, 1, 1], [], []>} : vector<1x32xf32>, vector<32x32xf32>, vector<1x32xf32> -> vector<1x32xf32>
    %c0_61 = arith.constant 0 : index
    %c0_62 = arith.constant 0 : index
    %120 = vector.load %arg14[%c0_61, %c0_62] : memref<1x32xf32, #tpu.memory_space<vmem>>, vector<1x32xf32>
    %121 = arith.addf %119, %120 : vector<1x32xf32>
    %c0_63 = arith.constant 0 : index
    %c0_64 = arith.constant 0 : index
    %c0_65 = arith.constant 0 : index
    %122 = vector.load %arg1[%c0_63, %c0_64, %c0_65] : memref<1x4x256xf32, #tpu.memory_space<vmem>>, vector<1x4x256xf32>
    %123 = vector.shape_cast %122 : vector<1x4x256xf32> to vector<4x256xf32>
    %c0_66 = arith.constant 0 : index
    %c0_67 = arith.constant 0 : index
    %124 = vector.load %arg9[%c0_66, %c0_67] : memref<32x4xf32, #tpu.memory_space<vmem>>, vector<32x4xf32>
    %cst_68 = arith.constant dense<0.000000e+00> : vector<32x256xf32>
    %125 = tpu.matmul %124, %123, %cst_68 {dimension_numbers = #tpu.dot_dimension_numbers<[1], [0], [0], [1], [0, 0, 1, 1], [], []>} : vector<32x4xf32>, vector<4x256xf32>, vector<32x256xf32> -> vector<32x256xf32>
    %126 = tpu.transpose %125, [1, 0] : vector<32x256xf32> -> vector<256x32xf32>
    %c0_69 = arith.constant 0 : index
    %c0_70 = arith.constant 0 : index
    %127 = vector.load %arg10[%c0_69, %c0_70] : memref<1x32xf32, #tpu.memory_space<vmem>>, vector<1x32xf32>
    %128 = vector.broadcast %127 : vector<1x32xf32> to vector<256x32xf32>
    %129 = arith.addf %126, %128 : vector<256x32xf32>
    %130 = arith.negf %129 : vector<256x32xf32>
    %131 = math.exp %130 : vector<256x32xf32>
    %cst_71 = arith.constant 1.000000e+00 : f32
    %132 = vector.broadcast %cst_71 : f32 to vector<256x32xf32>
    %133 = arith.addf %132, %131 : vector<256x32xf32>
    %134 = arith.divf %132, %133 : vector<256x32xf32>
    %135 = arith.mulf %129, %134 : vector<256x32xf32>
    %136 = vector.broadcast %121 : vector<1x32xf32> to vector<256x32xf32>
    %137 = arith.addf %135, %136 : vector<256x32xf32>
    %cst_72 = arith.constant dense<0.000000e+00> : vector<256xf32>
    %138 = vector.multi_reduction <add>, %137, %cst_72 [1] : vector<256x32xf32> to vector<256xf32>
    %139 = vector.shape_cast %138 : vector<256xf32> to vector<256x1xf32>
    %cst_73 = arith.constant 3.200000e+01 : f32
    %140 = vector.broadcast %cst_73 : f32 to vector<256x1xf32>
    %141 = arith.divf %139, %140 : vector<256x1xf32>
    %142 = vector.broadcast %141 : vector<256x1xf32> to vector<256x32xf32>
    %143 = arith.subf %137, %142 : vector<256x32xf32>
    %144 = arith.mulf %143, %143 : vector<256x32xf32>
    %cst_74 = arith.constant dense<0.000000e+00> : vector<256xf32>
    %145 = vector.multi_reduction <add>, %144, %cst_74 [1] : vector<256x32xf32> to vector<256xf32>
    %146 = vector.shape_cast %145 : vector<256xf32> to vector<256x1xf32>
    %cst_75 = arith.constant 3.200000e+01 : f32
    %147 = vector.broadcast %cst_75 : f32 to vector<256x1xf32>
    %148 = arith.divf %146, %147 : vector<256x1xf32>
    %149 = vector.broadcast %141 : vector<256x1xf32> to vector<256x32xf32>
    %150 = arith.subf %137, %149 : vector<256x32xf32>
    %cst_76 = arith.constant 9.99999974E-6 : f32
    %151 = vector.broadcast %cst_76 : f32 to vector<256x1xf32>
    %152 = arith.addf %148, %151 : vector<256x1xf32>
    %153 = math.rsqrt %152 : vector<256x1xf32>
    %154 = vector.broadcast %153 : vector<256x1xf32> to vector<256x32xf32>
    %155 = arith.mulf %150, %154 : vector<256x32xf32>
    %c0_77 = arith.constant 0 : index
    %c0_78 = arith.constant 0 : index
    %156 = vector.load %arg18[%c0_77, %c0_78] : memref<1x32xf32, #tpu.memory_space<vmem>>, vector<1x32xf32>
    %157 = vector.broadcast %156 : vector<1x32xf32> to vector<256x32xf32>
    %158 = arith.mulf %155, %157 : vector<256x32xf32>
    %c0_79 = arith.constant 0 : index
    %c0_80 = arith.constant 0 : index
    %159 = vector.load %arg19[%c0_79, %c0_80] : memref<1x32xf32, #tpu.memory_space<vmem>>, vector<1x32xf32>
    %160 = vector.broadcast %159 : vector<1x32xf32> to vector<256x32xf32>
    %161 = arith.addf %158, %160 : vector<256x32xf32>
    %c0_81 = arith.constant 0 : index
    %c0_82 = arith.constant 0 : index
    %162 = vector.load %arg15[%c0_81, %c0_82] : memref<32x32xf32, #tpu.memory_space<vmem>>, vector<32x32xf32>
    %cst_83 = arith.constant dense<0.000000e+00> : vector<256x32xf32>
    %163 = tpu.matmul %161, %162, %cst_83 {dimension_numbers = #tpu.dot_dimension_numbers<[1], [0], [0], [1], [0, 0, 1, 1], [], []>} : vector<256x32xf32>, vector<32x32xf32>, vector<256x32xf32> -> vector<256x32xf32>
    %c0_84 = arith.constant 0 : index
    %c0_85 = arith.constant 0 : index
    %164 = vector.load %arg16[%c0_84, %c0_85] : memref<32x64xf32, #tpu.memory_space<vmem>>, vector<32x64xf32>
    %cst_86 = arith.constant dense<0.000000e+00> : vector<12x64xf32>
    %165 = tpu.matmul %105, %164, %cst_86 {dimension_numbers = #tpu.dot_dimension_numbers<[1], [0], [0], [1], [0, 0, 1, 1], [], []>} : vector<12x32xf32>, vector<32x64xf32>, vector<12x64xf32> -> vector<12x64xf32>
    %166 = vector.extract_strided_slice %165 {offsets = [0, 0], sizes = [12, 32], strides = [1, 1]} : vector<12x64xf32> to vector<12x32xf32>
    %167 = vector.extract_strided_slice %165 {offsets = [0, 32], sizes = [12, 32], strides = [1, 1]} : vector<12x64xf32> to vector<12x32xf32>
    %cst_87 = arith.constant dense<0.000000e+00> : vector<256x12xf32>
    %168 = tpu.matmul %163, %166, %cst_87 {dimension_numbers = #tpu.dot_dimension_numbers<[1], [1], [0], [0], [0, 0, 1, 0], [], []>} : vector<256x32xf32>, vector<12x32xf32>, vector<256x12xf32> -> vector<256x12xf32>
    %cst_88 = arith.constant 0.176776692 : f32
    %169 = vector.broadcast %cst_88 : f32 to vector<256x12xf32>
    %170 = arith.mulf %168, %169 : vector<256x12xf32>
    %cst_89 = arith.constant dense<0xFF800000> : vector<256xf32>
    %171 = vector.multi_reduction <maximumf>, %170, %cst_89 [1] : vector<256x12xf32> to vector<256xf32>
    %172 = vector.shape_cast %171 : vector<256xf32> to vector<256x1xf32>
    %173 = vector.broadcast %172 : vector<256x1xf32> to vector<256x12xf32>
    %174 = arith.subf %170, %173 : vector<256x12xf32>
    %175 = math.exp %174 : vector<256x12xf32>
    %cst_90 = arith.constant dense<0.000000e+00> : vector<256xf32>
    %176 = vector.multi_reduction <add>, %175, %cst_90 [1] : vector<256x12xf32> to vector<256xf32>
    %177 = vector.shape_cast %176 : vector<256xf32> to vector<256x1xf32>
    %178 = tpu.reciprocal %177 {approx = true} : vector<256x1xf32> -> vector<256x1xf32>
    %179 = vector.broadcast %178 : vector<256x1xf32> to vector<256x12xf32>
    %180 = arith.mulf %175, %179 : vector<256x12xf32>
    %cst_91 = arith.constant dense<0.000000e+00> : vector<256x32xf32>
    %181 = tpu.matmul %180, %167, %cst_91 {dimension_numbers = #tpu.dot_dimension_numbers<[1], [0], [0], [1], [0, 0, 1, 1], [], []>} : vector<256x12xf32>, vector<12x32xf32>, vector<256x32xf32> -> vector<256x32xf32>
    %c0_92 = arith.constant 0 : index
    %c0_93 = arith.constant 0 : index
    %182 = vector.load %arg17[%c0_92, %c0_93] : memref<32x32xf32, #tpu.memory_space<vmem>>, vector<32x32xf32>
    %cst_94 = arith.constant dense<0.000000e+00> : vector<256x32xf32>
    %183 = tpu.matmul %181, %182, %cst_94 {dimension_numbers = #tpu.dot_dimension_numbers<[1], [0], [0], [1], [0, 0, 1, 1], [], []>} : vector<256x32xf32>, vector<32x32xf32>, vector<256x32xf32> -> vector<256x32xf32>
    %184 = arith.addf %137, %183 : vector<256x32xf32>
    %c0_95 = arith.constant 0 : index
    %c0_96 = arith.constant 0 : index
    %185 = vector.load %arg20[%c0_95, %c0_96] : memref<4x32xf32, #tpu.memory_space<vmem>>, vector<4x32xf32>
    %cst_97 = arith.constant dense<0.000000e+00> : vector<4x256xf32>
    %186 = tpu.matmul %185, %184, %cst_97 {dimension_numbers = #tpu.dot_dimension_numbers<[1], [1], [0], [0], [0, 0, 1, 0], [], []>} : vector<4x32xf32>, vector<256x32xf32>, vector<4x256xf32> -> vector<4x256xf32>
    %c0_98 = arith.constant 0 : index
    %c0_99 = arith.constant 0 : index
    %187 = vector.load %arg21[%c0_98, %c0_99] : memref<4x1xf32, #tpu.memory_space<vmem>>, vector<4x1xf32>
    %188 = vector.broadcast %187 : vector<4x1xf32> to vector<4x256xf32>
    %189 = arith.addf %186, %188 : vector<4x256xf32>
    %c0_100 = arith.constant 0 : index
    %c0_101 = arith.constant 0 : index
    %c0_102 = arith.constant 0 : index
    %190 = vector.load %arg22[%c0_100, %c0_101, %c0_102] : memref<1x4x256xf32, #tpu.memory_space<vmem>>, vector<1x4x256xf32>
    %191 = vector.shape_cast %190 : vector<1x4x256xf32> to vector<4x256xf32>
    %192 = vector.shape_cast %189 : vector<4x256xf32> to vector<1x4x256xf32>
    tpu.vector_store %arg22[%c0_100, %c0_101, %c0_102], %192 {strides = array<i32>} : memref<1x4x256xf32, #tpu.memory_space<vmem>>, vector<1x4x256xf32>,
    return
  }
  func.func @transform_0(%arg0: i32) -> (i32, i32, i32) {
    %c0_i32 = arith.constant 0 : i32
    %c0_i32_0 = arith.constant 0 : i32
    %c0_i32_1 = arith.constant 0 : i32
    return %arg0, %c0_i32, %c0_i32_0 : i32, i32, i32
  }
  func.func @transform_1(%arg0: i32) -> (i32, i32) {
    %c0_i32 = arith.constant 0 : i32
    %c0_i32_0 = arith.constant 0 : i32
    %c0_i32_1 = arith.constant 0 : i32
    return %c0_i32, %c0_i32_0 : i32, i32
  }
  func.func @transform_2(%arg0: i32) -> (i32, i32, i32) {
    %c0_i32 = arith.constant 0 : i32
    %c0_i32_0 = arith.constant 0 : i32
    %c0_i32_1 = arith.constant 0 : i32
    return %arg0, %c0_i32, %c0_i32_0 : i32, i32, i32
  }
  func.func @transform_3(%arg0: i32) -> (i32, i32) {
    %c0_i32 = arith.constant 0 : i32
    %c0_i32_0 = arith.constant 0 : i32
    %c0_i32_1 = arith.constant 0 : i32
    return %c0_i32, %c0_i32_0 : i32, i32
  }
  func.func @transform_4(%arg0: i32) -> (i32, i32) {
    %c0_i32 = arith.constant 0 : i32
    %c0_i32_0 = arith.constant 0 : i32
    %c0_i32_1 = arith.constant 0 : i32
    return %c0_i32, %c0_i32_0 : i32, i32
  }
  func.func @transform_5(%arg0: i32) -> (i32, i32) {
    %c0_i32 = arith.constant 0 : i32
    %c0_i32_0 = arith.constant 0 : i32
    %c0_i32_1 = arith.constant 0 : i32
    return %c0_i32, %c0_i32_0 : i32, i32
  }
  func.func @transform_6(%arg0: i32) -> (i32, i32) {
    %c0_i32 = arith.constant 0 : i32
    %c0_i32_0 = arith.constant 0 : i32
    %c0_i32_1 = arith.constant 0 : i32
    return %c0_i32, %c0_i32_0 : i32, i32
  }
  func.func @transform_7(%arg0: i32) -> (i32, i32) {
    %c0_i32 = arith.constant 0 : i32
    %c0_i32_0 = arith.constant 0 : i32
    %c0_i32_1 = arith.constant 0 : i32
    return %c0_i32, %c0_i32_0 : i32, i32
  }
  func.func @transform_8(%arg0: i32) -> (i32, i32) {
    %c0_i32 = arith.constant 0 : i32
    %c0_i32_0 = arith.constant 0 : i32
    %c0_i32_1 = arith.constant 0 : i32
    return %c0_i32, %c0_i32_0 : i32, i32
  }
  func.func @transform_9(%arg0: i32) -> (i32, i32) {
    %c0_i32 = arith.constant 0 : i32
    %c0_i32_0 = arith.constant 0 : i32
    %c0_i32_1 = arith.constant 0 : i32
    return %c0_i32, %c0_i32_0 : i32, i32
  }
  func.func @transform_10(%arg0: i32) -> (i32, i32) {
    %c0_i32 = arith.constant 0 : i32
    %c0_i32_0 = arith.constant 0 : i32
    %c0_i32_1 = arith.constant 0 : i32
    return %c0_i32, %c0_i32_0 : i32, i32
  }
  func.func @transform_11(%arg0: i32) -> (i32, i32) {
    %c0_i32 = arith.constant 0 : i32
    %c0_i32_0 = arith.constant 0 : i32
    %c0_i32_1 = arith.constant 0 : i32
    return %c0_i32, %c0_i32_0 : i32, i32
  }
  func.func @transform_12(%arg0: i32) -> (i32, i32) {
    %c0_i32 = arith.constant 0 : i32
    %c0_i32_0 = arith.constant 0 : i32
    %c0_i32_1 = arith.constant 0 : i32
    return %c0_i32, %c0_i32_0 : i32, i32
  }
  func.func @transform_13(%arg0: i32) -> (i32, i32) {
    %c0_i32 = arith.constant 0 : i32
    %c0_i32_0 = arith.constant 0 : i32
    %c0_i32_1 = arith.constant 0 : i32
    return %c0_i32, %c0_i32_0 : i32, i32
  }
  func.func @transform_14(%arg0: i32) -> (i32, i32) {
    %c0_i32 = arith.constant 0 : i32
    %c0_i32_0 = arith.constant 0 : i32
    %c0_i32_1 = arith.constant 0 : i32
    return %c0_i32, %c0_i32_0 : i32, i32
  }
  func.func @transform_15(%arg0: i32) -> (i32, i32) {
    %c0_i32 = arith.constant 0 : i32
    %c0_i32_0 = arith.constant 0 : i32
    %c0_i32_1 = arith.constant 0 : i32
    return %c0_i32, %c0_i32_0 : i32, i32
  }
  func.func @transform_16(%arg0: i32) -> (i32, i32) {
    %c0_i32 = arith.constant 0 : i32
    %c0_i32_0 = arith.constant 0 : i32
    %c0_i32_1 = arith.constant 0 : i32
    return %c0_i32, %c0_i32_0 : i32, i32
  }
  func.func @transform_17(%arg0: i32) -> (i32, i32) {
    %c0_i32 = arith.constant 0 : i32
    %c0_i32_0 = arith.constant 0 : i32
    %c0_i32_1 = arith.constant 0 : i32
    return %c0_i32, %c0_i32_0 : i32, i32
  }
  func.func @transform_18(%arg0: i32) -> (i32, i32) {
    %c0_i32 = arith.constant 0 : i32
    %c0_i32_0 = arith.constant 0 : i32
    %c0_i32_1 = arith.constant 0 : i32
    return %c0_i32, %c0_i32_0 : i32, i32
  }
  func.func @transform_19(%arg0: i32) -> (i32, i32) {
    %c0_i32 = arith.constant 0 : i32
    %c0_i32_0 = arith.constant 0 : i32
    %c0_i32_1 = arith.constant 0 : i32
    return %c0_i32, %c0_i32_0 : i32, i32
  }
  func.func @transform_20(%arg0: i32) -> (i32, i32) {
    %c0_i32 = arith.constant 0 : i32
    %c0_i32_0 = arith.constant 0 : i32
    %c0_i32_1 = arith.constant 0 : i32
    return %c0_i32, %c0_i32_0 : i32, i32
  }
  func.func @transform_21(%arg0: i32) -> (i32, i32, i32) {
    %c0_i32 = arith.constant 0 : i32
    %c0_i32_0 = arith.constant 0 : i32
    %c0_i32_1 = arith.constant 0 : i32
    return %arg0, %c0_i32, %c0_i32_0 : i32, i32, i32
  }
}

</mosaic_0001>

<bundles_post_ra>
// kernel: ip_adapter_forward.1
= control target key start
LH: loop header
LB: loop body
LE: loop exit
PB: predicated region body
PF: predicated region fallthrough
CT: control target
= control target key end

     0   :  { %s7038_s0 = inlined_call_operand.vmem [shape: f32[2,4,256], index: 0, kind: input, shape index: {}]   ;;  %s7039_s1 = inlined_call_operand.vmem [shape: f32[2,32], index: 1, kind: input, shape index: {}]   ;;  %s7040_s2 = inlined_call_operand.vmem [shape: f32[2,8,32], index: 2, kind: input, shape index: {}]   ;;  %s7041_s3 = inlined_call_operand.vmem [shape: f32[2,12], index: 3, kind: input, shape index: {}]   ;;  %s7042_s4 = inlined_call_operand.hbm [shape: f32[12,128], index: 4, kind: input, shape index: {}]   ;;  %s7043_s5 = inlined_call_operand.vmem [shape: f32[1,128], index: 5, kind: input, shape index: {}]   ;;  %s7044_s6 = inlined_call_operand.vmem [shape: f32[1,32], index: 6, kind: input, shape index: {}]   ;;  %s7045_s7 = inlined_call_operand.vmem [shape: f32[1,32], index: 7, kind: input, shape index: {}]   ;;  %s7046_s8 = inlined_call_operand.vmem [shape: f32[32,4], index: 8, kind: input, shape index: {}]   ;;  %s7047_s9 = inlined_call_operand.vmem [shape: f32[1,32], index: 9, kind: input, shape index: {}]   ;;  %s7048_s10 = inlined_call_operand.vmem [shape: f32[32,32], index: 10, kind: input, shape index: {}]   ;;  %s7049_s11 = inlined_call_operand.vmem [shape: f32[1,32], index: 11, kind: input, shape index: {}]   ;;  %s7050_s12 = inlined_call_operand.vmem [shape: f32[32,32], index: 12, kind: input, shape index: {}]   ;;  %s7051_s13 = inlined_call_operand.vmem [shape: f32[1,32], index: 13, kind: input, shape index: {}]   ;;  %s7052_s14 = inlined_call_operand.vmem [shape: f32[32,32], index: 14, kind: input, shape index: {}]   ;;  %s7053_s15 = inlined_call_operand.vmem [shape: f32[32,64], index: 15, kind: input, shape index: {}]   ;;  %s7054_s16 = inlined_call_operand.vmem [shape: f32[32,32], index: 16, kind: input, shape index: {}]   ;;  %s7055_s17 = inlined_call_operand.vmem [shape: f32[1,32], index: 17, kind: input, shape index: {}]   ;;  %s7056_s18 = inlined_call_operand.vmem [shape: f32[1,32], index: 18, kind: input, shape index: {}]   ;;  %s7057_s19 = inlined_call_operand.vmem [shape: f32[4,32], index: 19, kind: input, shape index: {}]   ;;  %s7058_s20 = inlined_call_operand.vmem [shape: f32[4,1], index: 20, kind: input, shape index: {}]   ;;  %s7059_s21 = inlined_call_operand.vmem [shape: f32[2,4,256], index: 21, kind: output, shape index: {}]  }
   0x1   :  { %7083 = sst [smem:[#allocation23_spill]] %s7038_s0 }
   0x2   :  { %7084 = sst [smem:[#allocation24_spill]] %s7039_s1 }
   0x3   :  { %7085 = sst [smem:[#allocation25_spill]] %s7040_s2 }
   0x4   :  { %7086 = sst [smem:[#allocation26_spill]] %s7041_s3 }
   0x5   :  { %7087 = sst [smem:[#allocation27_spill]] %s7042_s4 }
   0x6   :  { %7088 = sst [smem:[#allocation28_spill]] %s7043_s5 }
   0x7   :  { %26 = vsyncpa [#allocation4], 0  ;;  %s4927_s2 = smov 0  }
   0x8 LB: > { %7089 = sst [smem:[#allocation6_spill]] %s4807_s2  ;;  %s4936_s28 = sadd.s32 4294967295, %s4807_s2   ;;  %s4807_s2 = sphi %s4927_s2, %s32_s2  }
   0x9   : > { %s7090_s27 = sld [smem:[#allocation27_spill]]  ;;  %p4161_p0 = scmp.ge.s32.totalorder %s4807_s2, 1 }
   0xa   : > { %p514_p1 = scmp.lt.s32.totalorder %s4807_s2, 3  ;;  %p4397_p2 = scmp.eq.s32.totalorder %s4936_s28, 0 }
   0xb   : > { %s4809_s29 = smov [#allocation3]   ;;  %s4810_s4 = smov 128  }
   0xc   : > { %p515_p3 = pnand %p4161_p0, %p514_p1  ;;  %s533_s0 = sshll.u32 %s4809_s29, 4  ;;  %s534_s0 = int_to_ptr.vmem [resolvable:$true] %s533_s0 }
   0xd   : > { %s4811_s30 = smov 8  }
   0xe   : > { %p4393_p4 = pneg %p515_p3  ;;  %612 = sbr.rel (%p515_p3) target bundleno = 2720 (0xaa0), region = 104 }
   0xf   : > { %s531_s3 = sshll.u32 %s7090_s27, 4  ;;  %s532_s3 = int_to_ptr.hbm [resolvable:$true] %s531_s3 }
  0x10   : > { %p4394_p5 = pnand %p4397_p2, %p4393_p4 }
  0x12   : > { %4396 = dma.hbm_to_vmem [thread:$0]  (!%p4394_p5), %s532_s3, 256, %s534_s0, [#allocation4], %s4810_s4, %s4810_s4, %s4811_s30  }
  0x13   : > { %4802 = dma.done.wait (%p4397_p2), [#allocation4], 256  }
  0x14   : > { %4804 = vsyncadd (%p4397_p2), [#allocation4], 4294967040  ;;  %vm700_vm0 = vcmask 1043456   ;;  %s7091_s23 = sld [smem:[#allocation26_spill]]  ;;  %v694_v0 = vld [vmem:[#allocation3 + $0x8] sm:$0xf] }
  0x15   : > { %v693_v1 = vld [vmem:[#allocation3] sm:$0xff]  ;;  %vm696_vm1 = vcmask 97280   ;;  %4171 = vmatpush.msk.msra.mxu1 %vm700_vm0, %v694_v0  ;;  %s7092_s26 = sld [smem:[#allocation28_spill]]  ;;  %s7060_s27 = smov 32   ;;  %v913_v8 = vld [vmem:[%s7048_s10 + $0x10] sm:$0xff]  ;;  %v912_v9 = vld [vmem:[%s7048_s10 + $0x8] sm:$0xff] }
  0x16   : > { %s7064_s3 = smov 96   ;;  %s7062_s29 = smov 64   ;;  %v914_v7 = vld [vmem:[%s7048_s10 + $0x18] sm:$0xff]  ;;  %v911_v10 = vld [vmem:[%s7048_s10] sm:$0xff]  ;;  %vm725_vm2 = vcmask 261120   ;;  %vm996_vm3 = vcmask 31744  }
  0x17   : > { %719 = vmatpush.msra.mxu1 %v693_v1  ;;  %p677_p6 = scmp.lt.s32.totalorder %s4936_s28, 1  ;;  %s7093_s22 = sld [smem:[#allocation23_spill]]  ;;  %v4985_v12 = vld [vmem:[%s7046_s8] sm:$0xff]  ;;  %vm727_vm4 = vcmask 253952   ;;  %v4995_v16 = vld [vmem:[%s7046_s8 + $0x8] sm:$0xff]  ;;  %v5003_v19 = vld [vmem:[%s7046_s8 + $0x10] sm:$0xff] }
  0x18   : > { %s7094_s2 = sld [smem:[#allocation24_spill]]  ;;  %v5011_v22 = vld [vmem:[%s7046_s8 + $0x18] sm:$0xff]  ;;  %v4815_v23 = vmov 32.0   ;;  %s7095_s25 = smov 96   ;;  %v915_v42 = vld [vmem:[%s7049_s11] sm:$0x1] }
  0x19   : > { %s678_s0 = scalar_select %p677_p6, %s4936_s28, 1  ;;  %931 = vmatpush.msrb.mxu1 %v914_v7  ;;  %4427 = vrcp.f32 %v4815_v23  ;;  %v962_v54 = vld [vmem:[%s7050_s12 + $0x18] sm:$0xff]  ;;  %v961_v55 = vld [vmem:[%s7050_s12 + $0x10] sm:$0xff]  ;;  %v960_v58 = vld [vmem:[%s7050_s12 + $0x8] sm:$0xff] }
  0x1a   : > { %s691_s1 = scalar_lea.vmem %s7091_s23, %s4936_s28  ;;  %v959_v60 = vld [vmem:[%s7050_s12] sm:$0xff] }
  0x1b   : > { %v692_v2 = vld [vmem:[%s691_s1] sm:$0x1]  ;;  %s4960_s4 = sshll.u32 %s678_s0, 3  ;;  %932 = vmatpush.msrb.mxu1 %v913_v8  ;;  %s7097_s0 = smov 32  }
  0x1c   : > { %4172 = vmatmul.msk.f32.vlgmr.msra.gmra.mxu1 %vm696_vm1, %v692_v2  ;;  %v695_v3 = vld [vmem:[%s7092_s26] sm:$0x1]  ;;  %s7096_s26 = smov 64  }
  0x1d   : > { %s681_s23 = scalar_lea.vmem %s7093_s22, %s4960_s4  ;;  %933 = vmatpush.msrb.mxu1 %v912_v9  ;;  %v5063_v7 = vld [vmem:[%s7047_s9] ss:$0 sm:$0xff] }
  0x1e   : > { %v987_v6 = vld [vmem:[%s681_s23] sm:$0xff]  ;;  %s909_s30 = scalar_lea.vmem %s7094_s2, %s4936_s28 }
  0x1f   : > { %993 = vst [vmem:[#allocation1] ss:$2 sm:$0xff] %v987_v6  ;;  %v910_v11 = vld [vmem:[%s909_s30] sm:$0x1]  ;;  %934 = vmatpush.msrb.mxu1 %v911_v10  ;;  %v4428_v24 = vpop.eup %4427  ;;  %s7122_s30 = sld [smem:[#allocation25_spill]] }
  0x20   : > { %v732_v25 = vmul.f32 32.0, %v4428_v24  ;;  %vm736_vm5 = vweird.f32 %v4428_v24 }
  0x21   : > { %979 = vmatpush.msra.mxu1 %v962_v54 }
  0x22   : > { %v733_v26 = vsub.f32 1.0, %v732_v25  ;;  %v963_v25 = vld [vmem:[%s7051_s13] sm:$0x1] }
  0x23   : > { %980 = vmatpush.msra.mxu1 %v961_v55 }
  0x24   : > { %4173 = vmatmul.msk.f32.vlgmr.msrb.gmra.mxu1 %vm725_vm2, %v910_v11  ;;  %v734_v27 = vmul.f32 %v4428_v24, %v733_v26 }
  0x25   : > { %981 = vmatpush.msra.mxu1 %v960_v58  ;;  %s685_s5 = scalar_lea.vmem %s7122_s30, %s4960_s4 }
  0x26   : > { %v994_v13 = vld.sshfl [vmem:[#allocation1] sm:$0xff pattern:$0x75316420]  ;;  %v735_v28 = vadd.f32 %v4428_v24, %v734_v27 }
  0x27   : > { %4176 = vmatpush.msk.msra.mxu3 %vm700_vm0, %v994_v13  ;;  %982 = vmatpush.msra.mxu1 %v959_v60 }
  0x28   : > { %4177 = vmatmul.msk.f32.vlgmr.msra.gmra.mxu3 %vm996_vm3, %v4985_v12  ;;  %v5015_v29 = vsel %vm736_vm5, %v4428_v24, %v735_v28 }
  0x30   : > { %4178 = vmatmul.msk.f32.gmra.mxu3 %vm996_vm3, %v4995_v16 }
  0x38   : > { %4179 = vmatmul.msk.f32.gmra.mxu3 %vm996_vm3, %v5003_v19 }
  0x40   : > { %4180 = vmatmul.msk.f32.gmra.mxu3 %vm996_vm3, %v5011_v22 }
  0x99   : > { %v721_v4 = vpop.f32.mrf.mxu1 }
  0x9a   : > { %v4950_v5 = vadd.f32 %v721_v4, %v695_v3 }
  0x9c   : > { %859 = vrot.lane.b32.xlu1 %v4950_v5, %s7060_s27  ;;  %763 = vrot.lane.b32.xlu0 %v4950_v5, %s7064_s3  ;;  %v728_v62 = vsel %vm727_vm4, %v4950_v5, 0.0 }
  0xa1   : > { %v936_v43 = vpop.f32.mrf.mxu1 }
  0xa2   : > { %v937_v44 = vadd.f32 %v936_v43, %v915_v42 }
  0xa4   : > { %811 = vrot.lane.b32.xlu0 %v4950_v5, %s7062_s29  ;;  %v4174_v45 = vmul.f32 -1.442695, %v937_v44 }
  0xa6   : > { %4429 = vpow2.f32 %v4174_v45 }
  0xab   : > { %v1030_v51 = vpop.f32.mrf.mxu3 }
  0xac   : > { %v4430_v46 = vpop.eup %4429 }
  0xad   : > { %v942_v47 = vadd.f32 1.0, %v4430_v46 }
  0xaf   : > { %4431 = vrcp.f32 %v942_v47  ;;  %v954_v50 = vand.u32 2147483648, %v942_v47  ;;  %vm948_vm6 = vweird.f32 %v942_v47  ;;  %v952_v53 = vand.u32 2147483647, %v942_v47 }
  0xb1   : > { %v955_v57 = vor.u32 1.1754944e-38, %v954_v50  ;;  %vm953_vm9 = vcmp.eq.f32.partialorder %v952_v53, 8.507059e+37 }
  0xb3   : > { %v1033_v1 = vpop.f32.mrf.mxu3 }
  0xb5   : > { %v4432_v48 = vpop.eup %4431 }
  0xb6   : > { %v944_v49 = vmul.f32 %v4432_v48, %v942_v47  ;;  %vm949_vm7 = vweird.f32 %v4432_v48 }
  0xb7   : > { %vm950_vm8 = vmor %vm948_vm6, %vm949_vm7 }
  0xb8   : > { %v945_v52 = vsub.f32 1.0, %v944_v49 }
  0xba   : > { %v946_v56 = vmul.f32 %v4432_v48, %v945_v52 }
  0xbb   : > { %v1036_v2 = vpop.f32.mrf.mxu3 }
  0xbc   : > { %v947_v59 = vadd.f32 %v4432_v48, %v946_v56 }
  0xbe   : > { %v951_v61 = vsel %vm950_vm8, %v4432_v48, %v947_v59 }
  0xbf   : > { %v956_v63 = vsel %vm953_vm9, %v955_v57, %v951_v61 }
  0xc0   : > { %v958_v0 = vmul.f32 %v956_v63, %v937_v44 }
  0xc2   : > { %4175 = vmatmul.msk.f32.vlgmr.msra.gmra.mxu1 %vm725_vm2, %v958_v0 }
  0xc3   : > { %v1039_v3 = vpop.f32.mrf.mxu3 }
 0x10e   : > { %v764_v14 = vpop.permute.xlu0 %763  ;;  %v860_v20 = vpop.permute.xlu1 %859 }
 0x10f   : > { %v766_v15 = vsel %vm727_vm4, %v764_v14, 0.0  ;;  %v862_v21 = vsel %vm727_vm4, %v860_v20, 0.0 }
 0x110   : > { %767 = vadd.xlane.f32.xlu1 %v766_v15 }
 0x116   : > { %v812_v17 = vpop.permute.xlu0 %811 }
 0x117   : > { %v814_v18 = vsel %vm727_vm4, %v812_v17, 0.0 }
 0x118   : > { %815 = vadd.xlane.f32.xlu2 %v814_v18 }
 0x120   : > { %863 = vadd.xlane.f32.xlu2 %v862_v21 }
 0x13f   : > { %v984_v26 = vpop.f32.mrf.mxu1 }
 0x183   : > { %v768_v30 = vpop.xlane.xlu1 %767 }
 0x184   : > { %v769_v31 = vmul.f32 %v768_v30, %v5015_v29 }
 0x186   : > { %v5019_v32 = vsub.f32 %v4950_v5, %v769_v31 }
 0x188   : > { %v771_v33 = vmul.f32 %v5019_v32, %v5019_v32 }
 0x18a   : > { %773 = vrot.lane.b32.xlu0 %v771_v33, %s7095_s25 }
 0x18b   : > { %v816_v34 = vpop.xlane.xlu2 %815 }
 0x18c   : > { %v817_v35 = vmul.f32 %v816_v34, %v5015_v29  ;;  %v985_v34 = vadd.f32 %v984_v26, %v963_v25 }
 0x18e   : > { %v5026_v36 = vsub.f32 %v4950_v5, %v817_v35  ;;  %v5070_v42 = vperm.slane %v985_v34, 0 }
 0x190   : > { %v819_v37 = vmul.f32 %v5026_v36, %v5026_v36 }
 0x192   : > { %821 = vrot.lane.b32.xlu2 %v819_v37, %s7096_s26 }
 0x193   : > { %v864_v38 = vpop.xlane.xlu2 %863 }
 0x194   : > { %v865_v39 = vmul.f32 %v864_v38, %v5015_v29 }
 0x196   : > { %v5033_v40 = vsub.f32 %v4950_v5, %v865_v39 }
 0x198   : > { %v867_v41 = vmul.f32 %v5033_v40, %v5033_v40 }
 0x19a   : > { %869 = vrot.lane.b32.xlu0 %v867_v41, %s7097_s0 }
 0x1bb   : > { %729 = vadd.xlane.f32.xlu2 %v728_v62 }
 0x1bc   : > { %1071 = vxpose.xlu0.b32.start [1/4] (short) %v1030_v51, 128 }
 0x1c4   : > { %1072 = vxpose.xlu0.b32.cont [2/4] (short) %v1033_v1, 128  ;;  %v4419_v1 = vld [vmem:[%s7044_s6] ss:$0 sm:$0xff] }
 0x1cc   : > { %1073 = vxpose.xlu0.b32.cont [3/4] (short) %v1036_v2, 128 }
 0x1d4   : > { %1074 = vxpose.xlu0.b32.end [4/4] (short) %v1039_v3, 128  ;;  %v4424_v3 = vld [vmem:[%s7044_s6] ss:$0 sm:$0xff] }
 0x1fc   : > { %v5056_v4 = vpop.permute.xlu0 %773 }
 0x20c   : > { %v5058_v6 = vpop.permute.xlu0 %869 }
 0x260   : > { %v1087_v8 = vpop.trf.xlu0 }
 0x261   : > { %v1139_v9 = vadd.f32 %v5063_v7, %v1087_v8 }
 0x263   : > { %v4186_v10 = vmul.f32 -1.442695, %v1139_v9 }
 0x265   : > { %4433 = vpow2.f32 %v4186_v10 }
 0x268   : > { %v1088_v11 = vpop.trf.xlu0 }
 0x269   : > { %v1140_v13 = vadd.f32 %v5063_v7, %v1088_v11  ;;  %v4420_v11 = vld [vmem:[%s7044_s6] ss:$0 sm:$0xff] }
 0x26b   : > { %v4434_v14 = vpop.eup %4433  ;;  %v4187_v15 = vmul.f32 -1.442695, %v1140_v13 }
 0x26c   : > { %v1267_v17 = vadd.f32 1.0, %v4434_v14 }
 0x26d   : > { %4435 = vpow2.f32 %v4187_v15 }
 0x26e   : > { %4437 = vrcp.f32 %v1267_v17  ;;  %v1310_v28 = vand.u32 2147483648, %v1267_v17  ;;  %v1308_v33 = vand.u32 2147483647, %v1267_v17  ;;  %vm1304_vm11 = vweird.f32 %v1267_v17 }
 0x270   : > { %v1089_v18 = vpop.trf.xlu0  ;;  %v1311_v38 = vor.u32 1.1754944e-38, %v1310_v28  ;;  %vm1309_vm13 = vcmp.eq.f32.partialorder %v1308_v33, 8.507059e+37 }
 0x271   : > { %v5083_v61 = vadd.f32 %v5063_v7, %v1089_v18 }
 0x273   : > { %v4436_v20 = vpop.eup %4435  ;;  %v4188_v62 = vmul.f32 -1.442695, %v5083_v61 }
 0x274   : > { %v4438_v21 = vpop.eup %4437  ;;  %v1268_v23 = vadd.f32 1.0, %v4436_v20 }
 0x275   : > { %v1300_v24 = vmul.f32 %v4438_v21, %v1267_v17  ;;  %vm1305_vm10 = vweird.f32 %v4438_v21 }
 0x276   : > { %4439 = vrcp.f32 %v1268_v23  ;;  %vm1306_vm12 = vmor %vm1304_vm11, %vm1305_vm10  ;;  %vm1319_vm14 = vweird.f32 %v1268_v23  ;;  %v1325_v44 = vand.u32 2147483648, %v1268_v23  ;;  %v1323_v47 = vand.u32 2147483647, %v1268_v23 }
 0x277   : > { %v1301_v27 = vsub.f32 1.0, %v1300_v24  ;;  %4441 = vpow2.f32 %v4188_v62  ;;  %v4423_v24 = vld [vmem:[%s7045_s7] ss:$0 sm:$0xff] }
 0x278   : > { %v1090_v30 = vpop.trf.xlu0  ;;  %v1326_v51 = vor.u32 1.1754944e-38, %v1325_v44  ;;  %vm1324_vm6 = vcmp.eq.f32.partialorder %v1323_v47, 8.507059e+37 }
 0x279   : > { %v1302_v31 = vmul.f32 %v4438_v21, %v1301_v27  ;;  %v5087_v63 = vadd.f32 %v5063_v7, %v1090_v30 }
 0x27b   : > { %v1303_v35 = vadd.f32 %v4438_v21, %v1302_v31  ;;  %v4189_v2 = vmul.f32 -1.442695, %v5087_v63 }
 0x27c   : > { %v4440_v37 = vpop.eup %4439 }
 0x27d   : > { %v1307_v39 = vsel %vm1306_vm12, %v4438_v21, %v1303_v35  ;;  %v1315_v41 = vmul.f32 %v4440_v37, %v1268_v23  ;;  %vm1320_vm15 = vweird.f32 %v4440_v37  ;;  %v4442_v8 = vpop.eup %4441  ;;  %4443 = vpow2.f32 %v4189_v2  ;;  %v4422_v21 = vld [vmem:[%s7045_s7] ss:$0 sm:$0xff] }
 0x27e   : > { %v1312_v43 = vsel %vm1309_vm13, %v1311_v38, %v1307_v39  ;;  %vm1321_vm5 = vmor %vm1319_vm14, %vm1320_vm15  ;;  %v1269_v14 = vadd.f32 1.0, %v4442_v8 }
 0x27f   : > { %v1779_v45 = vmul.f32 %v1312_v43, %v1139_v9  ;;  %v1316_v46 = vsub.f32 1.0, %v1315_v41 }
 0x280   : > { %v1091_v48 = vpop.trf.xlu0  ;;  %4445 = vrcp.f32 %v1269_v14  ;;  %vm1334_vm7 = vweird.f32 %v1269_v14 }
 0x281   : > { %v1317_v49 = vmul.f32 %v4440_v37, %v1316_v46  ;;  %v5073_v50 = vadd.f32 %v5070_v42, %v1779_v45  ;;  %v5098_v9 = vadd.f32 %v5063_v7, %v1091_v48 }
 0x283   : > { %v1318_v52 = vadd.f32 %v4440_v37, %v1317_v49  ;;  %v1844_v53 = vsel %vm725_vm2, %v5073_v50, 0.0  ;;  %v4190_v15 = vmul.f32 -1.442695, %v5098_v9  ;;  %v4444_v17 = vpop.eup %4443 }
 0x284   : > { %1845 = vadd.xlane.f32.xlu1 %v1844_v53  ;;  %v5116_v23 = vadd.f32 1.0, %v4444_v17 }
 0x285   : > { %v1322_v54 = vsel %vm1321_vm5, %v4440_v37, %v1318_v52  ;;  %4447 = vpow2.f32 %v4190_v15 }
 0x286   : > { %v1327_v55 = vsel %vm1324_vm6, %v1326_v51, %v1322_v54  ;;  %v5125_v27 = vpop.eup %4445  ;;  %4449 = vrcp.f32 %v5116_v23  ;;  %v5152_v51 = vpop.permute.xlu2 %821  ;;  %vm1349_vm11 = vweird.f32 %v5116_v23  ;;  %v1353_v15 = vand.u32 2147483647, %v5116_v23 }
 0x287   : > { %v1780_v56 = vmul.f32 %v1327_v55, %v1140_v13  ;;  %v4421_v13 = vld [vmem:[%s7045_s7] ss:$0 sm:$0xff]  ;;  %v1330_v31 = vmul.f32 %v5125_v27, %v1269_v14  ;;  %vm1335_vm8 = vweird.f32 %v5125_v27  ;;  %v1338_v55 = vand.u32 2147483647, %v1269_v14 }
 0x288   : > { %v1092_v57 = vpop.trf.xlu0  ;;  %vm5168_vm9 = vmor %vm1334_vm7, %vm1335_vm8  ;;  %v1355_v17 = vand.u32 2147483648, %v5116_v23  ;;  %vm5212_vm14 = vcmp.eq.f32.partialorder %v1353_v15, 8.507059e+37 }
 0x289   : > { %v5078_v58 = vadd.f32 %v5070_v42, %v1780_v56  ;;  %v5111_v18 = vadd.f32 %v5063_v7, %v1092_v57  ;;  %v1331_v41 = vsub.f32 1.0, %v1330_v31  ;;  %v1340_v56 = vand.u32 2147483648, %v1269_v14 }
 0x28a   : > { %vm5175_vm10 = vcmp.eq.f32.partialorder %v1338_v55, 8.507059e+37 }
 0x28b   : > { %v1847_v59 = vsel %vm725_vm2, %v5078_v58, 0.0  ;;  %v4191_v25 = vmul.f32 -1.442695, %v5111_v18  ;;  %v4448_v28 = vpop.eup %4447  ;;  %v1332_v48 = vmul.f32 %v5125_v27, %v1331_v41 }
 0x28c   : > { %1848 = vadd.xlane.f32.xlu2 %v1847_v59  ;;  %v5132_v33 = vadd.f32 1.0, %v4448_v28  ;;  %v5142_v38 = vpop.eup %4449 }
 0x28d   : > { %4451 = vpow2.f32 %v4191_v25  ;;  %v1345_v45 = vmul.f32 %v5142_v38, %v5116_v23  ;;  %v1333_v62 = vadd.f32 %v5125_v27, %v1332_v48  ;;  %vm1350_vm12 = vweird.f32 %v5142_v38 }
 0x28e   : > { %vm5202_vm13 = vmor %vm1349_vm11, %vm1350_vm12  ;;  %vm1364_vm15 = vweird.f32 %v5132_v33 }
 0x28f   : > { %v1346_v57 = vsub.f32 1.0, %v1345_v45  ;;  %v1337_v14 = vsel %vm5168_vm9, %v5125_v27, %v1333_v62  ;;  %v1370_v62 = vand.u32 2147483648, %v5132_v33 }
 0x290   : > { %v1093_v60 = vpop.trf.xlu0 }
 0x291   : > { %v5135_v34 = vadd.f32 %v5063_v7, %v1093_v60 }
 0x293   : > { %v4452_v39 = vpop.eup %4451  ;;  %v4192_v43 = vmul.f32 -1.442695, %v5135_v34 }
 0x294   : > { %v5149_v46 = vadd.f32 1.0, %v4452_v39 }
 0x296   : > { %vm1379_vm8 = vweird.f32 %v5149_v46 }
 0x298   : > { %v1094_v0 = vpop.trf.xlu0 }
 0x299   : > { %v5123_v26 = vadd.f32 %v5063_v7, %v1094_v0 }
 0x29b   : > { %v4193_v30 = vmul.f32 -1.442695, %v5123_v26 }
 0x29d   : > { %795 = vrot.lane.b32.xlu1 %v4419_v1, %s7097_s0  ;;  %4453 = vpow2.f32 %v4193_v30 }
 0x29e   : > { %4455 = vrcp.f32 %v5132_v33 }
 0x29f   : > { %4457 = vpow2.f32 %v4192_v43 }
 0x2a0   : > { %v1095_v10 = vpop.trf.xlu0 }
 0x2a1   : > { %v5140_v37 = vadd.f32 %v5063_v7, %v1095_v10  ;;  %v1341_v10 = vor.u32 1.1754944e-38, %v1340_v56  ;;  %v1368_v56 = vand.u32 2147483647, %v5132_v33 }
 0x2a2   : > { %891 = vrot.lane.b32.xlu0 %v4424_v3, %s7095_s25 }
 0x2a3   : > { %v4194_v44 = vmul.f32 -1.442695, %v5140_v37  ;;  %v4454_v47 = vpop.eup %4453  ;;  %v1342_v27 = vsel %vm5175_vm10, %v1341_v10, %v1337_v14  ;;  %vm5246_vm7 = vcmp.eq.f32.partialorder %v1368_v56, 8.507059e+37 }
 0x2a4   : > { %843 = vrot.lane.b32.xlu2 %v4420_v11, %s7096_s26  ;;  %v5160_v54 = vpop.eup %4455  ;;  %v5164_v59 = vadd.f32 1.0, %v4454_v47  ;;  %v1347_v11 = vmul.f32 %v5142_v38, %v1346_v57  ;;  %v1781_v23 = vmul.f32 %v1342_v27, %v5083_v61 }
 0x2a5   : > { %802 = vrot.lane.b32.xlu1 %v4421_v13, %s7097_s0  ;;  %4459 = vpow2.f32 %v4194_v44  ;;  %v1360_v1 = vmul.f32 %v5160_v54, %v5132_v33  ;;  %v4458_v3 = vpop.eup %4457  ;;  %vm1365_vm5 = vweird.f32 %v5160_v54 }
 0x2a6   : > { %4461 = vrcp.f32 %v5149_v46  ;;  %v5192_v28 = vadd.f32 1.0, %v4458_v3  ;;  %v1348_v31 = vadd.f32 %v5142_v38, %v1347_v11  ;;  %vm5235_vm6 = vmor %vm1364_vm15, %vm1365_vm5  ;;  %v5251_v14 = vadd.f32 %v5070_v42, %v1781_v23 }
 0x2a7   : > { %v1361_v25 = vsub.f32 1.0, %v1360_v1  ;;  %v1415_v11 = vand.u32 2147483648, %v5164_v59 }
 0x2a8   : > { %v1096_v20 = vpop.trf.xlu0  ;;  %v1850_v56 = vsel %vm725_vm2, %v5251_v14, 0.0 }
 0x2a9   : > { %v5155_v52 = vadd.f32 %v5063_v7, %v1096_v20  ;;  %v1362_v55 = vmul.f32 %v5160_v54, %v1361_v25 }
 0x2ab   : > { %v4195_v2 = vmul.f32 -1.442695, %v5155_v52  ;;  %v4460_v13 = vpop.eup %4459 }
 0x2ac   : > { %850 = vrot.lane.b32.xlu2 %v4422_v21, %s7096_s26  ;;  %v5189_v21 = vpop.eup %4461  ;;  %v5197_v39 = vadd.f32 1.0, %v4460_v13  ;;  %v1371_v13 = vor.u32 1.1754944e-38, %v1370_v62 }
 0x2ad   : > { %898 = vrot.lane.b32.xlu1 %v4423_v24, %s7095_s25  ;;  %v730_v24 = vpop.xlane.xlu2 %729  ;;  %v1375_v44 = vmul.f32 %v5189_v21, %v5149_v46  ;;  %vm1380_vm9 = vweird.f32 %v5189_v21 }
 0x2ae   : > { %v738_v41 = vmul.f32 %v5015_v29, %v730_v24  ;;  %v1383_v24 = vand.u32 2147483647, %v5149_v46  ;;  %vm5283_vm12 = vmor %vm1379_vm8, %vm1380_vm9  ;;  %vm1394_vm8 = vweird.f32 %v5192_v28 }
 0x2af   : > { %v1376_v0 = vsub.f32 1.0, %v1375_v44 }
 0x2b0   : > { %v5137_v35 = vpop.trf.xlu0  ;;  %v5244_v10 = vsub.f32 %v4950_v5, %v738_v41 }
 0x2b8   : > { %v1098_v49 = vpop.trf.xlu0 }
 0x2b9   : > { %v5158_v53 = vadd.f32 %v5063_v7, %v1098_v49  ;;  %v1356_v49 = vor.u32 1.1754944e-38, %v1355_v17  ;;  %v1377_v17 = vmul.f32 %v5189_v21, %v1376_v0 }
 0x2bb   : > { %v4197_v60 = vmul.f32 -1.442695, %v5158_v53 }
 0x2bd   : > { %4463 = vpow2.f32 %v4197_v60  ;;  %v1352_v60 = vsel %vm5202_vm13, %v5142_v38, %v1348_v31  ;;  %v1385_v31 = vand.u32 2147483648, %v5149_v46  ;;  %vm5287_vm13 = vcmp.eq.f32.partialorder %v1383_v24, 8.507059e+37 }
 0x2be   : > { %4465 = vrcp.f32 %v5164_v59  ;;  %v1357_v3 = vsel %vm5212_vm14, %v1356_v49, %v1352_v60  ;;  %vm1409_vm14 = vweird.f32 %v5164_v59 }
 0x2bf   : > { %4467 = vpow2.f32 %v4195_v2  ;;  %v1363_v2 = vadd.f32 %v5160_v54, %v1362_v55  ;;  %v1782_v5 = vmul.f32 %v1357_v3, %v5087_v63  ;;  %v1386_v8 = vor.u32 1.1754944e-38, %v1385_v31 }
 0x2c0   : > { %v5187_v20 = vpop.trf.xlu0  ;;  %4469 = vrcp.f32 %v5192_v28 }
 0x2c1   : > { %v1367_v27 = vsel %vm5235_vm6, %v5160_v54, %v1363_v2  ;;  %v1378_v54 = vadd.f32 %v5189_v21, %v1377_v17 }
 0x2c3   : > { %v4464_v30 = vpop.eup %4463  ;;  %v1382_v24 = vsel %vm5283_vm12, %v5189_v21, %v1378_v54  ;;  %v740_v21 = vmul.f32 %v5244_v10, %v5244_v10 }
 0x2c4   : > { %v5208_v45 = vadd.f32 1.0, %v4464_v30  ;;  %v5210_v47 = vpop.eup %4465 }
 0x2c5   : > { %v4468_v57 = vpop.eup %4467  ;;  %v1405_v61 = vmul.f32 %v5210_v47, %v5164_v59  ;;  %vm1410_vm15 = vweird.f32 %v5210_v47 }
 0x2c6   : > { %4471 = vrcp.f32 %v5208_v45  ;;  %v5239_v38 = vadd.f32 1.0, %v4468_v57  ;;  %v5241_v33 = vpop.eup %4469  ;;  %v1475_v44 = vand.u32 2147483648, %v5208_v45  ;;  %vm1469_vm10 = vweird.f32 %v5208_v45 }
 0x2c7   : > { %4473 = vrcp.f32 %v5197_v39  ;;  %v1406_v25 = vsub.f32 1.0, %v1405_v61  ;;  %v1390_v43 = vmul.f32 %v5241_v33, %v5192_v28  ;;  %v1473_v63 = vand.u32 2147483647, %v5208_v45 }
 0x2c8   : > { %v5230_v1 = vpop.trf.xlu0  ;;  %4475 = vrcp.f32 %v5239_v38  ;;  %v1372_v57 = vsel %vm5246_vm7, %v1371_v13, %v1367_v27  ;;  %v5292_v61 = vadd.f32 %v5070_v42, %v1782_v5  ;;  %v1476_v3 = vor.u32 1.1754944e-38, %v1475_v44  ;;  %vm5312_vm7 = vmor %vm1409_vm14, %vm1410_vm15 }
 0x2c9   : > { %v1407_v49 = vmul.f32 %v5210_v47, %v1406_v25  ;;  %v1391_v2 = vsub.f32 1.0, %v1390_v43  ;;  %vm1474_vm6 = vcmp.eq.f32.partialorder %v1473_v63, 8.507059e+37  ;;  %v1783_v27 = vmul.f32 %v1372_v57, %v5098_v9 }
 0x2ca   : > { %v1853_v43 = vsel %vm725_vm2, %v5292_v61, 0.0  ;;  %v1398_v9 = vand.u32 2147483647, %v5192_v28  ;;  %vm1395_vm9 = vweird.f32 %v5241_v33  ;;  %v1400_v57 = vand.u32 2147483648, %v5192_v28 }
 0x2cb   : > { %v1408_v25 = vadd.f32 %v5210_v47, %v1407_v49  ;;  %v1392_v44 = vmul.f32 %v5241_v33, %v1391_v2  ;;  %v741_v28 = vsel %vm727_vm4, %v740_v21, 0.0 }
 0x2cc   : > { %v4472_v15 = vpop.eup %4471  ;;  %vm1399_vm15 = vcmp.eq.f32.partialorder %v1398_v9, 8.507059e+37 }
 0x2cd   : > { %v5256_v30 = vpop.eup %4473  ;;  %v1465_v41 = vmul.f32 %v4472_v15, %v5208_v45  ;;  %vm1470_vm11 = vweird.f32 %v4472_v15  ;;  %v1413_v45 = vand.u32 2147483647, %v5164_v59  ;;  %v1412_v54 = vsel %vm5312_vm7, %v5210_v47, %v1408_v25 }
 0x2ce   : > { %v1420_v55 = vmul.f32 %v5256_v30, %v5197_v39  ;;  %vm5299_vm5 = vmor %vm1469_vm10, %vm1470_vm11  ;;  %v5304_v17 = vpop.eup %4475  ;;  %vm1424_vm11 = vweird.f32 %v5197_v39  ;;  %vm1425_vm12 = vweird.f32 %v5256_v30  ;;  %v1401_v25 = vor.u32 1.1754944e-38, %v1400_v57 }
 0x2cf   : > { %v1466_v48 = vsub.f32 1.0, %v1465_v41  ;;  %vm1414_vm10 = vcmp.eq.f32.partialorder %v1413_v45, 8.507059e+37  ;;  %vm5364_vm14 = vmor %vm1424_vm11, %vm1425_vm12  ;;  %vm1440_vm7 = vweird.f32 %v5304_v17 }
 0x2d0   : > { %v5275_v23 = vpop.trf.xlu0  ;;  %v1421_v5 = vsub.f32 1.0, %v1420_v55  ;;  %v1435_v55 = vmul.f32 %v5304_v17, %v5239_v38 }
 0x2d1   : > { %v1467_v0 = vmul.f32 %v4472_v15, %v1466_v48  ;;  %v1387_v48 = vsel %vm5287_vm13, %v1386_v8, %v1382_v24  ;;  %vm5353_vm13 = vmor %vm1394_vm8, %vm1395_vm9 }
 0x2d2   : > { %v1422_v49 = vmul.f32 %v5256_v30, %v1421_v5  ;;  %v1784_v47 = vmul.f32 %v1387_v48, %v5111_v18  ;;  %v1436_v24 = vsub.f32 1.0, %v1435_v55 }
 0x2d3   : > { %v1468_v13 = vadd.f32 %v4472_v15, %v1467_v0  ;;  %v1393_v0 = vadd.f32 %v5241_v33, %v1392_v44 }
 0x2d4   : > { %v1437_v21 = vmul.f32 %v5304_v17, %v1436_v24 }
 0x2d5   : > { %v1472_v31 = vsel %vm5299_vm5, %v4472_v15, %v1468_v13  ;;  %1851 = vadd.xlane.f32.xlu2 %v1850_v56  ;;  %v1416_v15 = vor.u32 1.1754944e-38, %v1415_v11  ;;  %v1423_v11 = vadd.f32 %v5256_v30, %v1422_v49  ;;  %v1428_v13 = vand.u32 2147483647, %v5197_v39 }
 0x2d6   : > { %v1477_v59 = vsel %vm1474_vm6, %v1476_v3, %v1472_v31  ;;  %v1430_v3 = vand.u32 2147483648, %v5197_v39  ;;  %v1397_v5 = vsel %vm5353_vm13, %v5241_v33, %v1393_v0  ;;  %v5375_v31 = vadd.f32 %v5070_v42, %v1784_v47 }
 0x2d7   : > { %v1790_v63 = vmul.f32 %v1477_v59, %v5158_v53  ;;  %1854 = vadd.xlane.f32.xlu1 %v1853_v43  ;;  %v5343_v53 = vadd.f32 %v5070_v42, %v1783_v27  ;;  %v1417_v46 = vsel %vm1414_vm10, %v1416_v15, %v1412_v54  ;;  %v1427_v43 = vsel %vm5364_vm14, %v5256_v30, %v1423_v11 }
 0x2d8   : > { %v1102_v56 = vpop.trf.xlu0  ;;  %v1786_v27 = vmul.f32 %v1417_v46, %v5123_v26  ;;  %v1431_v41 = vor.u32 1.1754944e-38, %v1430_v3  ;;  %vm1429_vm5 = vcmp.eq.f32.partialorder %v1428_v13, 8.507059e+37  ;;  %v1402_v44 = vsel %vm1399_vm15, %v1401_v25, %v1397_v5 }
 0x2d9   : > { %v5337_v60 = vadd.f32 %v5070_v42, %v1790_v63  ;;  %v5340_v62 = vadd.f32 %v5063_v7, %v1102_v56  ;;  %v1856_v39 = vsel %vm725_vm2, %v5343_v53, 0.0  ;;  %vm1439_vm6 = vweird.f32 %v5239_v38 }
 0x2da   : > { %v5384_v26 = vadd.f32 %v5070_v42, %v1786_v27  ;;  %v1432_v9 = vsel %vm1429_vm5, %v1431_v41, %v1427_v43  ;;  %v1445_v59 = vand.u32 2147483648, %v5239_v38  ;;  %v1859_v48 = vsel %vm725_vm2, %v5375_v31, 0.0  ;;  %vm1441_vm8 = vmor %vm1439_vm6, %vm1440_vm7 }
 0x2db   : > { %v4201_v8 = vmul.f32 -1.442695, %v5340_v62  ;;  %v1877_v18 = vsel %vm725_vm2, %v5337_v60, 0.0  ;;  %v1785_v30 = vmul.f32 %v1402_v44, %v5135_v34  ;;  %v1438_v15 = vadd.f32 %v5304_v17, %v1437_v21 }
 0x2dc   : > { %1878 = vadd.xlane.f32.xlu0 %v1877_v18  ;;  %v1443_v63 = vand.u32 2147483647, %v5239_v38  ;;  %v1787_v49 = vmul.f32 %v1432_v9, %v5140_v37  ;;  %v1865_v55 = vsel %vm725_vm2, %v5384_v26, 0.0  ;;  %v1446_v56 = vor.u32 1.1754944e-38, %v1445_v59 }
 0x2dd   : > { %4477 = vpow2.f32 %v4201_v8  ;;  %742 = vadd.xlane.f32.xlu2 %v741_v28  ;;  %v1442_v57 = vsel %vm1441_vm8, %v5304_v17, %v1438_v15  ;;  %v5397_v34 = vadd.f32 %v5070_v42, %v1785_v30  ;;  %v995_v9 = vld.sshfl [vmem:[#allocation1 + $0x8] sm:$0xff pattern:$0x75316420]  ;;  %v776_v15 = vsel %vm727_vm4, %v5056_v4, 0.0 }
 0x2de   : > { %vm1444_vm9 = vcmp.eq.f32.partialorder %v1443_v63, 8.507059e+37  ;;  %v5400_v47 = vadd.f32 %v5070_v42, %v1787_v49  ;;  %4181 = vmatpush.msk.msra.mxu0 %vm700_vm0, %v995_v9  ;;  %v2623_v9 = vld [vmem:[%s7052_s14 + $0x18] sm:$0xff] }
 0x2df   : > { %1857 = vadd.xlane.f32.xlu1 %v1856_v39  ;;  %v1447_v38 = vsel %vm1444_vm9, %v1446_v56, %v1442_v57  ;;  %v1862_v37 = vsel %vm725_vm2, %v5397_v34, 0.0  ;;  %4182 = vmatmul.msk.f32.vlgmr.msra.gmra.mxu0 %vm996_vm3, %v4985_v12  ;;  %v872_v12 = vsel %vm727_vm4, %v5058_v6, 0.0 }
 0x2e0   : > { %v1788_v46 = vmul.f32 %v1447_v38, %v5155_v52  ;;  %v1868_v17 = vsel %vm725_vm2, %v5400_v47, 0.0  ;;  %2732 = vmatpush.msrb.mxu1 %v2623_v9  ;;  %v5511_v9 = vld [vmem:[%s7055_s17] ss:$0 sm:$0xff] }
 0x2e2   : > { %v5408_v24 = vadd.f32 %v5070_v42, %v1788_v46 }
 0x2e3   : > { %v4478_v33 = vpop.eup %4477 }
 0x2e4   : > { %v1282_v54 = vadd.f32 1.0, %v4478_v33  ;;  %v1871_v52 = vsel %vm725_vm2, %v5408_v24, 0.0 }
 0x2e5   : > { %1860 = vadd.xlane.f32.xlu2 %v1859_v48 }
 0x2e6   : > { %4479 = vrcp.f32 %v1282_v54  ;;  %v1535_v3 = vand.u32 2147483648, %v1282_v54  ;;  %vm1529_vm10 = vweird.f32 %v1282_v54  ;;  %v1533_v18 = vand.u32 2147483647, %v1282_v54 }
 0x2e7   : > { %1866 = vadd.xlane.f32.xlu1 %v1865_v55  ;;  %4183 = vmatmul.msk.f32.gmra.mxu0 %vm996_vm3, %v4995_v16 }
 0x2e8   : > { %v1536_v13 = vor.u32 1.1754944e-38, %v1535_v3  ;;  %vm1534_vm13 = vcmp.eq.f32.partialorder %v1533_v18, 8.507059e+37 }
 0x2ec   : > { %v4480_v0 = vpop.eup %4479 }
 0x2ed   : > { %v1525_v2 = vmul.f32 %v4480_v0, %v1282_v54  ;;  %1863 = vadd.xlane.f32.xlu2 %v1862_v37  ;;  %vm1530_vm11 = vweird.f32 %v4480_v0  ;;  %v824_v54 = vsel %vm727_vm4, %v5152_v51, 0.0 }
 0x2ee   : > { %vm1531_vm12 = vmor %vm1529_vm10, %vm1530_vm11 }
 0x2ef   : > { %v1526_v8 = vsub.f32 1.0, %v1525_v2  ;;  %1869 = vadd.xlane.f32.xlu1 %v1868_v17  ;;  %4184 = vmatmul.msk.f32.gmra.mxu0 %vm996_vm3, %v5003_v19 }
 0x2f1   : > { %v1527_v11 = vmul.f32 %v4480_v0, %v1526_v8 }
 0x2f3   : > { %v1528_v28 = vadd.f32 %v4480_v0, %v1527_v11 }
 0x2f5   : > { %v1532_v25 = vsel %vm1531_vm12, %v4480_v0, %v1528_v28 }
 0x2f6   : > { %v1537_v45 = vsel %vm1534_vm13, %v1536_v13, %v1532_v25 }
 0x2f7   : > { %v1794_v5 = vmul.f32 %v1537_v45, %v5340_v62  ;;  %v1846_v27 = vpop.xlane.xlu1 %1845  ;;  %1872 = vadd.xlane.f32.xlu1 %v1871_v52  ;;  %4185 = vmatmul.msk.f32.gmra.mxu0 %vm996_vm3, %v5011_v22 }
 0x2f8   : > { %v1940_v39 = vmul.f32 %v1846_v27, %v5015_v29 }
 0x2f9   : > { %v5415_v41 = vadd.f32 %v5070_v42, %v1794_v5 }
 0x2fa   : > { %v5418_v43 = vsub.f32 %v5073_v50, %v1940_v39  ;;  %v757_v39 = vld [vmem:[%s7044_s6] sm:$0x1] }
 0x2fb   : > { %v1889_v21 = vsel %vm725_vm2, %v5415_v41, 0.0 }
 0x2fc   : > { %1890 = vadd.xlane.f32.xlu0 %v1889_v21  ;;  %v2004_v44 = vmul.f32 %v5418_v43, %v5418_v43 }
 0x2fe   : > { %v2036_v33 = vsel %vm725_vm2, %v2004_v44, 0.0 }
 0x2ff   : > { %2037 = vadd.xlane.f32.xlu1 %v2036_v33  ;;  %v1849_v62 = vpop.xlane.xlu2 %1848  ;;  %v759_v33 = vld [vmem:[%s7045_s7] sm:$0x1] }
 0x300   : > { %v1941_v59 = vmul.f32 %v1849_v62, %v5015_v29 }
 0x302   : > { %v5430_v48 = vsub.f32 %v5078_v58, %v1941_v59 }
 0x304   : > { %v2005_v30 = vmul.f32 %v5430_v48, %v5430_v48 }
 0x306   : > { %v2039_v63 = vsel %vm725_vm2, %v2005_v30, 0.0 }
 0x307   : > { %777 = vadd.xlane.f32.xlu1 %v776_v15  ;;  %2040 = vadd.xlane.f32.xlu2 %v2039_v63  ;;  %v5449_v49 = vpop.permute.xlu2 %843  ;;  %v2622_v15 = vld [vmem:[%s7052_s14 + $0x10] sm:$0xff] }
 0x308   : > { %2733 = vmatpush.msrb.mxu1 %v2622_v15 }
 0x30f   : > { %825 = vadd.xlane.f32.xlu1 %v824_v54  ;;  %v5447_v4 = vpop.permute.xlu1 %795  ;;  %v5453_v16 = vpop.permute.xlu2 %850  ;;  %v2620_v54 = vld [vmem:[%s7052_s14] sm:$0xff] }
 0x317   : > { %873 = vadd.xlane.f32.xlu1 %v872_v12  ;;  %v5451_v55 = vpop.permute.xlu1 %802 }
 0x31f   : > { %v5455_v51 = vpop.permute.xlu1 %898 }
 0x348   : > { %v1852_v56 = vpop.xlane.xlu2 %1851 }
 0x349   : > { %v1942_v19 = vmul.f32 %v1852_v56, %v5015_v29 }
 0x34a   : > { %v1855_v57 = vpop.xlane.xlu1 %1854 }
 0x34b   : > { %v5459_v6 = vsub.f32 %v5251_v14, %v1942_v19  ;;  %v1943_v38 = vmul.f32 %v1855_v57, %v5015_v29 }
 0x34d   : > { %v2006_v22 = vmul.f32 %v5459_v6, %v5459_v6  ;;  %v5465_v0 = vsub.f32 %v5292_v61, %v1943_v38 }
 0x34f   : > { %v2042_v37 = vsel %vm725_vm2, %v2006_v22, 0.0  ;;  %v2007_v8 = vmul.f32 %v5465_v0, %v5465_v0 }
 0x350   : > { %2043 = vadd.xlane.f32.xlu2 %v2042_v37  ;;  %v743_v2 = vpop.xlane.xlu2 %742 }
 0x351   : > { %v744_v46 = vmul.f32 %v743_v2, %v5015_v29  ;;  %v2045_v18 = vsel %vm725_vm2, %v2007_v8, 0.0 }
 0x352   : > { %v5469_v3 = vpop.xlane.xlu1 %1857 }
 0x353   : > { %v745_v17 = vadd.f32 1e-05, %v744_v46 }
 0x355   : > { %4481 = vrsqrt.f32 %v745_v17  ;;  %vm752_vm14 = vweird.f32 %v745_v17 }
 0x358   : > { %2046 = vadd.xlane.f32.xlu2 %v2045_v18  ;;  %v5485_v62 = vpop.xlane.xlu2 %1860 }
 0x35a   : > { %v5474_v11 = vpop.xlane.xlu1 %1866 }
 0x35b   : > { %v4482_v13 = vpop.eup %4481 }
 0x35c   : > { %v747_v28 = vmul.f32 %v4482_v13, %v745_v17  ;;  %vm753_vm3 = vweird.f32 %v4482_v13 }
 0x35d   : > { %vm754_vm15 = vmor %vm752_vm14, %vm753_vm3 }
 0x35e   : > { %v748_v25 = vmul.f32 %v4482_v13, %v747_v28 }
 0x360   : > { %v749_v45 = vmul.f32 0.5, %v748_v25  ;;  %v5502_v12 = vpop.xlane.xlu2 %1863 }
 0x362   : > { %v750_v52 = vsub.f32 1.5, %v749_v45  ;;  %v5476_v5 = vpop.xlane.xlu1 %1869 }
 0x364   : > { %v751_v27 = vmul.f32 %v4482_v13, %v750_v52 }
 0x366   : > { %v755_v21 = vsel %vm754_vm15, %v4482_v13, %v751_v27 }
 0x367   : > { %v756_v44 = vmul.f32 %v755_v21, %v5244_v10  ;;  %v2621_v10 = vld [vmem:[%s7052_s14 + $0x8] sm:$0xff] }
 0x368   : > { %2734 = vmatpush.msrb.mxu1 %v2621_v10 }
 0x369   : > { %v758_v59 = vmul.f32 %v757_v39, %v756_v44 }
 0x36a   : > { %v5490_v30 = vpop.xlane.xlu1 %1872  ;;  %2735 = vmatpush.msrb.mxu1 %v2620_v54 }
 0x36b   : > { %v760_v63 = vadd.f32 %v759_v33, %v758_v59 }
 0x36d   : > { %761 = vst.msk [vmem:[#allocation2 + $0x8] sm:$0x1] %vm727_vm4, %v760_v63 }
 0x372   : > { %v2038_v56 = vpop.xlane.xlu1 %2037 }
 0x373   : > { %v2132_v19 = vmul.f32 %v2038_v56, %v5015_v29  ;;  %v5517_v56 = vld [vmem:[%s7056_s18] ss:$0 sm:$0xff] }
 0x375   : > { %v2164_v57 = vadd.f32 1e-05, %v2132_v19 }
 0x377   : > { %4483 = vrsqrt.f32 %v2164_v57  ;;  %vm2202_vm6 = vweird.f32 %v2164_v57 }
 0x37a   : > { %v778_v38 = vpop.xlane.xlu1 %777  ;;  %v2041_v22 = vpop.xlane.xlu2 %2040 }
 0x37b   : > { %v779_v37 = vmul.f32 %v778_v38, %v5015_v29  ;;  %v2133_v2 = vmul.f32 %v2041_v22, %v5015_v29  ;;  %v5522_v22 = vadd.f32 %v5063_v7, %v5137_v35 }
 0x37d   : > { %v4484_v46 = vpop.eup %4483  ;;  %v780_v17 = vadd.f32 1e-05, %v779_v37  ;;  %v2165_v8 = vadd.f32 1e-05, %v2133_v2 }
 0x37e   : > { %v2197_v18 = vmul.f32 %v4484_v46, %v2164_v57  ;;  %vm2203_vm5 = vweird.f32 %v4484_v46 }
 0x37f   : > { %4485 = vrsqrt.f32 %v780_v17  ;;  %vm2204_vm7 = vmor %vm2202_vm6, %vm2203_vm5  ;;  %vm787_vm10 = vweird.f32 %v780_v17  ;;  %vm2212_vm12 = vweird.f32 %v2165_v8 }
 0x380   : > { %v2198_v13 = vmul.f32 %v4484_v46, %v2197_v18  ;;  %4487 = vrsqrt.f32 %v2165_v8 }
 0x382   : > { %v2199_v28 = vmul.f32 0.5, %v2198_v13  ;;  %v826_v25 = vpop.xlane.xlu1 %825 }
 0x383   : > { %v827_v45 = vmul.f32 %v826_v25, %v5015_v29  ;;  %v4196_v25 = vmul.f32 -1.442695, %v5522_v22 }
 0x384   : > { %v2200_v52 = vsub.f32 1.5, %v2199_v28 }
 0x385   : > { %v4486_v27 = vpop.eup %4485  ;;  %v828_v39 = vadd.f32 1e-05, %v827_v45 }
 0x386   : > { %v4488_v21 = vpop.eup %4487  ;;  %v2201_v44 = vmul.f32 %v4484_v46, %v2200_v52  ;;  %v782_v33 = vmul.f32 %v4486_v27, %v780_v17  ;;  %vm788_vm8 = vweird.f32 %v4486_v27 }
 0x387   : > { %v2207_v59 = vmul.f32 %v4488_v21, %v2165_v8  ;;  %4489 = vrsqrt.f32 %v828_v39  ;;  %vm2213_vm9 = vweird.f32 %v4488_v21  ;;  %vm789_vm11 = vmor %vm787_vm10, %vm788_vm8  ;;  %vm835_vm14 = vweird.f32 %v828_v39 }
 0x388   : > { %v2205_v15 = vsel %vm2204_vm7, %v4484_v46, %v2201_v44  ;;  %v783_v63 = vmul.f32 %v4486_v27, %v782_v33  ;;  %vm2214_vm13 = vmor %vm2212_vm12, %vm2213_vm9  ;;  %4491 = vpow2.f32 %v4196_v25  ;;  %v1059_v25 = vpop.f32.mrf.mxu0 }
 0x389   : > { %v2516_v10 = vmul.f32 %v2205_v15, %v5418_v43  ;;  %v2208_v54 = vmul.f32 %v4488_v21, %v2207_v59 }
 0x38a   : > { %v784_v19 = vmul.f32 0.5, %v783_v63 }
 0x38b   : > { %v2552_v57 = vmul.f32 %v5511_v9, %v2516_v10  ;;  %v2209_v38 = vmul.f32 0.5, %v2208_v54 }
 0x38c   : > { %v785_v37 = vsub.f32 1.5, %v784_v19 }
 0x38d   : > { %v4490_v2 = vpop.eup %4489  ;;  %v2210_v46 = vsub.f32 1.5, %v2209_v38  ;;  %v2588_v43 = vadd.f32 %v5517_v56, %v2552_v57  ;;  %v1944_v38 = vmul.f32 %v5469_v3, %v5015_v29 }
 0x38e   : > { %v786_v18 = vmul.f32 %v4486_v27, %v785_v37  ;;  %v830_v13 = vmul.f32 %v4490_v2, %v828_v39  ;;  %vm836_vm3 = vweird.f32 %v4490_v2 }
 0x38f   : > { %v2211_v28 = vmul.f32 %v4488_v21, %v2210_v46  ;;  %4218 = vmatmul.msk.f32.vlgmr.msrb.gmra.mxu1 %vm725_vm2, %v2588_v43  ;;  %vm837_vm15 = vmor %vm835_vm14, %vm836_vm3 }
 0x390   : > { %v831_v7 = vmul.f32 %v4490_v2, %v830_v13  ;;  %v790_v35 = vsel %vm789_vm11, %v4486_v27, %v786_v18 }
 0x391   : > { %v2215_v45 = vsel %vm2214_vm13, %v4488_v21, %v2211_v28  ;;  %v791_v52 = vmul.f32 %v790_v35, %v5019_v32 }
 0x392   : > { %v832_v44 = vmul.f32 0.5, %v831_v7  ;;  %v2517_v33 = vmul.f32 %v2215_v45, %v5430_v48 }
 0x393   : > { %v798_v59 = vmul.f32 %v5447_v4, %v791_v52  ;;  %v4492_v4 = vpop.eup %4491  ;;  %v1945_v52 = vmul.f32 %v5485_v62, %v5015_v29 }
 0x394   : > { %v833_v17 = vsub.f32 1.5, %v832_v44  ;;  %v2553_v8 = vmul.f32 %v5511_v9, %v2517_v33  ;;  %v1277_v21 = vadd.f32 1.0, %v4492_v4 }
 0x395   : > { %v805_v15 = vadd.f32 %v5451_v55, %v798_v59 }
 0x396   : > { %v834_v63 = vmul.f32 %v4490_v2, %v833_v17  ;;  %v2589_v10 = vadd.f32 %v5517_v56, %v2553_v8  ;;  %4493 = vrcp.f32 %v1277_v21  ;;  %vm1454_vm5 = vweird.f32 %v1277_v21  ;;  %v1062_v8 = vpop.f32.mrf.mxu0 }
 0x397   : > { %807 = vrot.lane.b32.xlu1 %v805_v15, %s7095_s25  ;;  %v1460_v37 = vand.u32 2147483648, %v1277_v21  ;;  %v1458_v46 = vand.u32 2147483647, %v1277_v21  ;;  %v5556_v15 = vsub.f32 %v5375_v31, %v1945_v52 }
 0x398   : > { %4219 = vmatmul.msk.f32.gmra.mxu1 %vm725_vm2, %v2589_v10  ;;  %v838_v32 = vsel %vm837_vm15, %v4490_v2, %v834_v63 }
 0x399   : > { %v839_v48 = vmul.f32 %v838_v32, %v5026_v36  ;;  %v874_v36 = vpop.xlane.xlu1 %873  ;;  %v1461_v43 = vor.u32 1.1754944e-38, %v1460_v37  ;;  %vm1459_vm8 = vcmp.eq.f32.partialorder %v1458_v46, 8.507059e+37  ;;  %v2009_v32 = vmul.f32 %v5556_v15, %v5556_v15 }
 0x39b   : > { %v846_v27 = vmul.f32 %v5449_v49, %v839_v48  ;;  %v5542_v49 = vsub.f32 %v5343_v53, %v1944_v38 }
 0x39c   : > { %v4494_v55 = vpop.eup %4493 }
 0x39d   : > { %v853_v54 = vadd.f32 %v5453_v16, %v846_v27  ;;  %v1450_v39 = vmul.f32 %v4494_v55, %v1277_v21  ;;  %vm1455_vm6 = vweird.f32 %v4494_v55  ;;  %v875_v16 = vmul.f32 %v874_v36, %v5015_v29 }
 0x39e   : > { %vm1456_vm7 = vmor %vm1454_vm5, %vm1455_vm6  ;;  %v2008_v28 = vmul.f32 %v5542_v49, %v5542_v49 }
 0x39f   : > { %855 = vrot.lane.b32.xlu2 %v853_v54, %s7096_s26  ;;  %v1451_v19 = vsub.f32 1.0, %v1450_v39  ;;  %v876_v13 = vadd.f32 1e-05, %v875_v16  ;;  %v2051_v54 = vsel %vm725_vm2, %v2009_v32, 0.0 }
 0x3a0   : > { %v2048_v35 = vsel %vm725_vm2, %v2008_v28, 0.0 }
 0x3a1   : > { %v1452_v57 = vmul.f32 %v4494_v55, %v1451_v19  ;;  %4495 = vrsqrt.f32 %v876_v13  ;;  %vm883_vm13 = vweird.f32 %v876_v13 }
 0x3a3   : > { %v1453_v2 = vadd.f32 %v4494_v55, %v1452_v57 }
 0x3a5   : > { %v1457_v18 = vsel %vm1456_vm7, %v4494_v55, %v1453_v2  ;;  %v1065_v55 = vpop.f32.mrf.mxu0 }
 0x3a6   : > { %v1462_v7 = vsel %vm1459_vm8, %v1461_v43, %v1457_v18 }
 0x3a7   : > { %v1789_v3 = vmul.f32 %v1462_v7, %v5522_v22  ;;  %v4496_v59 = vpop.eup %4495 }
 0x3a8   : > { %v878_v63 = vmul.f32 %v4496_v59, %v876_v13  ;;  %vm884_vm12 = vweird.f32 %v4496_v59 }
 0x3a9   : > { %v5553_v33 = vadd.f32 %v5070_v42, %v1789_v3  ;;  %vm885_vm3 = vmor %vm883_vm13, %vm884_vm12 }
 0x3aa   : > { %v879_v48 = vmul.f32 %v4496_v59, %v878_v63  ;;  %v892_v63 = vpop.permute.xlu0 %891 }
 0x3ab   : > { %v1874_v22 = vsel %vm725_vm2, %v5553_v33, 0.0 }
 0x3ac   : > { %v880_v39 = vmul.f32 0.5, %v879_v48 }
 0x3ad   : > { %v1068_v28 = vpop.f32.mrf.mxu0 }
 0x3ae   : > { %v881_v38 = vsub.f32 1.5, %v880_v39 }
 0x3b0   : > { %v882_v16 = vmul.f32 %v4496_v59, %v881_v38 }
 0x3c1   : > { %2049 = vadd.xlane.f32.xlu1 %v2048_v35 }
 0x3c3   : > { %v2044_v45 = vpop.xlane.xlu2 %2043 }
 0x3c4   : > { %v2134_v44 = vmul.f32 %v2044_v45, %v5015_v29  ;;  %v886_v45 = vsel %vm885_vm3, %v4496_v59, %v882_v16 }
 0x3c5   : > { %1103 = vxpose.xlu2.b32.start [1/4] (short) %v1059_v25, 128  ;;  %v887_v13 = vmul.f32 %v886_v45, %v5033_v40 }
 0x3c6   : > { %v2166_v17 = vadd.f32 1e-05, %v2134_v44  ;;  %v5570_v44 = vld [vmem:[%s7047_s9] ss:$0 sm:$0xff] }
 0x3c7   : > { %v1152_v40 = vadd.f32 %v5570_v44, %v5230_v1 }
 0x3c8   : > { %4497 = vrsqrt.f32 %v2166_v17  ;;  %vm2222_vm10 = vweird.f32 %v2166_v17 }
 0x3c9   : > { %1875 = vadd.xlane.f32.xlu1 %v1874_v22 }
 0x3cb   : > { %v2047_v10 = vpop.xlane.xlu2 %2046 }
 0x3cc   : > { %v2135_v62 = vmul.f32 %v2047_v10, %v5015_v29 }
 0x3cd   : > { %1104 = vxpose.xlu2.b32.cont [2/4] (short) %v1062_v8, 128 }
 0x3ce   : > { %v4498_v4 = vpop.eup %4497  ;;  %v2167_v27 = vadd.f32 1e-05, %v2135_v62  ;;  %v894_v62 = vmul.f32 %v892_v63, %v887_v13 }
 0x3cf   : > { %v2217_v21 = vmul.f32 %v4498_v4, %v2166_v17  ;;  %vm2223_vm9 = vweird.f32 %v4498_v4  ;;  %v1151_v17 = vadd.f32 %v5570_v44, %v5187_v20 }
 0x3d0   : > { %4499 = vrsqrt.f32 %v2167_v27  ;;  %vm2224_vm11 = vmor %vm2222_vm10, %vm2223_vm9  ;;  %vm2232_vm15 = vweird.f32 %v2167_v27  ;;  %v901_v20 = vadd.f32 %v5455_v51, %v894_v62 }
 0x3d1   : > { %v2218_v19 = vmul.f32 %v4498_v4, %v2217_v21  ;;  %2052 = vadd.xlane.f32.xlu1 %v2051_v54  ;;  %v4198_v22 = vmul.f32 -1.442695, %v1151_v17 }
 0x3d3   : > { %v2219_v57 = vmul.f32 0.5, %v2218_v19  ;;  %4501 = vpow2.f32 %v4198_v22 }
 0x3d5   : > { %v2220_v37 = vsub.f32 1.5, %v2219_v57  ;;  %1105 = vxpose.xlu2.b32.cont [3/4] (short) %v1065_v55, 128  ;;  %v1946_v57 = vmul.f32 %v5502_v12, %v5015_v29 }
 0x3d6   : > { %v4500_v36 = vpop.eup %4499 }
 0x3d7   : > { %v2221_v2 = vmul.f32 %v4498_v4, %v2220_v37  ;;  %v2227_v46 = vmul.f32 %v4500_v36, %v2167_v27  ;;  %vm2233_vm14 = vweird.f32 %v4500_v36 }
 0x3d8   : > { %vm2234_vm5 = vmor %vm2232_vm15, %vm2233_vm14 }
 0x3d9   : > { %v2225_v43 = vsel %vm2224_vm11, %v4498_v4, %v2221_v2  ;;  %v2228_v18 = vmul.f32 %v4500_v36, %v2227_v46  ;;  %v4502_v48 = vpop.eup %4501  ;;  %v5589_v46 = vsub.f32 %v5397_v34, %v1946_v57  ;;  %v2835_v57 = vld [vmem:[%s7053_s15 + $0x10] sm:$0xff] }
 0x3da   : > { %v2518_v25 = vmul.f32 %v2225_v43, %v5459_v6  ;;  %v1279_v4 = vadd.f32 1.0, %v4502_v48  ;;  %v1948_v48 = vmul.f32 %v5476_v5, %v5015_v29 }
 0x3db   : > { %v2229_v7 = vmul.f32 0.5, %v2228_v18 }
 0x3dc   : > { %v2554_v3 = vmul.f32 %v5511_v9, %v2518_v25  ;;  %4503 = vrcp.f32 %v1279_v4  ;;  %vm1484_vm6 = vweird.f32 %v1279_v4  ;;  %v1490_v1 = vand.u32 2147483648, %v1279_v4 }
 0x3dd   : > { %v2230_v35 = vsub.f32 1.5, %v2229_v7  ;;  %1106 = vxpose.xlu2.b32.end [4/4] (short) %v1068_v28, 128  ;;  %v1488_v37 = vand.u32 2147483647, %v1279_v4  ;;  %v2010_v28 = vmul.f32 %v5589_v46, %v5589_v46 }
 0x3de   : > { %v2590_v52 = vadd.f32 %v5517_v56, %v2554_v3  ;;  %v1491_v16 = vor.u32 1.1754944e-38, %v1490_v1  ;;  %v2834_v1 = vld [vmem:[%s7053_s15 + $0x8] sm:$0xff] }
 0x3df   : > { %v2231_v6 = vmul.f32 %v4500_v36, %v2230_v35  ;;  %vm1489_vm9 = vcmp.eq.f32.partialorder %v1488_v37, 8.507059e+37  ;;  %v2054_v3 = vsel %vm725_vm2, %v2010_v28, 0.0 }
 0x3e0   : > { %4220 = vmatmul.msk.f32.gmra.mxu1 %vm725_vm2, %v2590_v52  ;;  %v1947_v52 = vmul.f32 %v5474_v11, %v5015_v29 }
 0x3e1   : > { %v2235_v8 = vsel %vm2234_vm5, %v4500_v36, %v2231_v6 }
 0x3e2   : > { %v2519_v59 = vmul.f32 %v2235_v8, %v5465_v0  ;;  %v4199_v0 = vmul.f32 -1.442695, %v1152_v40  ;;  %v4504_v21 = vpop.eup %4503 }
 0x3e3   : > { %v1480_v55 = vmul.f32 %v4504_v21, %v1279_v4  ;;  %vm1485_vm7 = vweird.f32 %v4504_v21  ;;  %v5613_v4 = vsub.f32 %v5400_v47, %v1948_v48 }
 0x3e4   : > { %v2555_v10 = vmul.f32 %v5511_v9, %v2519_v59  ;;  %4505 = vpow2.f32 %v4199_v0  ;;  %vm1486_vm8 = vmor %vm1484_vm6, %vm1485_vm7  ;;  %v5600_v59 = vsub.f32 %v5384_v26, %v1947_v52 }
 0x3e5   : > { %v1481_v19 = vsub.f32 1.0, %v1480_v55 }
 0x3e6   : > { %v2591_v32 = vadd.f32 %v5517_v56, %v2555_v10  ;;  %v2011_v10 = vmul.f32 %v5600_v59, %v5600_v59 }
 0x3e7   : > { %v1482_v51 = vmul.f32 %v4504_v21, %v1481_v19 }
 0x3e8   : > { %4221 = vmatmul.msk.f32.gmra.mxu1 %vm725_vm2, %v2591_v32  ;;  %v2057_v32 = vsel %vm725_vm2, %v2011_v10, 0.0 }
 0x3e9   : > { %v1483_v38 = vadd.f32 %v4504_v21, %v1482_v51 }
 0x3ea   : > { %903 = vrot.lane.b32.xlu1 %v901_v20, %s7097_s0  ;;  %v4506_v54 = vpop.eup %4505 }
 0x3eb   : > { %v1280_v39 = vadd.f32 1.0, %v4506_v54  ;;  %v1487_v43 = vsel %vm1486_vm8, %v4504_v21, %v1483_v38  ;;  %v2833_v38 = vld [vmem:[%s7053_s15] sm:$0xff] }
 0x3ec   : > { %v1492_v25 = vsel %vm1489_vm9, %v1491_v16, %v1487_v43 }
 0x3ed   : > { %4507 = vrcp.f32 %v1280_v39  ;;  %v1791_v7 = vmul.f32 %v1492_v25, %v1151_v17  ;;  %vm1499_vm10 = vweird.f32 %v1280_v39  ;;  %v1505_v6 = vand.u32 2147483648, %v1280_v39 }
 0x3ee   : > { %v1503_v8 = vand.u32 2147483647, %v1280_v39 }
 0x3ef   : > { %v5595_v45 = vadd.f32 %v5070_v42, %v1791_v7  ;;  %v1506_v22 = vor.u32 1.1754944e-38, %v1505_v6 }
 0x3f0   : > { %vm1504_vm13 = vcmp.eq.f32.partialorder %v1503_v8, 8.507059e+37 }
 0x3f1   : > { %v1880_v17 = vsel %vm725_vm2, %v5595_v45, 0.0 }
 0x3f3   : > { %v4508_v2 = vpop.eup %4507 }
 0x3f4   : > { %v1495_v18 = vmul.f32 %v4508_v2, %v1280_v39  ;;  %vm1500_vm11 = vweird.f32 %v4508_v2  ;;  %v724_v39 = vld [vmem:[%s685_s5] sm:$0xff] }
 0x3f5   : > { %vm1501_vm12 = vmor %vm1499_vm10, %vm1500_vm11  ;;  %726 = vst.msk [vmem:[#allocation2] sm:$0xff] %vm725_vm2, %v724_v39 }
 0x3f6   : > { %v1496_v12 = vsub.f32 1.0, %v1495_v18 }
 0x3f8   : > { %v1497_v35 = vmul.f32 %v4508_v2, %v1496_v12 }
 0x3f9   : > { %v856_v27 = vpop.permute.xlu2 %855 }
 0x3fa   : > { %858 = vst.msk [vmem:[#allocation2 + $0xa] sm:$0x1] %vm727_vm4, %v856_v27  ;;  %v1498_v13 = vadd.f32 %v4508_v2, %v1497_v35  ;;  %v1949_v27 = vmul.f32 %v5490_v30, %v5015_v29  ;;  %v2836_v30 = vld [vmem:[%s7053_s15 + $0x18] sm:$0xff] }
 0x3fb   : > { %2855 = vmatpush.msra.mxu2 %v2836_v30 }
 0x3fc   : > { %v1502_v63 = vsel %vm1501_vm12, %v4508_v2, %v1498_v13  ;;  %v5626_v21 = vsub.f32 %v5408_v24, %v1949_v27  ;;  %v907_v43 = vld [vmem:[#allocation2] sm:$0xff] }
 0x3fd   : > { %v1507_v62 = vsel %vm1504_vm13, %v1506_v22, %v1502_v63  ;;  %2856 = vmatpush.msra.mxu2 %v2835_v57 }
 0x3fe   : > { %v1792_v11 = vmul.f32 %v1507_v62, %v1152_v40  ;;  %v2012_v40 = vmul.f32 %v5613_v4, %v5613_v4  ;;  %v2013_v51 = vmul.f32 %v5626_v21, %v5626_v21 }
 0x3ff   : > { %2857 = vmatpush.msra.mxu2 %v2834_v1 }
 0x400   : > { %v5608_v20 = vadd.f32 %v5070_v42, %v1792_v11  ;;  %v2060_v5 = vsel %vm725_vm2, %v2012_v40, 0.0  ;;  %v2063_v37 = vsel %vm725_vm2, %v2013_v51, 0.0 }
 0x401   : > { %2858 = vmatpush.msra.mxu2 %v2833_v38 }
 0x402   : > { %v1883_v0 = vsel %vm725_vm2, %v5608_v20, 0.0  ;;  %4250 = vmatmul.msk.f32.vlgmr.msra.gmra.mxu2 %vm725_vm2, %v907_v43 }
 0x409   : > { %v808_v36 = vpop.permute.xlu1 %807 }
 0x40a   : > { %810 = vst.msk [vmem:[#allocation2 + $0x9] sm:$0x1] %vm727_vm4, %v808_v36  ;;  %v1879_v36 = vpop.xlane.xlu0 %1878 }
 0x40b   : > { %v1951_v28 = vmul.f32 %v1879_v36, %v5015_v29  ;;  %v5674_v36 = vadd.f32 %v5570_v44, %v5275_v23 }
 0x40d   : > { %v5655_v35 = vsub.f32 %v5337_v60, %v1951_v28 }
 0x40f   : > { %v2015_v63 = vmul.f32 %v5655_v35, %v5655_v35 }
 0x411   : > { %v2069_v11 = vsel %vm725_vm2, %v2015_v63, 0.0 }
 0x414   : > { %2055 = vadd.xlane.f32.xlu1 %v2054_v3 }
 0x41c   : > { %1881 = vadd.xlane.f32.xlu1 %v1880_v17 }
 0x424   : > { %2058 = vadd.xlane.f32.xlu1 %v2057_v32 }
 0x42c   : > { %1884 = vadd.xlane.f32.xlu1 %v1883_v0 }
 0x434   : > { %v2050_v54 = vpop.xlane.xlu1 %2049  ;;  %2061 = vadd.xlane.f32.xlu1 %v2060_v5 }
 0x435   : > { %v2136_v55 = vmul.f32 %v2050_v54, %v5015_v29 }
 0x437   : > { %v2168_v19 = vadd.f32 1e-05, %v2136_v55 }
 0x439   : > { %4509 = vrsqrt.f32 %v2168_v19  ;;  %vm2242_vm14 = vweird.f32 %v2168_v19 }
 0x43c   : > { %v1876_v2 = vpop.xlane.xlu1 %1875  ;;  %2064 = vadd.xlane.f32.xlu1 %v2063_v37 }
 0x43d   : > { %v1950_v16 = vmul.f32 %v1876_v2, %v5015_v29 }
 0x43f   : > { %v4510_v18 = vpop.eup %4509  ;;  %v5650_v25 = vsub.f32 %v5553_v33, %v1950_v16 }
 0x440   : > { %v2237_v12 = vmul.f32 %v4510_v18, %v2168_v19  ;;  %vm2243_vm3 = vweird.f32 %v4510_v18 }
 0x441   : > { %v2014_v7 = vmul.f32 %v5650_v25, %v5650_v25  ;;  %vm2244_vm15 = vmor %vm2242_vm14, %vm2243_vm3 }
 0x442   : > { %v2238_v3 = vmul.f32 %v4510_v18, %v2237_v12 }
 0x443   : > { %v2066_v52 = vsel %vm725_vm2, %v2014_v7, 0.0 }
 0x444   : > { %v2239_v6 = vmul.f32 0.5, %v2238_v3  ;;  %v2053_v13 = vpop.xlane.xlu1 %2052  ;;  %2067 = vadd.xlane.f32.xlu1 %v2066_v52 }
 0x445   : > { %v2137_v8 = vmul.f32 %v2053_v13, %v5015_v29 }
 0x446   : > { %v2240_v17 = vsub.f32 1.5, %v2239_v6 }
 0x447   : > { %v2169_v22 = vadd.f32 1e-05, %v2137_v8 }
 0x448   : > { %v2241_v10 = vmul.f32 %v4510_v18, %v2240_v17 }
 0x449   : > { %4511 = vrsqrt.f32 %v2169_v22  ;;  %vm2252_vm6 = vweird.f32 %v2169_v22 }
 0x44a   : > { %v2245_v62 = vsel %vm2244_vm15, %v4510_v18, %v2241_v10 }
 0x44b   : > { %v2520_v32 = vmul.f32 %v2245_v62, %v5542_v49 }
 0x44c   : > { %2070 = vadd.xlane.f32.xlu1 %v2069_v11 }
 0x44d   : > { %v2556_v48 = vmul.f32 %v5511_v9, %v2520_v32 }
 0x44f   : > { %v4512_v0 = vpop.eup %4511  ;;  %v2592_v27 = vadd.f32 %v5517_v56, %v2556_v48 }
 0x450   : > { %v2247_v40 = vmul.f32 %v4512_v0, %v2169_v22  ;;  %vm2253_vm5 = vweird.f32 %v4512_v0 }
 0x451   : > { %4222 = vmatmul.msk.f32.gmra.mxu1 %vm725_vm2, %v2592_v27  ;;  %vm2254_vm7 = vmor %vm2252_vm6, %vm2253_vm5 }
 0x452   : > { %v2248_v5 = vmul.f32 %v4512_v0, %v2247_v40 }
 0x454   : > { %v2249_v54 = vmul.f32 0.5, %v2248_v5 }
 0x456   : > { %v2250_v55 = vsub.f32 1.5, %v2249_v54 }
 0x458   : > { %v2251_v39 = vmul.f32 %v4512_v0, %v2250_v55 }
 0x45a   : > { %v2255_v30 = vsel %vm2254_vm7, %v4512_v0, %v2251_v39 }
 0x45b   : > { %v2521_v19 = vmul.f32 %v2255_v30, %v5556_v15  ;;  %v4200_v15 = vmul.f32 -1.442695, %v5674_v36 }
 0x45c   : > { %v904_v49 = vpop.permute.xlu1 %903 }
 0x45d   : > { %906 = vst.msk [vmem:[#allocation2 + $0xb] sm:$0x1] %vm727_vm4, %v904_v49  ;;  %v2557_v51 = vmul.f32 %v5511_v9, %v2521_v19 }
 0x45e   : > { %v1119_v57 = vpop.trf.xlu2 }
 0x45f   : > { %v1155_v1 = vadd.f32 %v5570_v44, %v1119_v57  ;;  %v2593_v38 = vadd.f32 %v5517_v56, %v2557_v51 }
 0x461   : > { %v4202_v37 = vmul.f32 -1.442695, %v1155_v1  ;;  %4223 = vmatmul.msk.f32.gmra.mxu1 %vm725_vm2, %v2593_v38 }
 0x463   : > { %4513 = vpow2.f32 %v4202_v37 }
 0x464   : > { %v908_v2 = vld [vmem:[#allocation2 + $0x8] sm:$0xf]  ;;  %4515 = vpow2.f32 %v4200_v15 }
 0x465   : > { %4251 = vmatmul.msk.f32.gmra.mxu2 %vm725_vm2, %v908_v2 }
 0x466   : > { %v1120_v16 = vpop.trf.xlu2 }
 0x467   : > { %v5679_v43 = vadd.f32 %v5570_v44, %v1120_v16 }
 0x469   : > { %v4514_v18 = vpop.eup %4513  ;;  %v4203_v28 = vmul.f32 -1.442695, %v5679_v43 }
 0x46a   : > { %v1283_v12 = vadd.f32 1.0, %v4514_v18  ;;  %v4516_v3 = vpop.eup %4515 }
 0x46b   : > { %4517 = vpow2.f32 %v4203_v28  ;;  %v5686_v22 = vadd.f32 1.0, %v4516_v3 }
 0x46c   : > { %4519 = vrcp.f32 %v1283_v12  ;;  %v1550_v63 = vand.u32 2147483648, %v1283_v12  ;;  %vm1544_vm4 = vweird.f32 %v1283_v12  ;;  %v1548_v62 = vand.u32 2147483647, %v1283_v12 }
 0x46d   : > { %vm1514_vm5 = vweird.f32 %v5686_v22 }
 0x46e   : > { %v1121_v7 = vpop.trf.xlu2  ;;  %v1551_v0 = vor.u32 1.1754944e-38, %v1550_v63  ;;  %vm1549_vm10 = vcmp.eq.f32.partialorder %v1548_v62, 8.507059e+37 }
 0x46f   : > { %v5683_v23 = vadd.f32 %v5570_v44, %v1121_v7 }
 0x471   : > { %v4518_v52 = vpop.eup %4517  ;;  %v4204_v6 = vmul.f32 -1.442695, %v5683_v23 }
 0x472   : > { %v4520_v13 = vpop.eup %4519  ;;  %v1284_v8 = vadd.f32 1.0, %v4518_v52 }
 0x473   : > { %v1540_v17 = vmul.f32 %v4520_v13, %v1283_v12  ;;  %4521 = vpow2.f32 %v4204_v6  ;;  %vm1545_vm8 = vweird.f32 %v4520_v13 }
 0x474   : > { %4523 = vrcp.f32 %v1284_v8  ;;  %vm1546_vm9 = vmor %vm1544_vm4, %vm1545_vm8  ;;  %vm1559_vm11 = vweird.f32 %v1284_v8  ;;  %v1565_v49 = vand.u32 2147483648, %v1284_v8  ;;  %v1563_v38 = vand.u32 2147483647, %v1284_v8 }
 0x475   : > { %v1541_v10 = vsub.f32 1.0, %v1540_v17  ;;  %4525 = vrcp.f32 %v5686_v22 }
 0x476   : > { %v1122_v11 = vpop.trf.xlu2  ;;  %v1566_v28 = vor.u32 1.1754944e-38, %v1565_v49  ;;  %vm1564_vm3 = vcmp.eq.f32.partialorder %v1563_v38, 8.507059e+37 }
 0x477   : > { %v1542_v32 = vmul.f32 %v4520_v13, %v1541_v10  ;;  %v5689_v48 = vadd.f32 %v5570_v44, %v1122_v11 }
 0x479   : > { %v4522_v27 = vpop.eup %4521  ;;  %v1543_v40 = vadd.f32 %v4520_v13, %v1542_v32  ;;  %v4205_v5 = vmul.f32 -1.442695, %v5689_v48 }
 0x47a   : > { %v4524_v54 = vpop.eup %4523  ;;  %v1285_v55 = vadd.f32 1.0, %v4522_v27 }
 0x47b   : > { %v1547_v39 = vsel %vm1546_vm9, %v4520_v13, %v1543_v40  ;;  %v1555_v30 = vmul.f32 %v4524_v54, %v1284_v8  ;;  %4527 = vpow2.f32 %v4205_v5  ;;  %vm1560_vm12 = vweird.f32 %v4524_v54  ;;  %v5693_v2 = vpop.eup %4525 }
 0x47c   : > { %v1552_v19 = vsel %vm1549_vm10, %v1551_v0, %v1547_v39  ;;  %4529 = vrcp.f32 %v1285_v55  ;;  %vm1561_vm13 = vmor %vm1559_vm11, %vm1560_vm12  ;;  %v1510_v6 = vmul.f32 %v5693_v2, %v5686_v22  ;;  %vm1574_vm14 = vweird.f32 %v1285_v55 }
 0x47d   : > { %v1795_v51 = vmul.f32 %v1552_v19, %v1155_v1  ;;  %v1556_v57 = vsub.f32 1.0, %v1555_v30  ;;  %v1580_v10 = vand.u32 2147483648, %v1285_v55  ;;  %v1578_v32 = vand.u32 2147483647, %v1285_v55 }
 0x47e   : > { %v1123_v37 = vpop.trf.xlu2  ;;  %v1511_v0 = vsub.f32 1.0, %v1510_v6  ;;  %v1518_v30 = vand.u32 2147483647, %v5686_v22  ;;  %vm1515_vm4 = vweird.f32 %v5693_v2 }
 0x47f   : > { %v5696_v15 = vadd.f32 %v5070_v42, %v1795_v51  ;;  %v1557_v16 = vmul.f32 %v4524_v54, %v1556_v57  ;;  %v5699_v18 = vadd.f32 %v5570_v44, %v1123_v37  ;;  %v1581_v19 = vor.u32 1.1754944e-38, %v1580_v10  ;;  %vm5741_vm10 = vmor %vm1514_vm5, %vm1515_vm4 }
 0x480   : > { %vm1579_vm7 = vcmp.eq.f32.partialorder %v1578_v32, 8.507059e+37  ;;  %vm5751_vm11 = vcmp.eq.f32.partialorder %v1518_v30, 8.507059e+37 }
 0x481   : > { %7123 = vst [vmem:[#allocation7_spill] sm:$0xff] %v5696_v15  ;;  %v4528_v12 = vpop.eup %4527  ;;  %v1558_v7 = vadd.f32 %v4524_v54, %v1557_v16  ;;  %v4206_v1 = vmul.f32 -1.442695, %v5699_v18  ;;  %v1892_v3 = vsel %vm725_vm2, %v5696_v15, 0.0 }
 0x482   : > { %v4530_v52 = vpop.eup %4529  ;;  %v1286_v13 = vadd.f32 1.0, %v4528_v12  ;;  %1893 = vadd.xlane.f32.xlu0 %v1892_v3 }
 0x483   : > { %v1562_v8 = vsel %vm1561_vm13, %v4524_v54, %v1558_v7  ;;  %v1570_v17 = vmul.f32 %v4530_v52, %v1285_v55  ;;  %4531 = vpow2.f32 %v4206_v1  ;;  %vm1575_vm15 = vweird.f32 %v4530_v52 }
 0x484   : > { %v1567_v63 = vsel %vm1564_vm3, %v1566_v28, %v1562_v8  ;;  %4533 = vrcp.f32 %v1286_v13  ;;  %vm5716_vm6 = vmor %vm1574_vm14, %vm1575_vm15  ;;  %v1512_v28 = vmul.f32 %v5693_v2, %v1511_v0  ;;  %vm1589_vm8 = vweird.f32 %v1286_v13 }
 0x485   : > { %v1796_v62 = vmul.f32 %v1567_v63, %v5679_v43  ;;  %v1571_v11 = vsub.f32 1.0, %v1570_v17  ;;  %v1593_v6 = vand.u32 2147483647, %v1286_v13  ;;  %v1595_v8 = vand.u32 2147483648, %v1286_v13 }
 0x486   : > { %v1124_v27 = vpop.trf.xlu2  ;;  %v1513_v10 = vadd.f32 %v5693_v2, %v1512_v28 }
 0x487   : > { %v5708_v40 = vadd.f32 %v5070_v42, %v1796_v62  ;;  %v1572_v5 = vmul.f32 %v4530_v52, %v1571_v11  ;;  %v5711_v39 = vadd.f32 %v5570_v44, %v1124_v27  ;;  %v2056_v54 = vpop.xlane.xlu1 %2055  ;;  %v1520_v62 = vand.u32 2147483648, %v5686_v22 }
 0x488   : > { %v2138_v49 = vmul.f32 %v2056_v54, %v5015_v29  ;;  %v1596_v22 = vor.u32 1.1754944e-38, %v1595_v8  ;;  %vm1594_vm13 = vcmp.eq.f32.partialorder %v1593_v6, 8.507059e+37 }
 0x489   : > { %7124 = vst [vmem:[#allocation8_spill] sm:$0xff] %v5708_v40  ;;  %v4532_v51 = vpop.eup %4531  ;;  %v1573_v57 = vadd.f32 %v4530_v52, %v1572_v5  ;;  %v4207_v38 = vmul.f32 -1.442695, %v5711_v39  ;;  %v1895_v37 = vsel %vm725_vm2, %v5708_v40, 0.0 }
 0x48a   : > { %v4534_v16 = vpop.eup %4533  ;;  %v5726_v55 = vadd.f32 1.0, %v4532_v51  ;;  %v5728_v12 = vadd.f32 1e-05, %v2138_v49  ;;  %1896 = vadd.xlane.f32.xlu0 %v1895_v37 }
 0x48b   : > { %v1577_v7 = vsel %vm5716_vm6, %v4530_v52, %v1573_v57  ;;  %v1585_v1 = vmul.f32 %v4534_v16, %v1286_v13  ;;  %4535 = vpow2.f32 %v4207_v38  ;;  %vm1590_vm9 = vweird.f32 %v4534_v16 }
 0x48c   : > { %v1582_v3 = vsel %vm1579_vm7, %v1581_v19, %v1577_v7  ;;  %4537 = vrcp.f32 %v5726_v55  ;;  %vm5756_vm12 = vmor %vm1589_vm8, %vm1590_vm9  ;;  %v1517_v13 = vsel %vm5741_vm10, %v5693_v2, %v1513_v10  ;;  %v1521_v38 = vor.u32 1.1754944e-38, %v1520_v62 }
 0x48d   : > { %v1797_v17 = vmul.f32 %v1582_v3, %v5683_v23  ;;  %v1586_v63 = vsub.f32 1.0, %v1585_v1  ;;  %4539 = vrsqrt.f32 %v5728_v12  ;;  %vm1604_vm3 = vweird.f32 %v5726_v55 }
 0x48e   : > { %v1125_v11 = vpop.trf.xlu2  ;;  %v1608_v2 = vand.u32 2147483647, %v5726_v55  ;;  %v1610_v8 = vand.u32 2147483648, %v5726_v55  ;;  %vm2262_vm8 = vweird.f32 %v5728_v12 }
 0x48f   : > { %v5746_v32 = vadd.f32 %v5070_v42, %v1797_v17  ;;  %v1587_v23 = vmul.f32 %v4534_v16, %v1586_v63  ;;  %v5749_v0 = vadd.f32 %v5570_v44, %v1125_v11  ;;  %v1882_v27 = vpop.xlane.xlu1 %1881  ;;  %v1522_v11 = vsel %vm5751_vm11, %v1521_v38, %v1517_v13 }
 0x490   : > { %v1952_v43 = vmul.f32 %v1882_v27, %v5015_v29  ;;  %vm1609_vm5 = vcmp.eq.f32.partialorder %v1608_v2, 8.507059e+37 }
 0x491   : > { %7129 = vst [vmem:[#allocation9_spill] sm:$0xff] %v5746_v32  ;;  %v4536_v19 = vpop.eup %4535  ;;  %v1588_v49 = vadd.f32 %v4534_v16, %v1587_v23  ;;  %v4208_v51 = vmul.f32 -1.442695, %v5749_v0  ;;  %v1898_v57 = vsel %vm725_vm2, %v5746_v32, 0.0 }
 0x492   : > { %v4538_v30 = vpop.eup %4537  ;;  %v5767_v37 = vadd.f32 1.0, %v4536_v19  ;;  %v5770_v28 = vsub.f32 %v5595_v45, %v1952_v43  ;;  %1899 = vadd.xlane.f32.xlu0 %v1898_v57 }
 0x493   : > { %v5772_v7 = vpop.eup %4539  ;;  %v1592_v1 = vsel %vm5756_vm12, %v4534_v16, %v1588_v49  ;;  %v1600_v3 = vmul.f32 %v4538_v30, %v5726_v55  ;;  %4541 = vpow2.f32 %v4208_v51  ;;  %vm1605_vm14 = vweird.f32 %v4538_v30 }
 0x494   : > { %v1597_v6 = vsel %vm1594_vm13, %v1596_v22, %v1592_v1  ;;  %4543 = vrcp.f32 %v5767_v37  ;;  %v2257_v10 = vmul.f32 %v5772_v7, %v5728_v12  ;;  %v2016_v62 = vmul.f32 %v5770_v28, %v5770_v28  ;;  %vm5794_vm15 = vmor %vm1604_vm3, %vm1605_vm14 }
 0x495   : > { %v1798_v17 = vmul.f32 %v1597_v6, %v5689_v48  ;;  %v1601_v63 = vsub.f32 1.0, %v1600_v3  ;;  %v1611_v22 = vor.u32 1.1754944e-38, %v1610_v8  ;;  %vm1619_vm6 = vweird.f32 %v5767_v37 }
 0x496   : > { %v1126_v16 = vpop.trf.xlu2  ;;  %v2258_v27 = vmul.f32 %v5772_v7, %v2257_v10  ;;  %v2072_v5 = vsel %vm725_vm2, %v2016_v62, 0.0  ;;  %v1623_v38 = vand.u32 2147483647, %v5767_v37  ;;  %v1625_v10 = vand.u32 2147483648, %v5767_v37 }
 0x497   : > { %v5789_v52 = vadd.f32 %v5070_v42, %v1798_v17  ;;  %v1602_v23 = vmul.f32 %v4538_v30, %v1601_v63  ;;  %v2059_v54 = vpop.xlane.xlu1 %2058  ;;  %v5799_v43 = vadd.f32 %v5570_v44, %v1126_v16  ;;  %2073 = vadd.xlane.f32.xlu1 %v2072_v5  ;;  %vm2263_vm7 = vweird.f32 %v5772_v7 }
 0x498   : > { %v2139_v19 = vmul.f32 %v2059_v54, %v5015_v29  ;;  %v2259_v57 = vmul.f32 0.5, %v2258_v27  ;;  %v1793_v27 = vmul.f32 %v1522_v11, %v5674_v36  ;;  %vm2264_vm9 = vmor %vm2262_vm8, %vm2263_vm7  ;;  %v1626_v5 = vor.u32 1.1754944e-38, %v1625_v10 }
 0x499   : > { %7134 = vst [vmem:[#allocation10_spill] sm:$0xff] %v5789_v52  ;;  %v4542_v49 = vpop.eup %4541  ;;  %v1603_v51 = vadd.f32 %v4538_v30, %v1602_v23  ;;  %v1901_v55 = vsel %vm725_vm2, %v5789_v52, 0.0  ;;  %v4209_v3 = vmul.f32 -1.442695, %v5799_v43  ;;  %vm1624_vm11 = vcmp.eq.f32.partialorder %v1623_v38, 8.507059e+37 }
 0x49a   : > { %v4544_v13 = vpop.eup %4543  ;;  %v5807_v1 = vadd.f32 1.0, %v4542_v49  ;;  %1902 = vadd.xlane.f32.xlu0 %v1901_v55  ;;  %v2260_v8 = vsub.f32 1.5, %v2259_v57  ;;  %v5813_v17 = vadd.f32 1e-05, %v2139_v19 }
 0x49b   : > { %v1607_v6 = vsel %vm5794_vm15, %v4538_v30, %v1603_v51  ;;  %v1615_v2 = vmul.f32 %v4544_v13, %v5767_v37  ;;  %vm1620_vm4 = vweird.f32 %v4544_v13 }
 0x49c   : > { %v1612_v63 = vsel %vm1609_vm5, %v1611_v22, %v1607_v6  ;;  %4545 = vrcp.f32 %v5807_v1  ;;  %v2261_v23 = vmul.f32 %v5772_v7, %v2260_v8  ;;  %vm5828_vm10 = vmor %vm1619_vm6, %vm1620_vm4  ;;  %vm1634_vm12 = vweird.f32 %v5807_v1 }
 0x49d   : > { %v1799_v16 = vmul.f32 %v1612_v63, %v5699_v18  ;;  %v1616_v62 = vsub.f32 1.0, %v1615_v2  ;;  %4547 = vpow2.f32 %v4209_v3  ;;  %v1638_v57 = vand.u32 2147483647, %v5807_v1 }
 0x49e   : > { %v1127_v30 = vpop.trf.xlu2  ;;  %4549 = vrsqrt.f32 %v5813_v17  ;;  %v2265_v11 = vsel %vm2264_vm9, %v5772_v7, %v2261_v23  ;;  %v1640_v6 = vand.u32 2147483648, %v5807_v1  ;;  %vm2272_vm15 = vweird.f32 %v5813_v17 }
 0x49f   : > { %v5823_v54 = vadd.f32 %v5070_v42, %v1799_v16  ;;  %v1617_v48 = vmul.f32 %v4544_v13, %v1616_v62  ;;  %v1885_v22 = vpop.xlane.xlu1 %1884  ;;  %v5833_v12 = vadd.f32 %v5570_v44, %v1127_v30  ;;  %v2522_v51 = vmul.f32 %v2265_v11, %v5589_v46 }
 0x4a0   : > { %v1953_v36 = vmul.f32 %v1885_v22, %v5015_v29  ;;  %vm1639_vm14 = vcmp.eq.f32.partialorder %v1638_v57, 8.507059e+37 }
 0x4a1   : > { %7137 = vst [vmem:[#allocation11_spill] sm:$0xff] %v5823_v54  ;;  %v1618_v19 = vadd.f32 %v4544_v13, %v1617_v48  ;;  %v1904_v49 = vsel %vm725_vm2, %v5823_v54, 0.0  ;;  %v4210_v55 = vmul.f32 -1.442695, %v5833_v12  ;;  %v2558_v46 = vmul.f32 %v5511_v9, %v2522_v51 }
 0x4a2   : > { %v4546_v37 = vpop.eup %4545  ;;  %v5844_v3 = vsub.f32 %v5608_v20, %v1953_v36  ;;  %1905 = vadd.xlane.f32.xlu0 %v1904_v49  ;;  %v1641_v36 = vor.u32 1.1754944e-38, %v1640_v6 }
 0x4a3   : > { %v1622_v7 = vsel %vm5828_vm10, %v4544_v13, %v1618_v19  ;;  %v1630_v38 = vmul.f32 %v4546_v37, %v5807_v1  ;;  %v4548_v2 = vpop.eup %4547  ;;  %vm1635_vm13 = vweird.f32 %v4546_v37  ;;  %4551 = vpow2.f32 %v4210_v55 }
 0x4a4   : > { %v1627_v8 = vsel %vm1624_vm11, %v1626_v5, %v1622_v7  ;;  %v2017_v63 = vmul.f32 %v5844_v3, %v5844_v3  ;;  %v5853_v10 = vpop.eup %4549  ;;  %v1290_v23 = vadd.f32 1.0, %v4548_v2  ;;  %v2594_v13 = vadd.f32 %v5517_v56, %v2558_v46  ;;  %vm5870_vm3 = vmor %vm1634_vm12, %vm1635_vm13 }
 0x4a5   : > { %v1800_v16 = vmul.f32 %v1627_v8, %v5711_v39  ;;  %v1631_v62 = vsub.f32 1.0, %v1630_v38  ;;  %v2267_v30 = vmul.f32 %v5853_v10, %v5813_v17  ;;  %v5865_v39 = vadd.f32 %v5070_v42, %v1793_v27 }
 0x4a6   : > { %v1128_v48 = vpop.trf.xlu2  ;;  %v2075_v9 = vsel %vm725_vm2, %v2017_v63, 0.0  ;;  %4553 = vrcp.f32 %v1290_v23  ;;  %4224 = vmatmul.msk.f32.gmra.mxu1 %vm725_vm2, %v2594_v13  ;;  %v1653_v13 = vand.u32 2147483647, %v1290_v23  ;;  %vm2273_vm5 = vweird.f32 %v5853_v10 }
 0x4a7   : > { %v5861_v22 = vadd.f32 %v5070_v42, %v1800_v16  ;;  %v1632_v18 = vmul.f32 %v4546_v37, %v1631_v62  ;;  %2076 = vadd.xlane.f32.xlu1 %v2075_v9  ;;  %v2062_v5 = vpop.xlane.xlu1 %2061  ;;  %v2268_v11 = vmul.f32 %v5853_v10, %v2267_v30  ;;  %v5876_v19 = vadd.f32 %v5570_v44, %v1128_v48  ;;  %vm5902_vm4 = vmor %vm2272_vm15, %vm2273_vm5 }
 0x4a8   : > { %v2140_v51 = vmul.f32 %v2062_v5, %v5015_v29  ;;  %v1886_v16 = vsel %vm725_vm2, %v5865_v39, 0.0  ;;  %vm1649_vm6 = vweird.f32 %v1290_v23  ;;  %v1655_v9 = vand.u32 2147483648, %v1290_v23 }
 0x4a9   : > { %7140 = vst [vmem:[#allocation12_spill] sm:$0xff] %v5861_v22  ;;  %v1633_v49 = vadd.f32 %v4546_v37, %v1632_v18  ;;  %v1907_v27 = vsel %vm725_vm2, %v5861_v22, 0.0  ;;  %v4552_v55 = vpop.eup %4551  ;;  %v2269_v7 = vmul.f32 0.5, %v2268_v11  ;;  %v4211_v1 = vmul.f32 -1.442695, %v5876_v19 }
 0x4aa   : > { %1908 = vadd.xlane.f32.xlu0 %v1907_v27  ;;  %v1291_v6 = vadd.f32 1.0, %v4552_v55  ;;  %v5884_v46 = vadd.f32 1e-05, %v2140_v51  ;;  %vm5908_vm8 = vcmp.eq.f32.partialorder %v1653_v13, 8.507059e+37  ;;  %v5951_v27 = vld [vmem:[%s7055_s17] ss:$0 sm:$0xff] }
 0x4ab   : > { %v1637_v38 = vsel %vm5870_vm3, %v4546_v37, %v1633_v49  ;;  %v2270_v8 = vsub.f32 1.5, %v2269_v7  ;;  %4555 = vpow2.f32 %v4211_v1 }
 0x4ac   : > { %v1642_v2 = vsel %vm1639_vm14, %v1641_v36, %v1637_v38  ;;  %v4554_v57 = vpop.eup %4553  ;;  %4557 = vrcp.f32 %v1291_v6  ;;  %v1656_v38 = vor.u32 1.1754944e-38, %v1655_v9  ;;  %v1670_v13 = vand.u32 2147483648, %v1291_v6 }
 0x4ad   : > { %v1801_v63 = vmul.f32 %v1642_v2, %v5749_v0  ;;  %v1645_v62 = vmul.f32 %v4554_v57, %v1290_v23  ;;  %v2271_v30 = vmul.f32 %v5853_v10, %v2270_v8  ;;  %4559 = vrsqrt.f32 %v5884_v46 }
 0x4ae   : > { %1887 = vadd.xlane.f32.xlu2 %v1886_v16  ;;  %v1129_v37 = vpop.trf.xlu2  ;;  %vm1650_vm7 = vweird.f32 %v4554_v57  ;;  %v1668_v2 = vand.u32 2147483647, %v1291_v6  ;;  %vm1664_vm10 = vweird.f32 %v1291_v6  ;;  %vm2282_vm13 = vweird.f32 %v5884_v46 }
 0x4af   : > { %v5893_v48 = vadd.f32 %v5070_v42, %v1801_v63  ;;  %v2065_v0 = vpop.xlane.xlu1 %2064  ;;  %v1646_v18 = vsub.f32 1.0, %v1645_v62  ;;  %v5897_v5 = vadd.f32 %v5570_v44, %v1129_v37  ;;  %v2275_v17 = vsel %vm5902_vm4, %v5853_v10, %v2271_v30  ;;  %vm5917_vm9 = vmor %vm1649_vm6, %vm1650_vm7 }
 0x4b0   : > { %v2141_v56 = vmul.f32 %v2065_v0, %v5015_v29  ;;  %v2523_v10 = vmul.f32 %v2275_v17, %v5600_v59  ;;  %vm5935_vm12 = vcmp.eq.f32.partialorder %v1668_v2, 8.507059e+37 }
 0x4b1   : > { %7143 = vst [vmem:[#allocation13_spill] sm:$0xff] %v5893_v48  ;;  %v1910_v11 = vsel %vm725_vm2, %v5893_v48, 0.0  ;;  %v4556_v49 = vpop.eup %4555  ;;  %v1647_v51 = vmul.f32 %v4554_v57, %v1646_v18  ;;  %v4212_v55 = vmul.f32 -1.442695, %v5897_v5 }
 0x4b2   : > { %1911 = vadd.xlane.f32.xlu0 %v1910_v11  ;;  %v4558_v7 = vpop.eup %4557  ;;  %v5921_v8 = vadd.f32 1.0, %v4556_v49  ;;  %v5923_v63 = vadd.f32 1e-05, %v2141_v56  ;;  %v1671_v11 = vor.u32 1.1754944e-38, %v1670_v13 }
 0x4b3   : > { %v1648_v16 = vadd.f32 %v4554_v57, %v1647_v51  ;;  %v1660_v62 = vmul.f32 %v4558_v7, %v1291_v6  ;;  %4561 = vpow2.f32 %v4212_v55  ;;  %v5925_v37 = vpop.eup %4559  ;;  %vm1665_vm11 = vweird.f32 %v4558_v7 }
 0x4b4   : > { %4563 = vrcp.f32 %v5921_v8  ;;  %v2277_v9 = vmul.f32 %v5925_v37, %v5884_v46  ;;  %vm5944_vm3 = vmor %vm1664_vm10, %vm1665_vm11  ;;  %v2559_v55 = vmul.f32 %v5951_v27, %v2523_v10  ;;  %vm1679_vm14 = vweird.f32 %v5921_v8  ;;  %v5966_v10 = vld [vmem:[%s7056_s18] ss:$0 sm:$0xff] }
 0x4b5   : > { %v1652_v23 = vsel %vm5917_vm9, %v4554_v57, %v1648_v16  ;;  %v1661_v30 = vsub.f32 1.0, %v1660_v62  ;;  %4565 = vrsqrt.f32 %v5923_v63  ;;  %v1685_v62 = vand.u32 2147483648, %v5921_v8 }
 0x4b6   : > { %v1130_v0 = vpop.trf.xlu2  ;;  %v1657_v18 = vsel %vm5908_vm8, %v1656_v38, %v1652_v23  ;;  %v2278_v57 = vmul.f32 %v5925_v37, %v2277_v9  ;;  %v2595_v23 = vadd.f32 %v5966_v10, %v2559_v55  ;;  %vm2283_vm15 = vweird.f32 %v5925_v37 }
 0x4b7   : > { %v2068_v36 = vpop.xlane.xlu1 %2067  ;;  %v1662_v59 = vmul.f32 %v4558_v7, %v1661_v30  ;;  %v1802_v49 = vmul.f32 %v1657_v18, %v5799_v43  ;;  %v5955_v17 = vadd.f32 %v5570_v44, %v1130_v0  ;;  %v1683_v43 = vand.u32 2147483647, %v5921_v8  ;;  %vm5993_vm7 = vmor %vm2282_vm13, %vm2283_vm15 }
 0x4b8   : > { %v2142_v1 = vmul.f32 %v2068_v36, %v5015_v29  ;;  %v2279_v6 = vmul.f32 0.5, %v2278_v57  ;;  %4225 = vmatmul.msk.f32.gmra.mxu1 %vm725_vm2, %v2595_v23  ;;  %vm2292_vm8 = vweird.f32 %v5923_v63 }
 0x4b9   : > { %v4562_v38 = vpop.eup %4561  ;;  %v1663_v2 = vadd.f32 %v4558_v7, %v1662_v59  ;;  %v4213_v30 = vmul.f32 -1.442695, %v5955_v17  ;;  %v5977_v59 = vadd.f32 %v5070_v42, %v1802_v49  ;;  %vm5985_vm6 = vcmp.eq.f32.partialorder %v1683_v43, 8.507059e+37 }
 0x4ba   : > { %v4564_v16 = vpop.eup %4563  ;;  %v5961_v13 = vadd.f32 1.0, %v4562_v38  ;;  %v2280_v18 = vsub.f32 1.5, %v2279_v6  ;;  %v5983_v55 = vadd.f32 1e-05, %v2142_v1  ;;  %v1686_v6 = vor.u32 1.1754944e-38, %v1685_v62 }
 0x4bb   : > { %v1667_v9 = vsel %vm5944_vm3, %v4558_v7, %v1663_v2  ;;  %v1675_v0 = vmul.f32 %v4564_v16, %v5921_v8  ;;  %v5974_v36 = vpop.eup %4565  ;;  %7154 = vst [vmem:[#allocation14_spill] sm:$0xff] %v5977_v59  ;;  %vm1680_vm5 = vweird.f32 %v4564_v16 }
 0x4bc   : > { %v1672_v57 = vsel %vm5935_vm12, %v1671_v11, %v1667_v9  ;;  %4567 = vrcp.f32 %v5961_v13  ;;  %v2281_v38 = vmul.f32 %v5925_v37, %v2280_v18  ;;  %v2287_v11 = vmul.f32 %v5974_v36, %v5923_v63  ;;  %vm6006_vm9 = vmor %vm1679_vm14, %vm1680_vm5 }
 0x4bd   : > { %v1676_v7 = vsub.f32 1.0, %v1675_v0  ;;  %v1803_v49 = vmul.f32 %v1672_v57, %v5833_v12  ;;  %4569 = vpow2.f32 %v4213_v30  ;;  %vm1694_vm4 = vweird.f32 %v5961_v13 }
 0x4be   : > { %v1131_v2 = vpop.trf.xlu2  ;;  %v2285_v23 = vsel %vm5993_vm7, %v5925_v37, %v2281_v38  ;;  %v1698_v46 = vand.u32 2147483647, %v5961_v13  ;;  %v2288_v62 = vmul.f32 %v5974_v36, %v2287_v11  ;;  %4571 = vrsqrt.f32 %v5983_v55 }
 0x4bf   : > { %v2071_v1 = vpop.xlane.xlu1 %2070  ;;  %v1677_v43 = vmul.f32 %v4564_v16, %v1676_v7  ;;  %v1913_v30 = vsel %vm725_vm2, %v5977_v59, 0.0  ;;  %v1700_v9 = vand.u32 2147483648, %v5961_v13  ;;  %v6017_v0 = vadd.f32 %v5570_v44, %v1131_v2 }
 0x4c0   : > { %1914 = vadd.xlane.f32.xlu0 %v1913_v30  ;;  %v2143_v8 = vmul.f32 %v2071_v1, %v5015_v29  ;;  %v6021_v57 = vadd.f32 %v5070_v42, %v1803_v49  ;;  %v2289_v7 = vmul.f32 0.5, %v2288_v62  ;;  %vm2293_vm10 = vweird.f32 %v5974_v36 }
 0x4c1   : > { %v1678_v37 = vadd.f32 %v4564_v16, %v1677_v43  ;;  %v2524_v38 = vmul.f32 %v2285_v23, %v5613_v4  ;;  %v4214_v44 = vmul.f32 -1.442695, %v6017_v0  ;;  %vm6048_vm12 = vmor %vm2292_vm8, %vm2293_vm10  ;;  %vm1699_vm3 = vcmp.eq.f32.partialorder %v1698_v46, 8.507059e+37 }
 0x4c2   : > { %v4568_v18 = vpop.eup %4567  ;;  %7161 = vst [vmem:[#allocation15_spill] sm:$0xff] %v6021_v57  ;;  %v2290_v43 = vsub.f32 1.5, %v2289_v7  ;;  %v6031_v49 = vadd.f32 1e-05, %v2143_v8  ;;  %v1916_v51 = vsel %vm725_vm2, %v6021_v57, 0.0 }
 0x4c3   : > { %v1682_v56 = vsel %vm6006_vm9, %v4564_v16, %v1678_v37  ;;  %v1690_v11 = vmul.f32 %v4568_v18, %v5961_v13  ;;  %vm1695_vm11 = vweird.f32 %v4568_v18  ;;  %v4570_v2 = vpop.eup %4569  ;;  %v2560_v62 = vmul.f32 %v5951_v27, %v2524_v38 }
 0x4c4   : > { %v1687_v1 = vsel %vm5985_vm6, %v1686_v6, %v1682_v56  ;;  %v6035_v23 = vadd.f32 1.0, %v4570_v2  ;;  %4573 = vpow2.f32 %v4214_v44  ;;  %v6037_v12 = vpop.eup %4571  ;;  %v2291_v37 = vmul.f32 %v5974_v36, %v2290_v43  ;;  %vm6056_vm13 = vmor %vm1694_vm4, %vm1695_vm11 }
 0x4c5   : > { %v1804_v30 = vmul.f32 %v1687_v1, %v5876_v19  ;;  %v1691_v4 = vsub.f32 1.0, %v1690_v11  ;;  %4575 = vrsqrt.f32 %v6031_v49  ;;  %v2596_v6 = vadd.f32 %v5966_v10, %v2560_v62  ;;  %v6066_v11 = vpop.f32.mrf.mxu2 }
 0x4c6   : > { %v1132_v16 = vpop.trf.xlu2  ;;  %4577 = vrcp.f32 %v6035_v23  ;;  %v1701_v38 = vor.u32 1.1754944e-38, %v1700_v9  ;;  %v2295_v56 = vsel %vm6048_vm12, %v5974_v36, %v2291_v37  ;;  %v2297_v63 = vmul.f32 %v6037_v12, %v5983_v55  ;;  %v6074_v9 = vld [vmem:[%s7047_s9] ss:$0 sm:$0xff]  ;;  %3465 = vrot.lane.b32.xlu2 %v6066_v11, %s7095_s25 }
 0x4c7   : > { %v1692_v8 = vmul.f32 %v4568_v18, %v1691_v4  ;;  %4226 = vmatmul.msk.f32.gmra.mxu1 %vm725_vm2, %v2596_v6  ;;  %v6069_v44 = vadd.f32 %v5070_v42, %v1804_v30  ;;  %v6077_v36 = vadd.f32 %v6074_v9, %v1132_v16  ;;  %v2525_v1 = vmul.f32 %v2295_v56, %v5626_v21 }
 0x4c8   : > { %1917 = vadd.xlane.f32.xlu0 %v1916_v51  ;;  %v2298_v2 = vmul.f32 %v6037_v12, %v2297_v63  ;;  %v1713_v62 = vand.u32 2147483647, %v6035_v23  ;;  %vm2303_vm14 = vweird.f32 %v6037_v12  ;;  %vm1709_vm15 = vweird.f32 %v6035_v23 }
 0x4c9   : > { %7166 = vst [vmem:[#allocation16_spill] sm:$0xff] %v6069_v44  ;;  %v1693_v13 = vadd.f32 %v4568_v18, %v1692_v8  ;;  %v4215_v30 = vmul.f32 -1.442695, %v6077_v36  ;;  %v2561_v6 = vmul.f32 %v5951_v27, %v2525_v1  ;;  %v1715_v63 = vand.u32 2147483648, %v6035_v23 }
 0x4ca   : > { %v4574_v43 = vpop.eup %4573  ;;  %v2299_v16 = vmul.f32 0.5, %v2298_v2  ;;  %vm2302_vm6 = vweird.f32 %v5983_v55  ;;  %vm6106_vm7 = vcmp.eq.f32.partialorder %v1713_v62, 8.507059e+37  ;;  %vm2312_vm8 = vweird.f32 %v6031_v49 }
 0x4cb   : > { %v1697_v46 = vsel %vm6056_vm13, %v4568_v18, %v1693_v13  ;;  %v6087_v4 = vpop.eup %4575  ;;  %v6089_v51 = vadd.f32 1.0, %v4574_v43  ;;  %4579 = vpow2.f32 %v4215_v30  ;;  %v1919_v18 = vsel %vm725_vm2, %v6069_v44, 0.0  ;;  %vm2304_vm4 = vmor %vm2302_vm6, %vm2303_vm14 }
 0x4cc   : > { %v1702_v37 = vsel %vm1699_vm3, %v1701_v38, %v1697_v46  ;;  %v4578_v8 = vpop.eup %4577  ;;  %v2307_v21 = vmul.f32 %v6087_v4, %v6031_v49  ;;  %v2300_v56 = vsub.f32 1.5, %v2299_v16  ;;  %v2597_v43 = vadd.f32 %v5966_v10, %v2561_v6 }
 0x4cd   : > { %v1805_v7 = vmul.f32 %v1702_v37, %v5897_v5  ;;  %v1705_v38 = vmul.f32 %v4578_v8, %v6035_v23  ;;  %4581 = vrcp.f32 %v6089_v51  ;;  %vm1710_vm5 = vweird.f32 %v4578_v8 }
 0x4ce   : > { %v1133_v19 = vpop.trf.xlu2  ;;  %v2301_v2 = vmul.f32 %v6037_v12, %v2300_v56  ;;  %v2308_v1 = vmul.f32 %v6087_v4, %v2307_v21  ;;  %vm6124_vm9 = vmor %vm1709_vm15, %vm1710_vm5  ;;  %v1716_v21 = vor.u32 1.1754944e-38, %v1715_v63  ;;  %vm2313_vm10 = vweird.f32 %v6087_v4 }
 0x4cf   : > { %v1706_v13 = vsub.f32 1.0, %v1705_v38  ;;  %v6114_v46 = vadd.f32 %v6074_v9, %v1133_v19  ;;  %v6117_v55 = vadd.f32 %v5070_v42, %v1805_v7  ;;  %4227 = vmatmul.msk.f32.gmra.mxu1 %vm725_vm2, %v2597_v43  ;;  %vm1724_vm11 = vweird.f32 %v6089_v51  ;;  %vm2314_vm13 = vmor %vm2312_vm8, %vm2313_vm10 }
 0x4d0   : > { %1920 = vadd.xlane.f32.xlu0 %v1919_v18  ;;  %v2305_v37 = vsel %vm2304_vm4, %v6037_v12, %v2301_v2  ;;  %v2309_v16 = vmul.f32 0.5, %v2308_v1  ;;  %v1730_v23 = vand.u32 2147483648, %v6089_v51 }
 0x4d1   : > { %7169 = vst [vmem:[#allocation17_spill] sm:$0xff] %v6117_v55  ;;  %v1707_v30 = vmul.f32 %v4578_v8, %v1706_v13  ;;  %v4580_v62 = vpop.eup %4579  ;;  %v4216_v18 = vmul.f32 -1.442695, %v6114_v46  ;;  %v2526_v19 = vmul.f32 %v2305_v37, %v5650_v25  ;;  %v1922_v25 = vsel %vm725_vm2, %v6117_v55, 0.0 }
 0x4d2   : > { %v2310_v38 = vsub.f32 1.5, %v2309_v16  ;;  %v1296_v56 = vadd.f32 1.0, %v4580_v62  ;;  %v1728_v16 = vand.u32 2147483647, %v6089_v51 }
 0x4d3   : > { %v4582_v7 = vpop.eup %4581  ;;  %v1708_v12 = vadd.f32 %v4578_v8, %v1707_v30  ;;  %4583 = vpow2.f32 %v4216_v18  ;;  %v2562_v2 = vmul.f32 %v5951_v27, %v2526_v19 }
 0x4d4   : > { %v1720_v13 = vmul.f32 %v4582_v7, %v6089_v51  ;;  %v2311_v43 = vmul.f32 %v6087_v4, %v2310_v38  ;;  %4585 = vrcp.f32 %v1296_v56  ;;  %vm1725_vm12 = vweird.f32 %v4582_v7 }
 0x4d5   : > { %v1712_v1 = vsel %vm6124_vm9, %v4578_v8, %v1708_v12  ;;  %v2598_v6 = vadd.f32 %v5966_v10, %v2562_v2  ;;  %vm6159_vm3 = vmor %vm1724_vm11, %vm1725_vm12  ;;  %vm1729_vm14 = vcmp.eq.f32.partialorder %v1728_v16, 8.507059e+37  ;;  %vm1739_vm15 = vweird.f32 %v1296_v56 }
 0x4d6   : > { %v1134_v63 = vpop.trf.xlu2  ;;  %v1717_v30 = vsel %vm6106_vm7, %v1716_v21, %v1712_v1  ;;  %v1721_v37 = vsub.f32 1.0, %v1720_v13  ;;  %v2315_v62 = vsel %vm2314_vm13, %v6087_v4, %v2311_v43 }
 0x4d7   : > { %v1806_v8 = vmul.f32 %v1717_v30, %v5955_v17  ;;  %v6151_v18 = vadd.f32 %v6074_v9, %v1134_v63  ;;  %v2527_v21 = vmul.f32 %v2315_v62, %v5655_v35  ;;  %v1731_v17 = vor.u32 1.1754944e-38, %v1730_v23  ;;  %4228 = vmatmul.msk.f32.gmra.mxu1 %vm725_vm2, %v2598_v6 }
 0x4d8   : > { %v1722_v5 = vmul.f32 %v4582_v7, %v1721_v37  ;;  %1923 = vadd.xlane.f32.xlu0 %v1922_v25  ;;  %v1745_v63 = vand.u32 2147483648, %v1296_v56  ;;  %v1743_v37 = vand.u32 2147483647, %v1296_v56 }
 0x4d9   : > { %v6155_v19 = vadd.f32 %v5070_v42, %v1806_v8  ;;  %v4217_v4 = vmul.f32 -1.442695, %v6151_v18  ;;  %v4584_v9 = vpop.eup %4583  ;;  %v2563_v38 = vmul.f32 %v5951_v27, %v2527_v21 }
 0x4da   : > { %v1723_v12 = vadd.f32 %v4582_v7, %v1722_v5  ;;  %v4586_v35 = vpop.eup %4585  ;;  %v1297_v13 = vadd.f32 1.0, %v4584_v9  ;;  %v1746_v62 = vor.u32 1.1754944e-38, %v1745_v63  ;;  %vm1744_vm7 = vcmp.eq.f32.partialorder %v1743_v37, 8.507059e+37 }
 0x4db   : > { %7172 = vst [vmem:[#allocation18_spill] sm:$0xff] %v6155_v19  ;;  %4587 = vpow2.f32 %v4217_v4  ;;  %v1735_v2 = vmul.f32 %v4586_v35, %v1296_v56  ;;  %v1925_v23 = vsel %vm725_vm2, %v6155_v19, 0.0  ;;  %v2599_v43 = vadd.f32 %v5966_v10, %v2563_v38 }
 0x4dc   : > { %v1727_v51 = vsel %vm6159_vm3, %v4582_v7, %v1723_v12  ;;  %4589 = vrcp.f32 %v1297_v13  ;;  %vm1740_vm5 = vweird.f32 %v4586_v35  ;;  %vm1754_vm4 = vweird.f32 %v1297_v13 }
 0x4dd   : > { %v1732_v1 = vsel %vm1729_vm14, %v1731_v17, %v1727_v51  ;;  %v1736_v30 = vsub.f32 1.0, %v1735_v2  ;;  %vm1741_vm6 = vmor %vm1739_vm15, %vm1740_vm5  ;;  %v1760_v56 = vand.u32 2147483648, %v1297_v13  ;;  %v1758_v38 = vand.u32 2147483647, %v1297_v13 }
 0x4de   : > { %v1807_v25 = vmul.f32 %v1732_v1, %v6017_v0 }
 0x4df   : > { %v1737_v16 = vmul.f32 %v4586_v35, %v1736_v30  ;;  %4229 = vmatmul.msk.f32.gmra.mxu1 %vm725_vm2, %v2599_v43  ;;  %v1761_v1 = vor.u32 1.1754944e-38, %v1760_v56  ;;  %vm1759_vm10 = vcmp.eq.f32.partialorder %v1758_v38, 8.507059e+37 }
 0x4e0   : > { %1926 = vadd.xlane.f32.xlu0 %v1925_v23  ;;  %v6173_v7 = vadd.f32 %v5070_v42, %v1807_v25 }
 0x4e1   : > { %v4588_v8 = vpop.eup %4587  ;;  %v1738_v6 = vadd.f32 %v4586_v35, %v1737_v16 }
 0x4e2   : > { %7175 = vst [vmem:[#allocation19_spill] sm:$0xff] %v6173_v7  ;;  %v1298_v5 = vadd.f32 1.0, %v4588_v8  ;;  %v4590_v21 = vpop.eup %4589  ;;  %v1928_v4 = vsel %vm725_vm2, %v6173_v7, 0.0 }
 0x4e3   : > { %v1742_v49 = vsel %vm1741_vm6, %v4586_v35, %v1738_v6  ;;  %v1750_v17 = vmul.f32 %v4590_v21, %v1297_v13  ;;  %vm1755_vm8 = vweird.f32 %v4590_v21  ;;  %v2737_v35 = vpop.f32.mrf.mxu1 }
 0x4e4   : > { %4591 = vrcp.f32 %v1298_v5  ;;  %v1747_v0 = vsel %vm1744_vm7, %v1746_v62, %v1742_v49  ;;  %vm1756_vm9 = vmor %vm1754_vm4, %vm1755_vm8  ;;  %vm1769_vm11 = vweird.f32 %v1298_v5  ;;  %v1773_v30 = vand.u32 2147483647, %v1298_v5 }
 0x4e5   : > { %v1808_v9 = vmul.f32 %v1747_v0, %v6077_v36  ;;  %v1751_v12 = vsub.f32 1.0, %v1750_v17  ;;  %v6186_v36 = vpop.xlane.xlu0 %1890  ;;  %v1775_v37 = vand.u32 2147483648, %v1298_v5 }
 0x4e6   : > { %vm1774_vm3 = vcmp.eq.f32.partialorder %v1773_v30, 8.507059e+37 }
 0x4e7   : > { %v1752_v2 = vmul.f32 %v4590_v21, %v1751_v12  ;;  %v6184_v63 = vadd.f32 %v5070_v42, %v1808_v9  ;;  %v1776_v17 = vor.u32 1.1754944e-38, %v1775_v37 }
 0x4e8   : > { %v6179_v51 = vpop.f32.mrf.mxu2  ;;  %1929 = vadd.xlane.f32.xlu0 %v1928_v4 }
 0x4e9   : > { %4252 = vmatpush.xpose.msk.msrb.mxu2 %vm725_vm2, %v6179_v51  ;;  %7176 = vst [vmem:[#allocation20_spill] sm:$0xff] %v6184_v63  ;;  %v1753_v43 = vadd.f32 %v4590_v21, %v1752_v2  ;;  %v1931_v62 = vsel %vm725_vm2, %v6184_v63, 0.0 }
 0x4ea   : > { %v4592_v23 = vpop.eup %4591 }
 0x4eb   : > { %v1765_v25 = vmul.f32 %v4592_v23, %v1298_v5  ;;  %v1757_v13 = vsel %vm1756_vm9, %v4590_v21, %v1753_v43  ;;  %vm1770_vm12 = vweird.f32 %v4592_v23  ;;  %v2740_v5 = vpop.f32.mrf.mxu1 }
 0x4ec   : > { %v1762_v16 = vsel %vm1759_vm10, %v1761_v1, %v1757_v13  ;;  %vm1771_vm13 = vmor %vm1769_vm11, %vm1770_vm12 }
 0x4ed   : > { %4253 = vmatpush.xpose.msk.msrb.mxu2 %vm725_vm2, %v6066_v11  ;;  %v1766_v8 = vsub.f32 1.0, %v1765_v25  ;;  %v1809_v6 = vmul.f32 %v1762_v16, %v6114_v46 }
 0x4ef   : > { %v1767_v49 = vmul.f32 %v4592_v23, %v1766_v8  ;;  %v6195_v11 = vadd.f32 %v5070_v42, %v1809_v6 }
 0x4f0   : > { %4254 = vmatmul.msk.f32.vlgmr.msrb.gmra.mxu2 %vm725_vm2, %v2737_v35  ;;  %1932 = vadd.xlane.f32.xlu0 %v1931_v62 }
 0x4f1   : > { %7177 = vst [vmem:[#allocation21_spill] sm:$0xff] %v6195_v11  ;;  %v1768_v21 = vadd.f32 %v4592_v23, %v1767_v49  ;;  %v1934_v46 = vsel %vm725_vm2, %v6195_v11, 0.0 }
 0x4f3   : > { %v1772_v0 = vsel %vm1771_vm13, %v4592_v23, %v1768_v21  ;;  %v2743_v38 = vpop.f32.mrf.mxu1 }
 0x4f4   : > { %v1777_v4 = vsel %vm1774_vm3, %v1776_v17, %v1772_v0 }
 0x4f5   : > { %v1894_v56 = vpop.xlane.xlu0 %1893  ;;  %v1810_v9 = vmul.f32 %v1777_v4, %v6151_v18 }
 0x4f7   : > { %v6202_v12 = vadd.f32 %v5070_v42, %v1810_v9 }
 0x4f8   : > { %4255 = vmatmul.msk.f32.gmra.mxu2 %vm725_vm2, %v2740_v5  ;;  %1935 = vadd.xlane.f32.xlu0 %v1934_v46 }
 0x4f9   : > { %7178 = vst [vmem:[#allocation22_spill] sm:$0xff] %v6202_v12  ;;  %v1937_v35 = vsel %vm725_vm2, %v6202_v12, 0.0 }
 0x4fb   : > { %v2746_v18 = vpop.f32.mrf.mxu1 }
 0x4fd   : > { %v6204_v2 = vpop.xlane.xlu0 %1896 }
 0x500   : > { %4256 = vmatmul.msk.f32.gmra.mxu2 %vm725_vm2, %v2743_v38  ;;  %1938 = vadd.xlane.f32.xlu0 %v1937_v35 }
 0x503   : > { %v2749_v42 = vpop.f32.mrf.mxu1 }
 0x505   : > { %v6209_v1 = vpop.xlane.xlu0 %1899 }
 0x508   : > { %4257 = vmatmul.msk.f32.gmra.mxu2 %vm725_vm2, %v2746_v18  ;;  %v1955_v18 = vmul.f32 %v6186_v36, %v5015_v29 }
 0x50a   : > { %v2074_v23 = vpop.xlane.xlu1 %2073 }
 0x50b   : > { %v2144_v43 = vmul.f32 %v2074_v23, %v5015_v29  ;;  %v2752_v37 = vpop.f32.mrf.mxu1 }
 0x50d   : > { %v6213_v25 = vpop.xlane.xlu0 %1902  ;;  %v2176_v13 = vadd.f32 1e-05, %v2144_v43 }
 0x50f   : > { %4593 = vrsqrt.f32 %v2176_v13  ;;  %vm2322_vm15 = vweird.f32 %v2176_v13 }
 0x510   : > { %4258 = vmatmul.msk.f32.gmra.mxu2 %vm725_vm2, %v2749_v42 }
 0x515   : > { %v4594_v30 = vpop.eup %4593  ;;  %v6216_v16 = vpop.xlane.xlu0 %1905 }
 0x516   : > { %v2317_v8 = vmul.f32 %v4594_v30, %v2176_v13  ;;  %vm2323_vm14 = vweird.f32 %v4594_v30 }
 0x517   : > { %vm2324_vm5 = vmor %vm2322_vm15, %vm2323_vm14 }
 0x518   : > { %4259 = vmatmul.msk.f32.gmra.mxu2 %vm725_vm2, %v2752_v37  ;;  %v2318_v62 = vmul.f32 %v4594_v30, %v2317_v8 }
 0x51a   : > { %v2077_v6 = vpop.xlane.xlu1 %2076  ;;  %v2319_v17 = vmul.f32 0.5, %v2318_v62 }
 0x51b   : > { %v2145_v49 = vmul.f32 %v2077_v6, %v5015_v29 }
 0x51c   : > { %v2320_v5 = vsub.f32 1.5, %v2319_v17  ;;  %v1956_v17 = vmul.f32 %v1894_v56, %v5015_v29  ;;  %v1957_v56 = vmul.f32 %v6204_v2, %v5015_v29  ;;  %v1958_v2 = vmul.f32 %v6209_v1, %v5015_v29 }
 0x51d   : > { %v2177_v21 = vadd.f32 1e-05, %v2145_v49  ;;  %v6220_v4 = vpop.xlane.xlu0 %1908 }
 0x51e   : > { %v2321_v0 = vmul.f32 %v4594_v30, %v2320_v5 }
 0x51f   : > { %4595 = vrsqrt.f32 %v2177_v21  ;;  %vm2332_vm7 = vweird.f32 %v2177_v21 }
 0x520   : > { %v2325_v46 = vsel %vm2324_vm5, %v4594_v30, %v2321_v0 }
 0x521   : > { %v1888_v9 = vpop.xlane.xlu2 %1887  ;;  %v2528_v35 = vmul.f32 %v2325_v46, %v5770_v28  ;;  %v6235_v28 = vsub.f32 %v5415_v41, %v1955_v18  ;;  %v6243_v46 = vsub.f32 %v5696_v15, %v1956_v17  ;;  %v1959_v17 = vmul.f32 %v6213_v25, %v5015_v29 }
 0x522   : > { %v1954_v38 = vmul.f32 %v1888_v9, %v5015_v29 }
 0x523   : > { %v2755_v23 = vpop.f32.mrf.mxu1  ;;  %v2564_v13 = vmul.f32 %v5951_v27, %v2528_v35  ;;  %v2019_v0 = vmul.f32 %v6235_v28, %v6235_v28  ;;  %v6273_v1 = vsub.f32 %v5789_v52, %v1959_v17 }
 0x524   : > { %v6227_v43 = vsub.f32 %v5865_v39, %v1954_v38  ;;  %4260 = vmatmul.msk.f32.gmra.mxu2 %vm725_vm2, %v2755_v23 }
 0x525   : > { %v4596_v42 = vpop.eup %4595  ;;  %v2600_v8 = vadd.f32 %v5966_v10, %v2564_v13  ;;  %v1912_v49 = vpop.xlane.xlu0 %1911  ;;  %v2081_v35 = vsel %vm725_vm2, %v2019_v0, 0.0  ;;  %v2020_v13 = vmul.f32 %v6243_v46, %v6243_v46 }
 0x526   : > { %v2327_v37 = vmul.f32 %v4596_v42, %v2177_v21  ;;  %v2018_v30 = vmul.f32 %v6227_v43, %v6227_v43  ;;  %vm2333_vm6 = vweird.f32 %v4596_v42 }
 0x527   : > { %4230 = vmatmul.msk.f32.gmra.mxu1 %vm725_vm2, %v2600_v8  ;;  %vm2334_vm4 = vmor %vm2332_vm7, %vm2333_vm6 }
 0x528   : > { %v2328_v62 = vmul.f32 %v4596_v42, %v2327_v37  ;;  %v2078_v36 = vsel %vm725_vm2, %v2018_v30, 0.0  ;;  %v2084_v30 = vsel %vm725_vm2, %v2020_v13, 0.0 }
 0x529   : > { %2079 = vadd.xlane.f32.xlu1 %v2078_v36  ;;  %v6264_v36 = vsub.f32 %v5746_v32, %v1958_v2 }
 0x52a   : > { %v2329_v6 = vmul.f32 0.5, %v2328_v62 }
 0x52c   : > { %v2330_v5 = vsub.f32 1.5, %v2329_v6 }
 0x52e   : > { %v2331_v9 = vmul.f32 %v4596_v42, %v2330_v5  ;;  %v2022_v5 = vmul.f32 %v6264_v36, %v6264_v36 }
 0x530   : > { %v2335_v38 = vsel %vm2334_vm4, %v4596_v42, %v2331_v9  ;;  %v6255_v42 = vsub.f32 %v5708_v40, %v1957_v56 }
 0x531   : > { %2082 = vadd.xlane.f32.xlu1 %v2081_v35  ;;  %v2529_v18 = vmul.f32 %v2335_v38, %v5844_v3  ;;  %v2090_v38 = vsel %vm725_vm2, %v2022_v5, 0.0  ;;  %v1960_v35 = vmul.f32 %v6216_v16, %v5015_v29  ;;  %v1962_v5 = vmul.f32 %v1912_v49, %v5015_v29 }
 0x532   : > { %v2021_v8 = vmul.f32 %v6255_v42, %v6255_v42 }
 0x533   : > { %v2565_v23 = vmul.f32 %v5951_v27, %v2529_v18  ;;  %v1915_v37 = vpop.xlane.xlu0 %1914  ;;  %v2023_v18 = vmul.f32 %v6273_v1, %v6273_v1 }
 0x534   : > { %v2087_v6 = vsel %vm725_vm2, %v2021_v8, 0.0 }
 0x535   : > { %v2601_v21 = vadd.f32 %v5966_v10, %v2565_v23  ;;  %v2758_v3 = vpop.f32.mrf.mxu1  ;;  %v6281_v23 = vsub.f32 %v5823_v54, %v1960_v35  ;;  %v2093_v13 = vsel %vm725_vm2, %v2023_v18, 0.0  ;;  %v6305_v18 = vsub.f32 %v5893_v48, %v1962_v5 }
 0x536   : > { %4261 = vmatmul.msk.f32.gmra.mxu2 %vm725_vm2, %v2758_v3 }
 0x537   : > { %4231 = vmatmul.msk.f32.gmra.mxu1 %vm725_vm2, %v2601_v21  ;;  %v1961_v21 = vmul.f32 %v6220_v4, %v5015_v29  ;;  %v2026_v49 = vmul.f32 %v6305_v18, %v6305_v18 }
 0x539   : > { %2085 = vadd.xlane.f32.xlu1 %v2084_v30  ;;  %v2024_v30 = vmul.f32 %v6281_v23, %v6281_v23  ;;  %v6291_v2 = vsub.f32 %v5861_v22, %v1961_v21  ;;  %v1963_v21 = vmul.f32 %v1915_v37, %v5015_v29 }
 0x53b   : > { %v1918_v62 = vpop.xlane.xlu0 %1917  ;;  %v2096_v17 = vsel %vm725_vm2, %v2024_v30, 0.0 }
 0x53c   : > { %v1964_v37 = vmul.f32 %v1918_v62, %v5015_v29 }
 0x541   : > { %2088 = vadd.xlane.f32.xlu1 %v2087_v6 }
 0x543   : > { %v1921_v0 = vpop.xlane.xlu0 %1920 }
 0x544   : > { %v2761_v9 = vpop.f32.mrf.mxu1 }
 0x545   : > { %4262 = vmatmul.msk.f32.gmra.mxu2 %vm725_vm2, %v2761_v9 }
 0x549   : > { %2091 = vadd.xlane.f32.xlu1 %v2090_v38  ;;  %v2025_v38 = vmul.f32 %v6291_v2, %v6291_v2 }
 0x54b   : > { %v1924_v25 = vpop.xlane.xlu0 %1923 }
 0x54c   : > { %v2764_v56 = vpop.f32.mrf.mxu1 }
 0x54d   : > { %4263 = vmatmul.msk.f32.gmra.mxu2 %vm725_vm2, %v2764_v56 }
 0x551   : > { %2094 = vadd.xlane.f32.xlu1 %v2093_v13  ;;  %v2099_v13 = vsel %vm725_vm2, %v2025_v38, 0.0 }
 0x553   : > { %v1927_v16 = vpop.xlane.xlu0 %1926 }
 0x554   : > { %v1967_v3 = vmul.f32 %v1927_v16, %v5015_v29  ;;  %v2767_v6 = vpop.f32.mrf.mxu1 }
 0x555   : > { %4264 = vmatmul.msk.f32.gmra.mxu2 %vm725_vm2, %v2767_v6 }
 0x556   : > { %v6294_v8 = vsub.f32 %v6155_v19, %v1967_v3  ;;  %v6314_v3 = vsub.f32 %v5977_v59, %v1963_v21 }
 0x558   : > { %v2031_v4 = vmul.f32 %v6294_v8, %v6294_v8 }
 0x559   : > { %2097 = vadd.xlane.f32.xlu1 %v2096_v17  ;;  %v2102_v17 = vsel %vm725_vm2, %v2026_v49, 0.0  ;;  %v1965_v49 = vmul.f32 %v1921_v0, %v5015_v29  ;;  %v1966_v0 = vmul.f32 %v1924_v25, %v5015_v29 }
 0x55a   : > { %v2117_v9 = vsel %vm725_vm2, %v2031_v4, 0.0 }
 0x55b   : > { %v1930_v35 = vpop.xlane.xlu0 %1929  ;;  %2118 = vadd.xlane.f32.xlu0 %v2117_v9  ;;  %v2027_v9 = vmul.f32 %v6314_v3, %v6314_v3 }
 0x55c   : > { %v2770_v56 = vpop.f32.mrf.mxu1  ;;  %v1968_v25 = vmul.f32 %v1930_v35, %v5015_v29 }
 0x55d   : > { %4265 = vmatmul.msk.f32.gmra.mxu2 %vm725_vm2, %v2770_v56  ;;  %v6327_v56 = vsub.f32 %v6021_v57, %v1964_v37 }
 0x561   : > { %2100 = vadd.xlane.f32.xlu1 %v2099_v13  ;;  %v2105_v13 = vsel %vm725_vm2, %v2027_v9, 0.0 }
 0x563   : > { %v1933_v30 = vpop.xlane.xlu0 %1932 }
 0x564   : > { %v1969_v16 = vmul.f32 %v1933_v30, %v5015_v29  ;;  %v2028_v30 = vmul.f32 %v6327_v56, %v6327_v56 }
 0x566   : > { %v6317_v6 = vsub.f32 %v6184_v63, %v1969_v16  ;;  %v2108_v37 = vsel %vm725_vm2, %v2028_v30, 0.0 }
 0x568   : > { %v2033_v4 = vmul.f32 %v6317_v6, %v6317_v6 }
 0x569   : > { %2103 = vadd.xlane.f32.xlu1 %v2102_v17  ;;  %v6335_v17 = vsub.f32 %v6069_v44, %v1965_v49 }
 0x56a   : > { %v2123_v5 = vsel %vm725_vm2, %v2033_v4, 0.0 }
 0x56b   : > { %v1936_v38 = vpop.xlane.xlu0 %1935  ;;  %2124 = vadd.xlane.f32.xlu0 %v2123_v5 }
 0x571   : > { %2106 = vadd.xlane.f32.xlu1 %v2105_v13 }
 0x573   : > { %v2985_v21 = vpop.f32.mrf.mxu2  ;;  %v1939_v62 = vpop.xlane.xlu0 %1938 }
 0x574   : > { %v1971_v16 = vmul.f32 %v1939_v62, %v5015_v29  ;;  %v2029_v62 = vmul.f32 %v6335_v17, %v6335_v17  ;;  %v6376_v32 = vmul.f32 0.17677669, %v2985_v21 }
 0x576   : > { %v6338_v4 = vsub.f32 %v6202_v12, %v1971_v16  ;;  %v6350_v16 = vsub.f32 %v6117_v55, %v1966_v0  ;;  %v2111_v30 = vsel %vm725_vm2, %v2029_v62, 0.0  ;;  %v1970_v62 = vmul.f32 %v1936_v38, %v5015_v29 }
 0x578   : > { %v2035_v5 = vmul.f32 %v6338_v4, %v6338_v4 }
 0x579   : > { %2109 = vadd.xlane.f32.xlu1 %v2108_v37 }
 0x57a   : > { %v2129_v13 = vsel %vm725_vm2, %v2035_v5, 0.0  ;;  %v2030_v5 = vmul.f32 %v6350_v16, %v6350_v16 }
 0x57b   : > { %v2988_v9 = vpop.f32.mrf.mxu2  ;;  %2130 = vadd.xlane.f32.xlu0 %v2129_v13  ;;  %v6359_v13 = vsub.f32 %v6173_v7, %v1968_v25 }
 0x57c   : > { %v6347_v49 = vmul.f32 0.17677669, %v2988_v9  ;;  %v2114_v9 = vsel %vm725_vm2, %v2030_v5, 0.0 }
 0x57d   : > { %v2032_v40 = vmul.f32 %v6359_v13, %v6359_v13 }
 0x57e   : > { %v3116_v37 = vsel %vm696_vm1, %v6347_v49, -inf }
 0x57f   : > { %v2120_v25 = vsel %vm725_vm2, %v2032_v40, 0.0 }
 0x581   : > { %2112 = vadd.xlane.f32.xlu1 %v2111_v30 }
 0x583   : > { %v2991_v15 = vpop.f32.mrf.mxu2  ;;  %3117 = vmax.xlane.f32.xlu0 %v3116_v37  ;;  %v6370_v37 = vsub.f32 %v6195_v11, %v1970_v62 }
 0x589   : > { %2115 = vadd.xlane.f32.xlu1 %v2114_v9  ;;  %v2034_v9 = vmul.f32 %v6370_v37, %v6370_v37 }
 0x58b   : > { %v2994_v0 = vpop.f32.mrf.mxu2  ;;  %v2126_v38 = vsel %vm725_vm2, %v2034_v9, 0.0  ;;  %v6385_v9 = vmul.f32 0.17677669, %v2991_v15 }
 0x58c   : > { %v6363_v30 = vmul.f32 0.17677669, %v2994_v0 }
 0x58e   : > { %v3122_v35 = vsel %vm696_vm1, %v6363_v30, -inf }
 0x58f   : > { %3123 = vmax.xlane.f32.xlu0 %v3122_v35 }
 0x591   : > { %2121 = vadd.xlane.f32.xlu1 %v2120_v25  ;;  %v3113_v25 = vsel %vm696_vm1, %v6376_v32, -inf }
 0x593   : > { %v2997_v5 = vpop.f32.mrf.mxu2 }
 0x594   : > { %v6391_v59 = vmul.f32 0.17677669, %v2997_v5 }
 0x596   : > { %v3125_v19 = vsel %vm696_vm1, %v6391_v59, -inf }
 0x599   : > { %2127 = vadd.xlane.f32.xlu1 %v2126_v38 }
 0x59b   : > { %v3000_v0 = vpop.f32.mrf.mxu2 }
 0x59c   : > { %v6378_v52 = vmul.f32 0.17677669, %v3000_v0  ;;  %v2080_v54 = vpop.xlane.xlu1 %2079 }
 0x59d   : > { %v2146_v35 = vmul.f32 %v2080_v54, %v5015_v29 }
 0x59e   : > { %v3128_v62 = vsel %vm696_vm1, %v6378_v52, -inf }
 0x59f   : > { %v2178_v40 = vadd.f32 1e-05, %v2146_v35  ;;  %3129 = vmax.xlane.f32.xlu0 %v3128_v62  ;;  %v3119_v35 = vsel %vm696_vm1, %v6385_v9, -inf }
 0x5a1   : > { %4597 = vrsqrt.f32 %v2178_v40  ;;  %3114 = vmax.xlane.f32.xlu1 %v3113_v25  ;;  %vm2342_vm9 = vweird.f32 %v2178_v40 }
 0x5a4   : > { %v2083_v38 = vpop.xlane.xlu1 %2082  ;;  %v2773_v0 = vpop.f32.mrf.mxu1 }
 0x5a5   : > { %v2147_v21 = vmul.f32 %v2083_v38, %v5015_v29  ;;  %4266 = vmatmul.msk.f32.gmra.mxu2 %vm725_vm2, %v2773_v0 }
 0x5a7   : > { %v4598_v22 = vpop.eup %4597  ;;  %v2179_v48 = vadd.f32 1e-05, %v2147_v21  ;;  %v3003_v7 = vpop.f32.mrf.mxu2 }
 0x5a8   : > { %v2337_v54 = vmul.f32 %v4598_v22, %v2178_v40  ;;  %vm2343_vm8 = vweird.f32 %v4598_v22 }
 0x5a9   : > { %4599 = vrsqrt.f32 %v2179_v48  ;;  %3120 = vmax.xlane.f32.xlu1 %v3119_v35  ;;  %vm2344_vm10 = vmor %vm2342_vm9, %vm2343_vm8  ;;  %vm2352_vm12 = vweird.f32 %v2179_v48 }
 0x5aa   : > { %v2338_v62 = vmul.f32 %v4598_v22, %v2337_v54 }
 0x5ac   : > { %v2339_v25 = vmul.f32 0.5, %v2338_v62  ;;  %v2086_v15 = vpop.xlane.xlu1 %2085 }
 0x5ad   : > { %v2148_v57 = vmul.f32 %v2086_v15, %v5015_v29  ;;  %v6397_v15 = vmul.f32 0.17677669, %v3003_v7 }
 0x5ae   : > { %v2340_v44 = vsub.f32 1.5, %v2339_v25 }
 0x5af   : > { %v4600_v38 = vpop.eup %4599  ;;  %v2180_v55 = vadd.f32 1e-05, %v2148_v57  ;;  %v3131_v7 = vsel %vm696_vm1, %v6397_v15, -inf }
 0x5b0   : > { %v2341_v21 = vmul.f32 %v4598_v22, %v2340_v44  ;;  %v2347_v0 = vmul.f32 %v4600_v38, %v2179_v48  ;;  %vm2353_vm11 = vweird.f32 %v4600_v38 }
 0x5b1   : > { %4601 = vrsqrt.f32 %v2180_v55  ;;  %3126 = vmax.xlane.f32.xlu1 %v3125_v19  ;;  %vm2354_vm13 = vmor %vm2352_vm12, %vm2353_vm11  ;;  %vm2362_vm14 = vweird.f32 %v2180_v55 }
 0x5b2   : > { %v2345_v5 = vsel %vm2344_vm10, %v4598_v22, %v2341_v21  ;;  %v2348_v54 = vmul.f32 %v4600_v38, %v2347_v0 }
 0x5b3   : > { %v2530_v35 = vmul.f32 %v2345_v5, %v6227_v43 }
 0x5b4   : > { %v2349_v62 = vmul.f32 0.5, %v2348_v54  ;;  %v2776_v25 = vpop.f32.mrf.mxu1  ;;  %v2089_v63 = vpop.xlane.xlu1 %2088 }
 0x5b5   : > { %v2149_v57 = vmul.f32 %v2089_v63, %v5015_v29  ;;  %4267 = vmatmul.msk.f32.gmra.mxu2 %vm725_vm2, %v2776_v25  ;;  %v2566_v44 = vmul.f32 %v5951_v27, %v2530_v35 }
 0x5b6   : > { %v2350_v40 = vsub.f32 1.5, %v2349_v62 }
 0x5b7   : > { %v4602_v11 = vpop.eup %4601  ;;  %v2181_v12 = vadd.f32 1e-05, %v2149_v57  ;;  %v2602_v22 = vadd.f32 %v5966_v10, %v2566_v44 }
 0x5b8   : > { %v2351_v19 = vmul.f32 %v4600_v38, %v2350_v40  ;;  %v2357_v43 = vmul.f32 %v4602_v11, %v2180_v55  ;;  %vm2363_vm3 = vweird.f32 %v4602_v11 }
 0x5b9   : > { %4603 = vrsqrt.f32 %v2181_v12  ;;  %3132 = vmax.xlane.f32.xlu1 %v3131_v7  ;;  %4232 = vmatmul.msk.f32.gmra.mxu1 %vm725_vm2, %v2602_v22  ;;  %v3006_v25 = vpop.f32.mrf.mxu2  ;;  %vm2364_vm15 = vmor %vm2362_vm14, %vm2363_vm3  ;;  %vm2372_vm6 = vweird.f32 %v2181_v12 }
 0x5ba   : > { %v2355_v63 = vsel %vm2354_vm13, %v4600_v38, %v2351_v19  ;;  %v2358_v21 = vmul.f32 %v4602_v11, %v2357_v43  ;;  %v6409_v44 = vmul.f32 0.17677669, %v3006_v25 }
 0x5bb   : > { %v2531_v0 = vmul.f32 %v2355_v63, %v6235_v28 }
 0x5bc   : > { %v2359_v5 = vmul.f32 0.5, %v2358_v21  ;;  %v2092_v54 = vpop.xlane.xlu1 %2091  ;;  %v3134_v28 = vsel %vm696_vm1, %v6409_v44, -inf }
 0x5bd   : > { %v2150_v35 = vmul.f32 %v2092_v54, %v5015_v29  ;;  %v2567_v62 = vmul.f32 %v5951_v27, %v2531_v0 }
 0x5be   : > { %v2360_v48 = vsub.f32 1.5, %v2359_v5 }
 0x5bf   : > { %v4604_v57 = vpop.eup %4603  ;;  %v2182_v40 = vadd.f32 1e-05, %v2150_v35  ;;  %v2603_v7 = vadd.f32 %v5966_v10, %v2567_v62 }
 0x5c0   : > { %v2361_v22 = vmul.f32 %v4602_v11, %v2360_v48  ;;  %v2367_v38 = vmul.f32 %v4604_v57, %v2181_v12  ;;  %vm2373_vm5 = vweird.f32 %v4604_v57  ;;  %v6429_v12 = vld [vmem:[%s7055_s17] ss:$0 sm:$0xff] }
 0x5c1   : > { %4605 = vrsqrt.f32 %v2182_v40  ;;  %4233 = vmatmul.msk.f32.gmra.mxu1 %vm725_vm2, %v2603_v7  ;;  %3135 = vmax.xlane.f32.xlu1 %v3134_v28  ;;  %vm2374_vm7 = vmor %vm2372_vm6, %vm2373_vm5  ;;  %vm2382_vm8 = vweird.f32 %v2182_v40 }
 0x5c2   : > { %v2365_v19 = vsel %vm2364_vm15, %v4602_v11, %v2361_v22  ;;  %v2368_v43 = vmul.f32 %v4604_v57, %v2367_v38 }
 0x5c3   : > { %v2532_v63 = vmul.f32 %v2365_v19, %v6243_v46 }
 0x5c4   : > { %v2369_v21 = vmul.f32 0.5, %v2368_v43  ;;  %v2095_v0 = vpop.xlane.xlu1 %2094 }
 0x5c5   : > { %v2151_v5 = vmul.f32 %v2095_v0, %v5015_v29  ;;  %v2568_v54 = vmul.f32 %v5951_v27, %v2532_v63 }
 0x5c6   : > { %v2370_v55 = vsub.f32 1.5, %v2369_v21 }
 0x5c7   : > { %v4606_v35 = vpop.eup %4605  ;;  %v2183_v62 = vadd.f32 1e-05, %v2151_v5  ;;  %v2604_v48 = vadd.f32 %v5966_v10, %v2568_v54 }
 0x5c8   : > { %v2371_v25 = vmul.f32 %v4604_v57, %v2370_v55  ;;  %v2377_v7 = vmul.f32 %v4606_v35, %v2182_v40  ;;  %v3009_v22 = vpop.f32.mrf.mxu2  ;;  %vm2383_vm4 = vweird.f32 %v4606_v35 }
 0x5c9   : > { %4607 = vrsqrt.f32 %v2183_v62  ;;  %4234 = vmatmul.msk.f32.gmra.mxu1 %vm725_vm2, %v2604_v48  ;;  %v6420_v38 = vmul.f32 0.17677669, %v3009_v22  ;;  %vm2384_vm9 = vmor %vm2382_vm8, %vm2383_vm4  ;;  %vm2392_vm11 = vweird.f32 %v2183_v62 }
 0x5ca   : > { %v2375_v11 = vsel %vm2374_vm7, %v4604_v57, %v2371_v25  ;;  %v2378_v46 = vmul.f32 %v4606_v35, %v2377_v7 }
 0x5cb   : > { %v2533_v27 = vmul.f32 %v2375_v11, %v6255_v42  ;;  %v3137_v43 = vsel %vm696_vm1, %v6420_v38, -inf  ;;  %v6435_v42 = vld [vmem:[%s7056_s18] ss:$0 sm:$0xff] }
 0x5cc   : > { %v2379_v28 = vmul.f32 0.5, %v2378_v46  ;;  %v2098_v19 = vpop.xlane.xlu1 %2097  ;;  %3138 = vmax.xlane.f32.xlu1 %v3137_v43 }
 0x5cd   : > { %v2152_v10 = vmul.f32 %v2098_v19, %v5015_v29  ;;  %v2569_v57 = vmul.f32 %v6429_v12, %v2533_v27 }
 0x5ce   : > { %v2380_v63 = vsub.f32 1.5, %v2379_v28 }
 0x5cf   : > { %v4608_v21 = vpop.eup %4607  ;;  %v2184_v0 = vadd.f32 1e-05, %v2152_v10  ;;  %v2605_v5 = vadd.f32 %v6435_v42, %v2569_v57 }
 0x5d0   : > { %v2381_v54 = vmul.f32 %v4606_v35, %v2380_v63  ;;  %v2387_v55 = vmul.f32 %v4608_v21, %v2183_v62  ;;  %v6440_v46 = vpop.f32.mrf.mxu2  ;;  %vm2393_vm10 = vweird.f32 %v4608_v21 }
 0x5d1   : > { %4609 = vrsqrt.f32 %v2184_v0  ;;  %4235 = vmatmul.msk.f32.gmra.mxu1 %vm725_vm2, %v2605_v5  ;;  %vm2394_vm12 = vmor %vm2392_vm11, %vm2393_vm10  ;;  %vm2402_vm3 = vweird.f32 %v2184_v0 }
 0x5d2   : > { %v2385_v48 = vsel %vm2384_vm9, %v4606_v35, %v2381_v54  ;;  %v2388_v25 = vmul.f32 %v4608_v21, %v2387_v55 }
 0x5d3   : > { %v2534_v7 = vmul.f32 %v2385_v48, %v6264_v36 }
 0x5d4   : > { %v2389_v11 = vmul.f32 0.5, %v2388_v25  ;;  %v2101_v22 = vpop.xlane.xlu1 %2100 }
 0x5d5   : > { %v2153_v27 = vmul.f32 %v2101_v22, %v5015_v29  ;;  %v2570_v19 = vmul.f32 %v6429_v12, %v2534_v7 }
 0x5d6   : > { %v2390_v28 = vsub.f32 1.5, %v2389_v11 }
 0x5d7   : > { %v4610_v40 = vpop.eup %4609  ;;  %v2185_v43 = vadd.f32 1e-05, %v2153_v27  ;;  %v2606_v35 = vadd.f32 %v6435_v42, %v2570_v19  ;;  %v2119_v19 = vpop.xlane.xlu0 %2118 }
 0x5d8   : > { %v2391_v10 = vmul.f32 %v4608_v21, %v2390_v28  ;;  %v2397_v57 = vmul.f32 %v4610_v40, %v2184_v0  ;;  %v3015_v55 = vpop.f32.mrf.mxu2  ;;  %vm2403_vm13 = vweird.f32 %v4610_v40 }
 0x5d9   : > { %4611 = vrsqrt.f32 %v2185_v43  ;;  %4236 = vmatmul.msk.f32.gmra.mxu1 %vm725_vm2, %v2606_v35  ;;  %v6447_v25 = vmul.f32 0.17677669, %v3015_v55  ;;  %vm2404_vm14 = vmor %vm2402_vm3, %vm2403_vm13  ;;  %vm2412_vm5 = vweird.f32 %v2185_v43 }
 0x5da   : > { %v2395_v36 = vsel %vm2394_vm12, %v4608_v21, %v2391_v10  ;;  %v2398_v63 = vmul.f32 %v4610_v40, %v2397_v57 }
 0x5db   : > { %v2535_v5 = vmul.f32 %v2395_v36, %v6273_v1  ;;  %v3143_v21 = vsel %vm696_vm1, %v6447_v25, -inf }
 0x5dc   : > { %v2399_v54 = vmul.f32 0.5, %v2398_v63  ;;  %v2104_v48 = vpop.xlane.xlu1 %2103  ;;  %3144 = vmax.xlane.f32.xlu2 %v3143_v21 }
 0x5dd   : > { %v2154_v7 = vmul.f32 %v2104_v48, %v5015_v29  ;;  %v2571_v62 = vmul.f32 %v6429_v12, %v2535_v5 }
 0x5de   : > { %v2400_v11 = vsub.f32 1.5, %v2399_v54 }
 0x5df   : > { %v4612_v22 = vpop.eup %4611  ;;  %v2186_v27 = vadd.f32 1e-05, %v2154_v7  ;;  %v2607_v28 = vadd.f32 %v6435_v42, %v2571_v62 }
 0x5e0   : > { %v2401_v1 = vmul.f32 %v4610_v40, %v2400_v11  ;;  %v2407_v10 = vmul.f32 %v4612_v22, %v2185_v43  ;;  %vm2413_vm15 = vweird.f32 %v4612_v22  ;;  %v2125_v11 = vpop.xlane.xlu0 %2124 }
 0x5e1   : > { %4613 = vrsqrt.f32 %v2186_v27  ;;  %4237 = vmatmul.msk.f32.gmra.mxu1 %vm725_vm2, %v2607_v28  ;;  %vm2414_vm6 = vmor %vm2412_vm5, %vm2413_vm15  ;;  %vm2422_vm4 = vweird.f32 %v2186_v27 }
 0x5e2   : > { %v2405_v57 = vsel %vm2404_vm14, %v4610_v40, %v2401_v1  ;;  %v2408_v35 = vmul.f32 %v4612_v22, %v2407_v10 }
 0x5e3   : > { %v2536_v36 = vmul.f32 %v2405_v57, %v6281_v23 }
 0x5e4   : > { %v2409_v63 = vmul.f32 0.5, %v2408_v35  ;;  %v2107_v5 = vpop.xlane.xlu1 %2106 }
 0x5e5   : > { %v2155_v54 = vmul.f32 %v2107_v5, %v5015_v29  ;;  %v2572_v48 = vmul.f32 %v6429_v12, %v2536_v36 }
 0x5e6   : > { %v2410_v55 = vsub.f32 1.5, %v2409_v63 }
 0x5e7   : > { %v4614_v7 = vpop.eup %4613  ;;  %v2187_v0 = vadd.f32 1e-05, %v2155_v54  ;;  %v2608_v40 = vadd.f32 %v6435_v42, %v2572_v48 }
 0x5e8   : > { %v2411_v62 = vmul.f32 %v4612_v22, %v2410_v55  ;;  %v2417_v21 = vmul.f32 %v4614_v7, %v2186_v27  ;;  %vm2423_vm7 = vweird.f32 %v4614_v7  ;;  %v2159_v55 = vmul.f32 %v2119_v19, %v5015_v29 }
 0x5e9   : > { %4615 = vrsqrt.f32 %v2187_v0  ;;  %4238 = vmatmul.msk.f32.gmra.mxu1 %vm725_vm2, %v2608_v40  ;;  %vm2424_vm8 = vmor %vm2422_vm4, %vm2423_vm7  ;;  %vm2432_vm10 = vweird.f32 %v2187_v0 }
 0x5ea   : > { %v2415_v28 = vsel %vm2414_vm6, %v4612_v22, %v2411_v62  ;;  %v2418_v23 = vmul.f32 %v4614_v7, %v2417_v21 }
 0x5eb   : > { %v2537_v1 = vmul.f32 %v2415_v28, %v6291_v2  ;;  %v6469_v28 = vadd.f32 1e-05, %v2159_v55 }
 0x5ec   : > { %v2419_v10 = vmul.f32 0.5, %v2418_v23  ;;  %v2110_v57 = vpop.xlane.xlu1 %2109 }
 0x5ed   : > { %v2156_v35 = vmul.f32 %v2110_v57, %v5015_v29  ;;  %v2573_v36 = vmul.f32 %v6429_v12, %v2537_v1 }
 0x5ee   : > { %v2420_v63 = vsub.f32 1.5, %v2419_v10  ;;  %v6465_v62 = vpop.xlane.xlu0 %2130 }
 0x5ef   : > { %v4616_v43 = vpop.eup %4615  ;;  %v2188_v5 = vadd.f32 1e-05, %v2156_v35  ;;  %v2609_v54 = vadd.f32 %v6435_v42, %v2573_v36 }
 0x5f0   : > { %v2421_v22 = vmul.f32 %v4614_v7, %v2420_v63  ;;  %v2427_v48 = vmul.f32 %v4616_v43, %v2187_v0  ;;  %vm2433_vm9 = vweird.f32 %v4616_v43 }
 0x5f1   : > { %4617 = vrsqrt.f32 %v2188_v5  ;;  %4239 = vmatmul.msk.f32.gmra.mxu1 %vm725_vm2, %v2609_v54  ;;  %vm2434_vm11 = vmor %vm2432_vm10, %vm2433_vm9  ;;  %vm2442_vm13 = vweird.f32 %v2188_v5  ;;  %vm2472_vm9 = vweird.f32 %v6469_v28 }
 0x5f2   : > { %v2425_v2 = vsel %vm2424_vm8, %v4614_v7, %v2421_v22  ;;  %v2428_v21 = vmul.f32 %v4616_v43, %v2427_v48  ;;  %4619 = vrsqrt.f32 %v6469_v28 }
 0x5f3   : > { %v2538_v40 = vmul.f32 %v2425_v2, %v6305_v18 }
 0x5f4   : > { %v2429_v23 = vmul.f32 0.5, %v2428_v21  ;;  %v2113_v1 = vpop.xlane.xlu1 %2112 }
 0x5f5   : > { %v2157_v10 = vmul.f32 %v2113_v1, %v5015_v29  ;;  %v2574_v19 = vmul.f32 %v6429_v12, %v2538_v40 }
 0x5f6   : > { %v2430_v27 = vsub.f32 1.5, %v2429_v23  ;;  %v3118_v18 = vpop.xlane.xlu0 %3117 }
 0x5f7   : > { %v4618_v57 = vpop.eup %4617  ;;  %v2189_v35 = vadd.f32 1e-05, %v2157_v10  ;;  %v2610_v36 = vadd.f32 %v6435_v42, %v2574_v19  ;;  %v3210_v54 = vsub.f32 %v6347_v49, %v3118_v18  ;;  %v2161_v10 = vmul.f32 %v2125_v11, %v5015_v29 }
 0x5f8   : > { %v2431_v7 = vmul.f32 %v4616_v43, %v2430_v27  ;;  %v2437_v63 = vmul.f32 %v4618_v57, %v2188_v5  ;;  %v6480_v1 = vpop.eup %4619  ;;  %vm2443_vm12 = vweird.f32 %v4618_v57 }
 0x5f9   : > { %4621 = vrsqrt.f32 %v2189_v35  ;;  %4240 = vmatmul.msk.f32.gmra.mxu1 %vm725_vm2, %v2610_v36  ;;  %v3243_v2 = vmul.f32 1.442695, %v3210_v54  ;;  %vm2444_vm3 = vmor %vm2442_vm13, %vm2443_vm12  ;;  %vm2452_vm15 = vweird.f32 %v2189_v35  ;;  %vm2473_vm4 = vweird.f32 %v6480_v1 }
 0x5fa   : > { %v2435_v55 = vsel %vm2434_vm11, %v4616_v43, %v2431_v7  ;;  %v2438_v22 = vmul.f32 %v4618_v57, %v2437_v63  ;;  %v2467_v7 = vmul.f32 %v6480_v1, %v6469_v28  ;;  %v6489_v63 = vadd.f32 1e-05, %v2161_v10  ;;  %vm2474_vm10 = vmor %vm2472_vm9, %vm2473_vm4 }
 0x5fb   : > { %v2539_v48 = vmul.f32 %v2435_v55, %v6314_v3  ;;  %4623 = vpow2.f32 %v3243_v2  ;;  %v6505_v10 = vmul.f32 0.17677669, %v6440_v46 }
 0x5fc   : > { %v2439_v21 = vmul.f32 0.5, %v2438_v22  ;;  %v2116_v40 = vpop.xlane.xlu1 %2115  ;;  %v2468_v2 = vmul.f32 %v6480_v1, %v2467_v7 }
 0x5fd   : > { %v2158_v23 = vmul.f32 %v2116_v40, %v5015_v29  ;;  %v2575_v0 = vmul.f32 %v6429_v12, %v2539_v48 }
 0x5fe   : > { %v2440_v49 = vsub.f32 1.5, %v2439_v21 }
 0x5ff   : > { %v4622_v43 = vpop.eup %4621  ;;  %v6483_v19 = vadd.f32 1e-05, %v2158_v23  ;;  %v2611_v27 = vadd.f32 %v6435_v42, %v2575_v0 }
 0x600   : > { %v2441_v3 = vmul.f32 %v4618_v57, %v2440_v49  ;;  %v2447_v36 = vmul.f32 %v4622_v43, %v2189_v35  ;;  %vm2453_vm14 = vweird.f32 %v4622_v43  ;;  %v3140_v35 = vsel %vm696_vm1, %v6505_v10, -inf }
 0x601   : > { %4625 = vrsqrt.f32 %v6483_v19  ;;  %4241 = vmatmul.msk.f32.gmra.mxu1 %vm725_vm2, %v2611_v27  ;;  %v6492_v54 = vpop.eup %4623  ;;  %vm2454_vm5 = vmor %vm2452_vm15, %vm2453_vm14  ;;  %vm2462_vm7 = vweird.f32 %v6483_v19  ;;  %vm2492_vm14 = vweird.f32 %v6489_v63 }
 0x602   : > { %v2445_v18 = vsel %vm2444_vm3, %v4618_v57, %v2441_v3  ;;  %v2448_v11 = vmul.f32 %v4622_v43, %v2447_v36  ;;  %v3308_v5 = vsel %vm696_vm1, %v6492_v54, 0.0  ;;  %4627 = vrsqrt.f32 %v6489_v63  ;;  %v3124_v3 = vpop.xlane.xlu0 %3123 }
 0x603   : > { %v2540_v55 = vmul.f32 %v2445_v18, %v6327_v56  ;;  %3309 = vadd.xlane.f32.xlu1 %v3308_v5  ;;  %v2469_v36 = vmul.f32 0.5, %v2468_v2 }
 0x604   : > { %v2449_v22 = vmul.f32 0.5, %v2448_v11  ;;  %v2122_v48 = vpop.xlane.xlu1 %2121  ;;  %v3018_v11 = vpop.f32.mrf.mxu2 }
 0x605   : > { %v2160_v21 = vmul.f32 %v2122_v48, %v5015_v29  ;;  %v2576_v40 = vmul.f32 %v6429_v12, %v2540_v55  ;;  %v2470_v2 = vsub.f32 1.5, %v2469_v36 }
 0x606   : > { %v2450_v57 = vsub.f32 1.5, %v2449_v22  ;;  %v3212_v22 = vsub.f32 %v6363_v30, %v3124_v3  ;;  %v2163_v3 = vmul.f32 %v6465_v62, %v5015_v29 }
 0x607   : > { %v4626_v23 = vpop.eup %4625  ;;  %v6501_v0 = vadd.f32 1e-05, %v2160_v21  ;;  %v2612_v56 = vadd.f32 %v6435_v42, %v2576_v40  ;;  %v6518_v40 = vmul.f32 0.17677669, %v3018_v11 }
 0x608   : > { %v2451_v49 = vmul.f32 %v4622_v43, %v2450_v57  ;;  %v2457_v27 = vmul.f32 %v4626_v23, %v6483_v19  ;;  %v6512_v46 = vpop.eup %4627  ;;  %vm2463_vm6 = vweird.f32 %v4626_v23  ;;  %v6536_v19 = vadd.f32 1e-05, %v2163_v3 }
 0x609   : > { %4629 = vrsqrt.f32 %v6501_v0  ;;  %4242 = vmatmul.msk.f32.gmra.mxu1 %vm725_vm2, %v2612_v56  ;;  %v2487_v30 = vmul.f32 %v6512_v46, %v6489_v63  ;;  %v3247_v56 = vmul.f32 1.442695, %v3212_v22  ;;  %vm2464_vm8 = vmor %vm2462_vm7, %vm2463_vm6  ;;  %vm2482_vm12 = vweird.f32 %v6501_v0 }
 0x60a   : > { %v2455_v7 = vsel %vm2454_vm5, %v4622_v43, %v2451_v49  ;;  %v2458_v18 = vmul.f32 %v4626_v23, %v2457_v27  ;;  %vm2493_vm3 = vweird.f32 %v6512_v46 }
 0x60b   : > { %v2541_v55 = vmul.f32 %v2455_v7, %v6335_v17  ;;  %3141 = vmax.xlane.f32.xlu1 %v3140_v35  ;;  %v2488_v62 = vmul.f32 %v6512_v46, %v2487_v30  ;;  %vm2494_vm15 = vmor %vm2492_vm14, %vm2493_vm3 }
 0x60c   : > { %v2459_v5 = vmul.f32 0.5, %v2458_v18  ;;  %v2128_v48 = vpop.xlane.xlu1 %2127  ;;  %v2471_v18 = vmul.f32 %v6480_v1, %v2470_v2 }
 0x60d   : > { %v2162_v21 = vmul.f32 %v2128_v48, %v5015_v29  ;;  %v2577_v43 = vmul.f32 %v6429_v12, %v2541_v55  ;;  %v2489_v30 = vmul.f32 0.5, %v2488_v62 }
 0x60e   : > { %v2460_v57 = vsub.f32 1.5, %v2459_v5  ;;  %v3146_v5 = vsel %vm696_vm1, %v6518_v40, -inf }
 0x60f   : > { %v4630_v17 = vpop.eup %4629  ;;  %v6522_v49 = vadd.f32 1e-05, %v2162_v21  ;;  %v2613_v27 = vadd.f32 %v6435_v42, %v2577_v43 }
 0x610   : > { %v2461_v36 = vmul.f32 %v4626_v23, %v2460_v57  ;;  %v2477_v7 = vmul.f32 %v4630_v17, %v6501_v0  ;;  %vm2483_vm11 = vweird.f32 %v4630_v17 }
 0x611   : > { %4631 = vrsqrt.f32 %v6522_v49  ;;  %4243 = vmatmul.msk.f32.gmra.mxu1 %vm725_vm2, %v2613_v27  ;;  %vm2484_vm13 = vmor %vm2482_vm12, %vm2483_vm11  ;;  %vm2502_vm6 = vweird.f32 %v6522_v49 }
 0x612   : > { %v2465_v11 = vsel %vm2464_vm8, %v4626_v23, %v2461_v36  ;;  %v2478_v55 = vmul.f32 %v4630_v17, %v2477_v7  ;;  %4633 = vpow2.f32 %v3247_v56  ;;  %v2475_v23 = vsel %vm2474_vm10, %v6480_v1, %v2471_v18 }
 0x613   : > { %v2542_v29 = vmul.f32 %v2465_v11, %v6350_v16  ;;  %3147 = vmax.xlane.f32.xlu1 %v3146_v5  ;;  %v2543_v57 = vmul.f32 %v2475_v23, %v6294_v8  ;;  %4635 = vrsqrt.f32 %v6536_v19  ;;  %v2490_v36 = vsub.f32 1.5, %v2489_v30 }
 0x614   : > { %v2479_v22 = vmul.f32 0.5, %v2478_v55  ;;  %v3115_v35 = vpop.xlane.xlu1 %3114  ;;  %vm2512_vm8 = vweird.f32 %v6536_v19 }
 0x615   : > { %v3209_v48 = vsub.f32 %v6376_v32, %v3115_v35  ;;  %v2578_v28 = vmul.f32 %v6429_v12, %v2542_v29  ;;  %v2579_v8 = vmul.f32 %v6429_v12, %v2543_v57 }
 0x616   : > { %v2480_v2 = vsub.f32 1.5, %v2479_v22  ;;  %v2491_v22 = vmul.f32 %v6512_v46, %v2490_v36 }
 0x617   : > { %v4632_v16 = vpop.eup %4631  ;;  %v3241_v21 = vmul.f32 1.442695, %v3209_v48  ;;  %v2614_v43 = vadd.f32 %v6435_v42, %v2578_v28  ;;  %v2615_v62 = vadd.f32 %v6435_v42, %v2579_v8 }
 0x618   : > { %v6546_v56 = vpop.eup %4633  ;;  %v2481_v27 = vmul.f32 %v4630_v17, %v2480_v2  ;;  %v2497_v1 = vmul.f32 %v4632_v16, %v6522_v49  ;;  %v2495_v48 = vsel %vm2494_vm15, %v6512_v46, %v2491_v22  ;;  %vm2503_vm5 = vweird.f32 %v4632_v16 }
 0x619   : > { %4637 = vpow2.f32 %v3241_v21  ;;  %4244 = vmatmul.msk.f32.gmra.mxu1 %vm725_vm2, %v2614_v43  ;;  %v3314_v32 = vsel %vm696_vm1, %v6546_v56, 0.0  ;;  %v4636_v11 = vpop.eup %4635  ;;  %v2545_v30 = vmul.f32 %v2495_v48, %v6317_v6  ;;  %vm2504_vm7 = vmor %vm2502_vm6, %vm2503_vm5 }
 0x61a   : > { %v2485_v7 = vsel %vm2484_vm13, %v4630_v17, %v2481_v27  ;;  %v2498_v18 = vmul.f32 %v4632_v16, %v2497_v1  ;;  %v2507_v5 = vmul.f32 %v4636_v11, %v6536_v19  ;;  %v3130_v17 = vpop.xlane.xlu0 %3129  ;;  %vm2513_vm4 = vweird.f32 %v4636_v11 }
 0x61b   : > { %3315 = vadd.xlane.f32.xlu1 %v3314_v32  ;;  %v2544_v29 = vmul.f32 %v2485_v7, %v6359_v13  ;;  %v3214_v43 = vsub.f32 %v6378_v52, %v3130_v17  ;;  %vm2514_vm9 = vmor %vm2512_vm8, %vm2513_vm4 }
 0x61c   : > { %v6553_v3 = vpop.xlane.xlu1 %3120  ;;  %v2499_v35 = vmul.f32 0.5, %v2498_v18  ;;  %v2508_v28 = vmul.f32 %v4636_v11, %v2507_v5 }
 0x61d   : > { %v2580_v23 = vmul.f32 %v6429_v12, %v2544_v29  ;;  %v3251_v46 = vmul.f32 1.442695, %v3214_v43 }
 0x61e   : > { %v2500_v2 = vsub.f32 1.5, %v2499_v35  ;;  %v2509_v1 = vmul.f32 0.5, %v2508_v28 }
 0x61f   : > { %v6556_v55 = vpop.eup %4637  ;;  %v2616_v27 = vadd.f32 %v6435_v42, %v2580_v23 }
 0x620   : > { %v3305_v0 = vsel %vm696_vm1, %v6556_v55, 0.0  ;;  %v2501_v63 = vmul.f32 %v4632_v16, %v2500_v2  ;;  %v2510_v8 = vsub.f32 1.5, %v2509_v1  ;;  %v3211_v2 = vsub.f32 %v6385_v9, %v6553_v3 }
 0x621   : > { %3306 = vadd.xlane.f32.xlu0 %v3305_v0  ;;  %4245 = vmatmul.msk.f32.gmra.mxu1 %vm725_vm2, %v2615_v62 }
 0x622   : > { %v2505_v52 = vsel %vm2504_vm7, %v4632_v16, %v2501_v63  ;;  %v2511_v49 = vmul.f32 %v4636_v11, %v2510_v8 }
 0x623   : > { %v2546_v7 = vmul.f32 %v2505_v52, %v6370_v37 }
 0x624   : > { %v3127_v13 = vpop.xlane.xlu1 %3126 }
 0x625   : > { %v3213_v21 = vsub.f32 %v6391_v59, %v3127_v13  ;;  %v2581_v59 = vmul.f32 %v6429_v12, %v2545_v30  ;;  %v2582_v62 = vmul.f32 %v6429_v12, %v2546_v7 }
 0x627   : > { %v3249_v57 = vmul.f32 1.442695, %v3213_v21  ;;  %v2617_v18 = vadd.f32 %v6435_v42, %v2581_v59  ;;  %v2618_v19 = vadd.f32 %v6435_v42, %v2582_v62 }
 0x629   : > { %4639 = vpow2.f32 %v3249_v57  ;;  %4246 = vmatmul.msk.f32.gmra.mxu1 %vm725_vm2, %v2616_v27  ;;  %v3021_v27 = vpop.f32.mrf.mxu2 }
 0x62a   : > { %4641 = vpow2.f32 %v3251_v46  ;;  %v6619_v63 = vmul.f32 0.17677669, %v3021_v27 }
 0x62c   : > { %v3133_v32 = vpop.xlane.xlu1 %3132  ;;  %v3149_v46 = vsel %vm696_vm1, %v6619_v63, -inf }
 0x62d   : > { %v3215_v6 = vsub.f32 %v6397_v15, %v3133_v32  ;;  %v2515_v15 = vsel %vm2514_vm9, %v4636_v11, %v2511_v49 }
 0x62e   : > { %v2547_v35 = vmul.f32 %v2515_v15, %v6338_v4 }
 0x62f   : > { %v6576_v36 = vpop.eup %4639  ;;  %v3253_v16 = vmul.f32 1.442695, %v3215_v6 }
 0x630   : > { %v3317_v29 = vsel %vm696_vm1, %v6576_v36, 0.0  ;;  %v6586_v0 = vpop.eup %4641  ;;  %v2583_v13 = vmul.f32 %v6429_v12, %v2547_v35 }
 0x631   : > { %3318 = vadd.xlane.f32.xlu1 %v3317_v29  ;;  %4247 = vmatmul.msk.f32.gmra.mxu1 %vm725_vm2, %v2617_v18  ;;  %4643 = vpow2.f32 %v3253_v16  ;;  %v3320_v17 = vsel %vm696_vm1, %v6586_v0, 0.0 }
 0x634   : > { %v3136_v37 = vpop.xlane.xlu1 %3135 }
 0x635   : > { %3467 = vrot.lane.b32.xlu0 %v6179_v51, %s7095_s25  ;;  %v3216_v5 = vsub.f32 %v6409_v44, %v3136_v37  ;;  %v2619_v44 = vadd.f32 %v6435_v42, %v2583_v13  ;;  %v3245_v42 = vmul.f32 1.442695, %v3211_v2  ;;  %s690_s25 = scalar_lea.vmem %s7059_s21, %s4960_s4 }
 0x636   : > { %v2779_v22 = vpop.f32.mrf.mxu1 }
 0x637   : > { %4268 = vmatmul.msk.f32.gmra.mxu2 %vm725_vm2, %v2779_v22  ;;  %v3255_v11 = vmul.f32 1.442695, %v3216_v5  ;;  %v6598_v51 = vpop.eup %4643 }
 0x638   : > { %v3323_v4 = vsel %vm696_vm1, %v6598_v51, 0.0  ;;  %v3024_v32 = vpop.f32.mrf.mxu2 }
 0x639   : > { %3321 = vadd.xlane.f32.xlu1 %v3320_v17  ;;  %4248 = vmatmul.msk.f32.gmra.mxu1 %vm725_vm2, %v2618_v19  ;;  %4645 = vpow2.f32 %v3255_v11  ;;  %v6625_v52 = vmul.f32 0.17677669, %v3024_v32  ;;  %v3466_v11 = vpop.permute.xlu2 %3465 }
 0x63a   : > { %4647 = vpow2.f32 %v3245_v42 }
 0x63b   : > { %v3152_v6 = vsel %vm696_vm1, %v6625_v52, -inf }
 0x63e   : > { %v2782_v23 = vpop.f32.mrf.mxu1 }
 0x63f   : > { %4269 = vmatmul.msk.f32.gmra.mxu2 %vm725_vm2, %v2782_v23  ;;  %v6605_v48 = vpop.eup %4645  ;;  %v3139_v9 = vpop.xlane.xlu1 %3138 }
 0x640   : > { %v3326_v12 = vsel %vm696_vm1, %v6605_v48, 0.0  ;;  %v6614_v57 = vpop.eup %4647  ;;  %v3217_v3 = vsub.f32 %v6420_v38, %v3139_v9 }
 0x641   : > { %3324 = vadd.xlane.f32.xlu1 %v3323_v4  ;;  %4249 = vmatmul.msk.f32.gmra.mxu1 %vm725_vm2, %v2619_v44  ;;  %v3311_v30 = vsel %vm696_vm1, %v6614_v57, 0.0 }
 0x642   : > { %v3257_v8 = vmul.f32 1.442695, %v3217_v3 }
 0x644   : > { %4649 = vpow2.f32 %v3257_v8 }
 0x646   : > { %v2785_v28 = vpop.f32.mrf.mxu1 }
 0x647   : > { %4270 = vmatmul.msk.f32.gmra.mxu2 %vm725_vm2, %v2785_v28 }
 0x649   : > { %3327 = vadd.xlane.f32.xlu1 %v3326_v12 }
 0x64a   : > { %v6630_v38 = vpop.eup %4649 }
 0x64b   : > { %v3329_v18 = vsel %vm696_vm1, %v6630_v38, 0.0 }
 0x64e   : > { %v2788_v21 = vpop.f32.mrf.mxu1 }
 0x64f   : > { %4271 = vmatmul.msk.f32.gmra.mxu2 %vm725_vm2, %v2788_v21  ;;  %v3145_v42 = vpop.xlane.xlu2 %3144 }
 0x656   : > { %v2791_v43 = vpop.f32.mrf.mxu1 }
 0x657   : > { %4272 = vmatmul.msk.f32.gmra.mxu2 %vm725_vm2, %v2791_v43 }
 0x65e   : > { %v2794_v1 = vpop.f32.mrf.mxu1 }
 0x65f   : > { %3312 = vadd.xlane.f32.xlu0 %v3311_v30  ;;  %4273 = vmatmul.msk.f32.gmra.mxu2 %vm725_vm2, %v2794_v1  ;;  %v3219_v30 = vsub.f32 %v6447_v25, %v3145_v42 }
 0x661   : > { %v3261_v1 = vmul.f32 1.442695, %v3219_v30 }
 0x666   : > { %v2797_v59 = vpop.f32.mrf.mxu1 }
 0x667   : > { %3150 = vmax.xlane.f32.xlu0 %v3149_v46  ;;  %4274 = vmatmul.msk.f32.gmra.mxu2 %vm725_vm2, %v2797_v59 }
 0x66e   : > { %v2800_v7 = vpop.f32.mrf.mxu1 }
 0x66f   : > { %3153 = vmax.xlane.f32.xlu0 %v3152_v6  ;;  %4275 = vmatmul.msk.f32.gmra.mxu2 %vm725_vm2, %v2800_v7 }
 0x676   : > { %v2803_v29 = vpop.f32.mrf.mxu1  ;;  %v3310_v5 = vpop.xlane.xlu1 %3309 }
 0x677   : > { %3330 = vadd.xlane.f32.xlu0 %v3329_v18  ;;  %4276 = vmatmul.msk.f32.gmra.mxu2 %vm725_vm2, %v2803_v29 }
 0x67e   : > { %v2806_v49 = vpop.f32.mrf.mxu1  ;;  %v3142_v4 = vpop.xlane.xlu1 %3141 }
 0x67f   : > { %4277 = vmatmul.msk.f32.gmra.mxu2 %vm725_vm2, %v2806_v49  ;;  %v3218_v12 = vsub.f32 %v6505_v10, %v3142_v4 }
 0x681   : > { %v3259_v21 = vmul.f32 1.442695, %v3218_v12 }
 0x686   : > { %v2809_v16 = vpop.f32.mrf.mxu1  ;;  %v3148_v10 = vpop.xlane.xlu1 %3147 }
 0x687   : > { %4278 = vmatmul.msk.f32.gmra.mxu2 %vm725_vm2, %v2809_v16  ;;  %v3220_v32 = vsub.f32 %v6518_v40, %v3148_v10 }
 0x689   : > { %v3263_v8 = vmul.f32 1.442695, %v3220_v32 }
 0x68e   : > { %v2812_v62 = vpop.f32.mrf.mxu1  ;;  %v3316_v49 = vpop.xlane.xlu1 %3315 }
 0x68f   : > { %4279 = vmatmul.msk.f32.gmra.mxu2 %vm725_vm2, %v2812_v62 }
 0x694   : > { %v3307_v37 = vpop.xlane.xlu0 %3306 }
 0x695   : > { %4651 = vrcp.f32 %v3307_v37 }
 0x696   : > { %v2815_v15 = vpop.f32.mrf.mxu1  ;;  %4653 = vrcp.f32 %v3310_v5 }
 0x697   : > { %4280 = vmatmul.msk.f32.gmra.mxu2 %vm725_vm2, %v2815_v15  ;;  %4655 = vpow2.f32 %v3259_v21 }
 0x698   : > { %4657 = vpow2.f32 %v3261_v1 }
 0x699   : > { %4659 = vpow2.f32 %v3263_v8 }
 0x69b   : > { %v4652_v35 = vpop.eup %4651 }
 0x69c   : > { %v3433_v13 = vmul.f32 %v4652_v35, %v6556_v55  ;;  %v4654_v23 = vpop.eup %4653 }
 0x69d   : > { %v3434_v28 = vmul.f32 %v4654_v23, %v6492_v54  ;;  %v6655_v9 = vpop.eup %4655 }
 0x69e   : > { %v2818_v22 = vpop.f32.mrf.mxu1  ;;  %v3332_v59 = vsel %vm696_vm1, %v6655_v9, 0.0  ;;  %v6664_v6 = vpop.eup %4657 }
 0x69f   : > { %4281 = vmatmul.msk.f32.gmra.mxu2 %vm725_vm2, %v2818_v22  ;;  %v3335_v40 = vsel %vm696_vm1, %v6664_v6, 0.0  ;;  %v6672_v16 = vpop.eup %4659 }
 0x6a0   : > { %v3338_v5 = vsel %vm696_vm1, %v6672_v16, 0.0 }
 0x6a4   : > { %v3319_v35 = vpop.xlane.xlu1 %3318 }
 0x6a6   : > { %v2821_v19 = vpop.f32.mrf.mxu1 }
 0x6a7   : > { %v3468_v17 = vpop.permute.xlu0 %3467  ;;  %4282 = vmatmul.msk.f32.gmra.mxu2 %vm725_vm2, %v2821_v19 }
 0x6a8   : > { %4286 = vmatpush.msk.msrb.mxu3 %vm700_vm0, %v3468_v17 }
 0x6aa   : > { %3583 = vmatpush.msrb.mxu3 %v3466_v11 }
 0x6ab   : > { %4287 = vmatmul.msk.f32.vlgmr.msrb.gmra.mxu3 %vm696_vm1, %v3433_v13 }
 0x6ae   : > { %v2824_v44 = vpop.f32.mrf.mxu1 }
 0x6af   : > { %4283 = vmatmul.msk.f32.gmra.mxu2 %vm725_vm2, %v2824_v44 }
 0x6b3   : > { %4288 = vmatmul.msk.f32.gmra.mxu3 %vm696_vm1, %v3434_v28 }
 0x6b6   : > { %v2827_v2 = vpop.f32.mrf.mxu1 }
 0x6b7   : > { %4284 = vmatmul.msk.f32.gmra.mxu2 %vm725_vm2, %v2827_v2  ;;  %v3322_v2 = vpop.xlane.xlu1 %3321 }
 0x6ba   : > { %v3027_v55 = vpop.f32.mrf.mxu2 }
 0x6bb   : > { %v6649_v43 = vmul.f32 0.17677669, %v3027_v55 }
 0x6bd   : > { %v3155_v27 = vsel %vm696_vm1, %v6649_v43, -inf }
 0x6be   : > { %3156 = vmax.xlane.f32.xlu2 %v3155_v27  ;;  %v2830_v54 = vpop.f32.mrf.mxu1 }
 0x6bf   : > { %4285 = vmatmul.msk.f32.gmra.mxu2 %vm725_vm2, %v2830_v54 }
 0x6c2   : > { %v3030_v3 = vpop.f32.mrf.mxu2 }
 0x6c3   : > { %v6657_v46 = vmul.f32 0.17677669, %v3030_v3  ;;  %v3325_v3 = vpop.xlane.xlu1 %3324 }
 0x6c5   : > { %v3158_v25 = vsel %vm696_vm1, %v6657_v46, -inf }
 0x6c6   : > { %3159 = vmax.xlane.f32.xlu1 %v3158_v25  ;;  %3333 = vadd.xlane.f32.xlu2 %v3332_v59 }
 0x6ca   : > { %v3033_v7 = vpop.f32.mrf.mxu2 }
 0x6cb   : > { %v6666_v18 = vmul.f32 0.17677669, %v3033_v7 }
 0x6cd   : > { %v3161_v29 = vsel %vm696_vm1, %v6666_v18, -inf }
 0x6ce   : > { %3162 = vmax.xlane.f32.xlu0 %v3161_v29  ;;  %3336 = vadd.xlane.f32.xlu1 %v3335_v40 }
 0x6d2   : > { %v3036_v62 = vpop.f32.mrf.mxu2  ;;  %v3313_v15 = vpop.xlane.xlu0 %3312 }
 0x6d3   : > { %v6674_v37 = vmul.f32 0.17677669, %v3036_v62  ;;  %4661 = vrcp.f32 %v3313_v15 }
 0x6d4   : > { %4663 = vrcp.f32 %v3316_v49  ;;  %v3328_v49 = vpop.xlane.xlu1 %3327 }
 0x6d5   : > { %v3164_v22 = vsel %vm696_vm1, %v6674_v37, -inf }
 0x6d6   : > { %3165 = vmax.xlane.f32.xlu2 %v3164_v22  ;;  %3339 = vadd.xlane.f32.xlu0 %v3338_v5 }
 0x6d9   : > { %v4662_v19 = vpop.eup %4661 }
 0x6da   : > { %v3151_v17 = vpop.xlane.xlu0 %3150  ;;  %v3435_v11 = vmul.f32 %v4662_v19, %v6614_v57  ;;  %v3039_v13 = vpop.f32.mrf.mxu2  ;;  %v3684_v19 = vld [vmem:[%s7054_s16 + $0x18] sm:$0xff] }
 0x6db   : > { %v3221_v23 = vsub.f32 %v6619_v63, %v3151_v17  ;;  %v6682_v44 = vmul.f32 0.17677669, %v3039_v13  ;;  %v4664_v12 = vpop.eup %4663  ;;  %3793 = vmatpush.msrb.mxu0 %v3684_v19  ;;  %v3681_v13 = vld [vmem:[%s7054_s16] sm:$0xff] }
 0x6dc   : > { %4289 = vmatmul.msk.f32.gmra.mxu3 %vm696_vm1, %v3435_v11  ;;  %v3436_v42 = vmul.f32 %v4664_v12, %v6546_v56 }
 0x6dd   : > { %v3265_v4 = vmul.f32 1.442695, %v3221_v23  ;;  %v3167_v28 = vsel %vm696_vm1, %v6682_v44, -inf }
 0x6de   : > { %3168 = vmax.xlane.f32.xlu1 %v3167_v28 }
 0x6df   : > { %4665 = vpow2.f32 %v3265_v4 }
 0x6e0   : > { %4667 = vrcp.f32 %v3319_v35 }
 0x6e2   : > { %v3154_v21 = vpop.xlane.xlu0 %3153  ;;  %v3042_v57 = vpop.f32.mrf.mxu2 }
 0x6e3   : > { %v3222_v55 = vsub.f32 %v6625_v52, %v3154_v21  ;;  %v6689_v63 = vmul.f32 0.17677669, %v3042_v57 }
 0x6e4   : > { %4290 = vmatmul.msk.f32.gmra.mxu3 %vm696_vm1, %v3436_v42 }
 0x6e5   : > { %v6692_v30 = vpop.eup %4665  ;;  %v3267_v27 = vmul.f32 1.442695, %v3222_v55  ;;  %v3170_v54 = vsel %vm696_vm1, %v6689_v63, -inf }
 0x6e6   : > { %v3341_v1 = vsel %vm696_vm1, %v6692_v30, 0.0  ;;  %v4668_v10 = vpop.eup %4667  ;;  %3171 = vmax.xlane.f32.xlu0 %v3170_v54 }
 0x6e7   : > { %4669 = vpow2.f32 %v3267_v27  ;;  %3342 = vadd.xlane.f32.xlu2 %v3341_v1  ;;  %v3437_v56 = vmul.f32 %v4668_v10, %v6576_v36 }
 0x6e8   : > { %4671 = vrcp.f32 %v3322_v2 }
 0x6e9   : > { %4673 = vrcp.f32 %v3325_v3 }
 0x6ea   : > { %v3045_v52 = vpop.f32.mrf.mxu2  ;;  %4675 = vrcp.f32 %v3328_v49  ;;  %v3331_v5 = vpop.xlane.xlu0 %3330 }
 0x6eb   : > { %v6699_v32 = vmul.f32 0.17677669, %v3045_v52  ;;  %4677 = vrcp.f32 %v3331_v5 }
 0x6ec   : > { %4291 = vmatmul.msk.f32.gmra.mxu3 %vm696_vm1, %v3437_v56 }
 0x6ed   : > { %v6702_v25 = vpop.eup %4669  ;;  %v3173_v59 = vsel %vm696_vm1, %v6699_v32, -inf }
 0x6ee   : > { %v3344_v8 = vsel %vm696_vm1, %v6702_v25, 0.0  ;;  %v4672_v7 = vpop.eup %4671 }
 0x6ef   : > { %3174 = vmax.xlane.f32.xlu2 %v3173_v59  ;;  %3345 = vadd.xlane.f32.xlu1 %v3344_v8  ;;  %v3438_v36 = vmul.f32 %v4672_v7, %v6586_v0  ;;  %v4674_v15 = vpop.eup %4673 }
 0x6f0   : > { %v3439_v22 = vmul.f32 %v4674_v15, %v6598_v51  ;;  %v4676_v35 = vpop.eup %4675  ;;  %v3683_v51 = vld [vmem:[%s7054_s16 + $0x10] sm:$0xff] }
 0x6f1   : > { %v3440_v0 = vmul.f32 %v4676_v35, %v6605_v48  ;;  %v4678_v17 = vpop.eup %4677  ;;  %v3682_v48 = vld [vmem:[%s7054_s16 + $0x8] sm:$0xff]  ;;  %3794 = vmatpush.msrb.mxu0 %v3683_v51 }
 0x6f2   : > { %v3048_v29 = vpop.f32.mrf.mxu2  ;;  %v3441_v11 = vmul.f32 %v4678_v17, %v6630_v38 }
 0x6f3   : > { %v6709_v40 = vmul.f32 0.17677669, %v3048_v29  ;;  %3795 = vmatpush.msrb.mxu0 %v3682_v48 }
 0x6f4   : > { %4292 = vmatmul.msk.f32.gmra.mxu3 %vm696_vm1, %v3438_v36 }
 0x6f5   : > { %v3176_v62 = vsel %vm696_vm1, %v6709_v40, -inf  ;;  %3796 = vmatpush.msrb.mxu0 %v3681_v13 }
 0x6f7   : > { %3177 = vmax.xlane.f32.xlu1 %v3176_v62 }
 0x6fa   : > { %v3051_v38 = vpop.f32.mrf.mxu2 }
 0x6fb   : > { %v6740_v10 = vmul.f32 0.17677669, %v3051_v38 }
 0x6fc   : > { %4293 = vmatmul.msk.f32.gmra.mxu3 %vm696_vm1, %v3439_v22 }
 0x6fd   : > { %v3179_v29 = vsel %vm696_vm1, %v6740_v10, -inf }
 0x702   : > { %v3054_v55 = vpop.f32.mrf.mxu2 }
 0x704   : > { %4294 = vmatmul.msk.f32.gmra.mxu3 %vm696_vm1, %v3440_v0 }
 0x70a   : > { %v3057_v7 = vpop.f32.mrf.mxu2 }
 0x70c   : > { %4295 = vmatmul.msk.f32.gmra.mxu3 %vm696_vm1, %v3441_v11 }
 0x712   : > { %v3060_v17 = vpop.f32.mrf.mxu2 }
 0x72e   : > { %v3585_v23 = vpop.f32.mrf.mxu3 }
 0x72f   : > { %4319 = vmatmul.msk.f32.vlgmr.msrb.gmra.mxu0 %vm725_vm2, %v3585_v23 }
 0x731   : > { %v3157_v4 = vpop.xlane.xlu2 %3156 }
 0x732   : > { %v3223_v28 = vsub.f32 %v6649_v43, %v3157_v4 }
 0x734   : > { %v3269_v12 = vmul.f32 1.442695, %v3223_v28  ;;  %v6773_v28 = vmul.f32 0.17677669, %v3060_v17 }
 0x736   : > { %4679 = vpow2.f32 %v3269_v12  ;;  %v3588_v2 = vpop.f32.mrf.mxu3 }
 0x737   : > { %4320 = vmatmul.msk.f32.gmra.mxu0 %vm725_vm2, %v3588_v2 }
 0x739   : > { %v3160_v21 = vpop.xlane.xlu1 %3159  ;;  %v3334_v42 = vpop.xlane.xlu2 %3333 }
 0x73a   : > { %v3224_v57 = vsub.f32 %v6657_v46, %v3160_v21  ;;  %4681 = vrcp.f32 %v3334_v42 }
 0x73c   : > { %v6736_v27 = vpop.eup %4679  ;;  %v3271_v54 = vmul.f32 1.442695, %v3224_v57  ;;  %v3188_v57 = vsel %vm696_vm1, %v6773_v28, -inf }
 0x73d   : > { %v3347_v1 = vsel %vm696_vm1, %v6736_v27, 0.0 }
 0x73e   : > { %4683 = vpow2.f32 %v3271_v54  ;;  %3348 = vadd.xlane.f32.xlu0 %v3347_v1 }
 0x740   : > { %v4682_v43 = vpop.eup %4681 }
 0x741   : > { %v3163_v56 = vpop.xlane.xlu0 %3162  ;;  %v3337_v52 = vpop.xlane.xlu1 %3336  ;;  %v3442_v3 = vmul.f32 %v4682_v43, %v6655_v9  ;;  %v6751_v9 = vmul.f32 0.17677669, %v3054_v55 }
 0x742   : > { %v3225_v59 = vsub.f32 %v6666_v18, %v3163_v56  ;;  %4685 = vrcp.f32 %v3337_v52 }
 0x743   : > { %4296 = vmatmul.msk.f32.gmra.mxu3 %vm696_vm1, %v3442_v3  ;;  %v3182_v0 = vsel %vm696_vm1, %v6751_v9, -inf }
 0x744   : > { %v6745_v46 = vpop.eup %4683  ;;  %v3273_v8 = vmul.f32 1.442695, %v3225_v59 }
 0x745   : > { %v3350_v36 = vsel %vm696_vm1, %v6745_v46, 0.0 }
 0x746   : > { %4687 = vpow2.f32 %v3273_v8  ;;  %3351 = vadd.xlane.f32.xlu2 %v3350_v36  ;;  %3180 = vmax.xlane.f32.xlu0 %v3179_v29 }
 0x748   : > { %v4686_v49 = vpop.eup %4685 }
 0x749   : > { %v3340_v18 = vpop.xlane.xlu0 %3339  ;;  %v3166_v62 = vpop.xlane.xlu2 %3165  ;;  %v3443_v15 = vmul.f32 %v4686_v49, %v6664_v6  ;;  %v6762_v6 = vmul.f32 0.17677669, %v3057_v7 }
 0x74a   : > { %4689 = vrcp.f32 %v3340_v18  ;;  %v3226_v22 = vsub.f32 %v6674_v37, %v3166_v62 }
 0x74b   : > { %4297 = vmatmul.msk.f32.gmra.mxu3 %vm696_vm1, %v3443_v15  ;;  %v3185_v38 = vsel %vm696_vm1, %v6762_v6, -inf }
 0x74c   : > { %v6756_v5 = vpop.eup %4687  ;;  %v3275_v35 = vmul.f32 1.442695, %v3226_v22 }
 0x74d   : > { %v3353_v19 = vsel %vm696_vm1, %v6756_v5, 0.0 }
 0x74e   : > { %4691 = vpow2.f32 %v3275_v35  ;;  %3183 = vmax.xlane.f32.xlu2 %v3182_v0  ;;  %3354 = vadd.xlane.f32.xlu1 %v3353_v19 }
 0x750   : > { %v4690_v11 = vpop.eup %4689 }
 0x751   : > { %v3444_v37 = vmul.f32 %v4690_v11, %v6672_v16  ;;  %v3169_v51 = vpop.xlane.xlu1 %3168  ;;  %v3063_v16 = vpop.f32.mrf.mxu2 }
 0x752   : > { %v3227_v48 = vsub.f32 %v6682_v44, %v3169_v51  ;;  %v6783_v43 = vmul.f32 0.17677669, %v3063_v16 }
 0x753   : > { %4298 = vmatmul.msk.f32.gmra.mxu3 %vm696_vm1, %v3444_v37 }
 0x754   : > { %v6767_v13 = vpop.eup %4691  ;;  %v3277_v23 = vmul.f32 1.442695, %v3227_v48  ;;  %v3191_v29 = vsel %vm696_vm1, %v6783_v43, -inf }
 0x755   : > { %v3356_v4 = vsel %vm696_vm1, %v6767_v13, 0.0 }
 0x756   : > { %3186 = vmax.xlane.f32.xlu1 %v3185_v38  ;;  %3357 = vadd.xlane.f32.xlu0 %v3356_v4  ;;  %4693 = vpow2.f32 %v3277_v23 }
 0x759   : > { %v3172_v12 = vpop.xlane.xlu0 %3171  ;;  %v3066_v3 = vpop.f32.mrf.mxu2 }
 0x75a   : > { %v3343_v2 = vpop.xlane.xlu2 %3342  ;;  %v3228_v44 = vsub.f32 %v6689_v63, %v3172_v12  ;;  %v6795_v18 = vmul.f32 0.17677669, %v3066_v3 }
 0x75b   : > { %4695 = vrcp.f32 %v3343_v2 }
 0x75c   : > { %v6776_v21 = vpop.eup %4693  ;;  %v3279_v42 = vmul.f32 1.442695, %v3228_v44  ;;  %v3194_v19 = vsel %vm696_vm1, %v6795_v18, -inf }
 0x75d   : > { %v3359_v55 = vsel %vm696_vm1, %v6776_v21, 0.0 }
 0x75e   : > { %3189 = vmax.xlane.f32.xlu0 %v3188_v57  ;;  %4697 = vpow2.f32 %v3279_v42  ;;  %3360 = vadd.xlane.f32.xlu2 %v3359_v55 }
 0x75f   : > { %v3591_v54 = vpop.f32.mrf.mxu3 }
 0x760   : > { %4321 = vmatmul.msk.f32.gmra.mxu0 %vm725_vm2, %v3591_v54 }
 0x761   : > { %v4696_v1 = vpop.eup %4695  ;;  %v3069_v35 = vpop.f32.mrf.mxu2 }
 0x762   : > { %v3346_v63 = vpop.xlane.xlu1 %3345  ;;  %v3175_v56 = vpop.xlane.xlu2 %3174  ;;  %v3445_v52 = vmul.f32 %v4696_v1, %v6692_v30 }
 0x763   : > { %4699 = vrcp.f32 %v3346_v63  ;;  %v3229_v59 = vsub.f32 %v6699_v32, %v3175_v56 }
 0x764   : > { %4299 = vmatmul.msk.f32.gmra.mxu3 %vm696_vm1, %v3445_v52  ;;  %v6788_v8 = vpop.eup %4697 }
 0x765   : > { %v3281_v7 = vmul.f32 1.442695, %v3229_v59  ;;  %v3362_v36 = vsel %vm696_vm1, %v6788_v8, 0.0 }
 0x766   : > { %3363 = vadd.xlane.f32.xlu1 %v3362_v36  ;;  %3192 = vmax.xlane.f32.xlu2 %v3191_v29 }
 0x767   : > { %4701 = vpow2.f32 %v3281_v7  ;;  %v3594_v49 = vpop.f32.mrf.mxu3 }
 0x768   : > { %4322 = vmatmul.msk.f32.gmra.mxu0 %vm725_vm2, %v3594_v49 }
 0x769   : > { %v4700_v30 = vpop.eup %4699  ;;  %v3072_v48 = vpop.f32.mrf.mxu2 }
 0x76a   : > { %v3178_v32 = vpop.xlane.xlu1 %3177  ;;  %v3446_v62 = vmul.f32 %v4700_v30, %v6702_v25  ;;  %v6807_v25 = vmul.f32 0.17677669, %v3069_v35  ;;  %v6816_v38 = vmul.f32 0.17677669, %v3072_v48 }
 0x76b   : > { %v3230_v15 = vsub.f32 %v6709_v40, %v3178_v32 }
 0x76c   : > { %4300 = vmatmul.msk.f32.gmra.mxu3 %vm696_vm1, %v3446_v62  ;;  %v3197_v51 = vsel %vm696_vm1, %v6807_v25, -inf  ;;  %v3200_v4 = vsel %vm696_vm1, %v6816_v38, -inf }
 0x76d   : > { %v6800_v22 = vpop.eup %4701  ;;  %v3283_v0 = vmul.f32 1.442695, %v3230_v15 }
 0x76e   : > { %v3365_v17 = vsel %vm696_vm1, %v6800_v22, 0.0  ;;  %3195 = vmax.xlane.f32.xlu1 %v3194_v19 }
 0x76f   : > { %4703 = vpow2.f32 %v3283_v0  ;;  %v3597_v11 = vpop.f32.mrf.mxu3  ;;  %3366 = vadd.xlane.f32.xlu0 %v3365_v17 }
 0x770   : > { %4323 = vmatmul.msk.f32.gmra.mxu0 %vm725_vm2, %v3597_v11 }
 0x775   : > { %v6809_v40 = vpop.eup %4703 }
 0x776   : > { %v3368_v37 = vsel %vm696_vm1, %v6809_v40, 0.0 }
 0x777   : > { %v3600_v23 = vpop.f32.mrf.mxu3  ;;  %3369 = vadd.xlane.f32.xlu2 %v3368_v37  ;;  %3198 = vmax.xlane.f32.xlu0 %v3197_v51 }
 0x778   : > { %4324 = vmatmul.msk.f32.gmra.mxu0 %vm725_vm2, %v3600_v23 }
 0x77f   : > { %v3603_v16 = vpop.f32.mrf.mxu3  ;;  %3201 = vmax.xlane.f32.xlu2 %v3200_v4 }
 0x780   : > { %4325 = vmatmul.msk.f32.gmra.mxu0 %vm725_vm2, %v3603_v16 }
 0x787   : > { %v3606_v12 = vpop.f32.mrf.mxu3 }
 0x788   : > { %4326 = vmatmul.msk.f32.gmra.mxu0 %vm725_vm2, %v3606_v12 }
 0x78f   : > { %v3609_v2 = vpop.f32.mrf.mxu3 }
 0x790   : > { %4327 = vmatmul.msk.f32.gmra.mxu0 %vm725_vm2, %v3609_v2 }
 0x7b1   : > { %v3349_v44 = vpop.xlane.xlu0 %3348 }
 0x7b2   : > { %4705 = vrcp.f32 %v3349_v44 }
 0x7b8   : > { %v4706_v42 = vpop.eup %4705 }
 0x7b9   : > { %v3181_v57 = vpop.xlane.xlu0 %3180  ;;  %v3352_v55 = vpop.xlane.xlu2 %3351  ;;  %v3447_v54 = vmul.f32 %v4706_v42, %v6736_v27 }
 0x7ba   : > { %v3231_v1 = vsub.f32 %v6740_v10, %v3181_v57  ;;  %4707 = vrcp.f32 %v3352_v55  ;;  %v3075_v27 = vpop.f32.mrf.mxu2 }
 0x7bb   : > { %4301 = vmatmul.msk.f32.gmra.mxu3 %vm696_vm1, %v3447_v54  ;;  %v6834_v32 = vmul.f32 0.17677669, %v3075_v27 }
 0x7bc   : > { %v3285_v63 = vmul.f32 1.442695, %v3231_v1 }
 0x7bd   : > { %v3203_v19 = vsel %vm696_vm1, %v6834_v32, -inf }
 0x7be   : > { %4709 = vpow2.f32 %v3285_v63 }
 0x7c0   : > { %v4708_v56 = vpop.eup %4707 }
 0x7c1   : > { %v3355_v52 = vpop.xlane.xlu1 %3354  ;;  %v3184_v3 = vpop.xlane.xlu2 %3183  ;;  %v3448_v59 = vmul.f32 %v4708_v56, %v6745_v46 }
 0x7c2   : > { %4711 = vrcp.f32 %v3355_v52  ;;  %v3232_v7 = vsub.f32 %v6751_v9, %v3184_v3  ;;  %v3078_v11 = vpop.f32.mrf.mxu2 }
 0x7c3   : > { %4302 = vmatmul.msk.f32.gmra.mxu3 %vm696_vm1, %v3448_v59 }
 0x7c4   : > { %v6829_v36 = vpop.eup %4709  ;;  %v3287_v29 = vmul.f32 1.442695, %v3232_v7 }
 0x7c5   : > { %v3371_v10 = vsel %vm696_vm1, %v6829_v36, 0.0 }
 0x7c6   : > { %4713 = vpow2.f32 %v3287_v29  ;;  %3372 = vadd.xlane.f32.xlu1 %v3371_v10  ;;  %v3612_v49 = vpop.f32.mrf.mxu3 }
 0x7c7   : > { %4328 = vmatmul.msk.f32.gmra.mxu0 %vm725_vm2, %v3612_v49 }
 0x7c8   : > { %v4712_v30 = vpop.eup %4711 }
 0x7c9   : > { %v3187_v46 = vpop.xlane.xlu1 %3186  ;;  %v3358_v62 = vpop.xlane.xlu0 %3357  ;;  %v3449_v9 = vmul.f32 %v4712_v30, %v6756_v5 }
 0x7ca   : > { %v3233_v15 = vsub.f32 %v6762_v6, %v3187_v46  ;;  %4715 = vrcp.f32 %v3358_v62  ;;  %v6846_v6 = vmul.f32 0.17677669, %v3078_v11 }
 0x7cb   : > { %4303 = vmatmul.msk.f32.gmra.mxu3 %vm696_vm1, %v3449_v9 }
 0x7cc   : > { %v6839_v35 = vpop.eup %4713  ;;  %v3289_v0 = vmul.f32 1.442695, %v3233_v15  ;;  %v3206_v44 = vsel %vm696_vm1, %v6846_v6, -inf }
 0x7cd   : > { %v3374_v17 = vsel %vm696_vm1, %v6839_v35, 0.0 }
 0x7ce   : > { %4717 = vpow2.f32 %v3289_v0  ;;  %3204 = vmax.xlane.f32.xlu1 %v3203_v19  ;;  %v3615_v37 = vpop.f32.mrf.mxu3  ;;  %3375 = vadd.xlane.f32.xlu0 %v3374_v17 }
 0x7cf   : > { %4329 = vmatmul.msk.f32.gmra.mxu0 %vm725_vm2, %v3615_v37 }
 0x7d0   : > { %v4716_v5 = vpop.eup %4715 }
 0x7d1   : > { %v3190_v51 = vpop.xlane.xlu0 %3189  ;;  %v3450_v48 = vmul.f32 %v4716_v5, %v6767_v13  ;;  %v3361_v4 = vpop.xlane.xlu2 %3360 }
 0x7d2   : > { %v3234_v23 = vsub.f32 %v6773_v28, %v3190_v51  ;;  %4719 = vrcp.f32 %v3361_v4 }
 0x7d3   : > { %4304 = vmatmul.msk.f32.gmra.mxu3 %vm696_vm1, %v3450_v48 }
 0x7d4   : > { %v6851_v16 = vpop.eup %4717  ;;  %v3291_v12 = vmul.f32 1.442695, %v3234_v23  ;;  %v6892_v23 = vpop.f32.mrf.mxu0 }
 0x7d5   : > { %v3377_v2 = vsel %vm696_vm1, %v6851_v16, 0.0 }
 0x7d6   : > { %4721 = vpow2.f32 %v3291_v12  ;;  %3378 = vadd.xlane.f32.xlu2 %v3377_v2  ;;  %v3618_v42 = vpop.f32.mrf.mxu3  ;;  %3207 = vmax.xlane.f32.xlu0 %v3206_v44 }
 0x7d7   : > { %4330 = vmatmul.msk.f32.gmra.mxu0 %vm725_vm2, %v3618_v42 }
 0x7d8   : > { %v4720_v13 = vpop.eup %4719 }
 0x7d9   : > { %v3364_v28 = vpop.xlane.xlu1 %3363  ;;  %v3193_v57 = vpop.xlane.xlu2 %3192  ;;  %v3451_v55 = vmul.f32 %v4720_v13, %v6776_v21 }
 0x7da   : > { %4723 = vrcp.f32 %v3364_v28  ;;  %v3235_v54 = vsub.f32 %v6783_v43, %v3193_v57 }
 0x7db   : > { %4305 = vmatmul.msk.f32.gmra.mxu3 %vm696_vm1, %v3451_v55 }
 0x7dc   : > { %v6860_v1 = vpop.eup %4721  ;;  %v3293_v63 = vmul.f32 1.442695, %v3235_v54  ;;  %v6896_v42 = vpop.f32.mrf.mxu0 }
 0x7dd   : > { %v3380_v56 = vsel %vm696_vm1, %v6860_v1, 0.0 }
 0x7de   : > { %3381 = vadd.xlane.f32.xlu1 %v3380_v56  ;;  %4725 = vpow2.f32 %v3293_v63 }
 0x7e0   : > { %v4724_v52 = vpop.eup %4723 }
 0x7e1   : > { %v3196_v3 = vpop.xlane.xlu1 %3195  ;;  %v3452_v7 = vmul.f32 %v4724_v52, %v6788_v8 }
 0x7e2   : > { %v3367_v59 = vpop.xlane.xlu0 %3366  ;;  %v3236_v21 = vsub.f32 %v6795_v18, %v3196_v3 }
 0x7e3   : > { %4727 = vrcp.f32 %v3367_v59  ;;  %4306 = vmatmul.msk.f32.gmra.mxu3 %vm696_vm1, %v3452_v7 }
 0x7e4   : > { %v6868_v43 = vpop.eup %4725  ;;  %v3295_v27 = vmul.f32 1.442695, %v3236_v21  ;;  %v6902_v52 = vpop.f32.mrf.mxu0 }
 0x7e5   : > { %v3383_v29 = vsel %vm696_vm1, %v6868_v43, 0.0 }
 0x7e6   : > { %4729 = vpow2.f32 %v3295_v27  ;;  %3384 = vadd.xlane.f32.xlu2 %v3383_v29 }
 0x7e7   : > { %v3621_v10 = vpop.f32.mrf.mxu3 }
 0x7e8   : > { %4331 = vmatmul.msk.f32.gmra.mxu0 %vm725_vm2, %v3621_v10 }
 0x7e9   : > { %v4728_v49 = vpop.eup %4727 }
 0x7ea   : > { %v3199_v30 = vpop.xlane.xlu0 %3198  ;;  %v3370_v46 = vpop.xlane.xlu2 %3369  ;;  %v3453_v8 = vmul.f32 %v4728_v49, %v6800_v22 }
 0x7eb   : > { %v3237_v18 = vsub.f32 %v6807_v25, %v3199_v30  ;;  %4731 = vrcp.f32 %v3370_v46 }
 0x7ec   : > { %4307 = vmatmul.msk.f32.gmra.mxu3 %vm696_vm1, %v3453_v8  ;;  %v6876_v62 = vpop.eup %4729  ;;  %v6915_v29 = vpop.f32.mrf.mxu0 }
 0x7ed   : > { %v3297_v9 = vmul.f32 1.442695, %v3237_v18  ;;  %v3386_v15 = vsel %vm696_vm1, %v6876_v62, 0.0 }
 0x7ee   : > { %3387 = vadd.xlane.f32.xlu0 %v3386_v15 }
 0x7ef   : > { %4733 = vpow2.f32 %v3297_v9  ;;  %v3624_v0 = vpop.f32.mrf.mxu3 }
 0x7f0   : > { %4332 = vmatmul.msk.f32.gmra.mxu0 %vm725_vm2, %v3624_v0 }
 0x7f1   : > { %v4732_v19 = vpop.eup %4731 }
 0x7f2   : > { %v3202_v17 = vpop.xlane.xlu2 %3201  ;;  %v3454_v22 = vmul.f32 %v4732_v19, %v6809_v40 }
 0x7f3   : > { %v3238_v25 = vsub.f32 %v6816_v38, %v3202_v17 }
 0x7f4   : > { %4308 = vmatmul.msk.f32.gmra.mxu3 %vm696_vm1, %v3454_v22 }
 0x7f5   : > { %v6884_v11 = vpop.eup %4733  ;;  %v3299_v37 = vmul.f32 1.442695, %v3238_v25 }
 0x7f6   : > { %v3389_v5 = vsel %vm696_vm1, %v6884_v11, 0.0 }
 0x7f7   : > { %4735 = vpow2.f32 %v3299_v37  ;;  %3390 = vadd.xlane.f32.xlu1 %v3389_v5 }
 0x7fd   : > { %v6888_v51 = vpop.eup %4735 }
 0x7fe   : > { %v3392_v48 = vsel %vm696_vm1, %v6888_v51, 0.0 }
 0x7ff   : > { %3393 = vadd.xlane.f32.xlu2 %v3392_v48 }
 0x839   : > { %v3373_v40 = vpop.xlane.xlu1 %3372 }
 0x83a   : > { %4737 = vrcp.f32 %v3373_v40 }
 0x83e   : > { %v3627_v38 = vpop.f32.mrf.mxu3 }
 0x83f   : > { %4333 = vmatmul.msk.f32.gmra.mxu0 %vm725_vm2, %v3627_v38 }
 0x840   : > { %v4738_v4 = vpop.eup %4737 }
 0x841   : > { %v3205_v12 = vpop.xlane.xlu1 %3204  ;;  %v3376_v2 = vpop.xlane.xlu0 %3375  ;;  %v3455_v44 = vmul.f32 %v4738_v4, %v6829_v36 }
 0x842   : > { %v3239_v13 = vsub.f32 %v6834_v32, %v3205_v12  ;;  %4739 = vrcp.f32 %v3376_v2 }
 0x843   : > { %4309 = vmatmul.msk.f32.gmra.mxu3 %vm696_vm1, %v3455_v44 }
 0x844   : > { %v3301_v28 = vmul.f32 1.442695, %v3239_v13 }
 0x846   : > { %4741 = vpow2.f32 %v3301_v28  ;;  %v3630_v57 = vpop.f32.mrf.mxu3 }
 0x847   : > { %4334 = vmatmul.msk.f32.gmra.mxu0 %vm725_vm2, %v3630_v57 }
 0x848   : > { %v4740_v55 = vpop.eup %4739 }
 0x849   : > { %v3208_v54 = vpop.xlane.xlu0 %3207  ;;  %v3379_v63 = vpop.xlane.xlu2 %3378  ;;  %v3456_v56 = vmul.f32 %v4740_v55, %v6839_v35 }
 0x84a   : > { %v3240_v36 = vsub.f32 %v6846_v6, %v3208_v54  ;;  %4743 = vrcp.f32 %v3379_v63 }
 0x84b   : > { %4310 = vmatmul.msk.f32.gmra.mxu3 %vm696_vm1, %v3456_v56 }
 0x84c   : > { %v6906_v32 = vpop.eup %4741  ;;  %v3303_v3 = vmul.f32 1.442695, %v3240_v36 }
 0x84d   : > { %v3395_v59 = vsel %vm696_vm1, %v6906_v32, 0.0 }
 0x84e   : > { %4745 = vpow2.f32 %v3303_v3  ;;  %v3633_v7 = vpop.f32.mrf.mxu3  ;;  %3396 = vadd.xlane.f32.xlu0 %v3395_v59 }
 0x84f   : > { %4335 = vmatmul.msk.f32.gmra.mxu0 %vm725_vm2, %v3633_v7 }
 0x850   : > { %v4744_v21 = vpop.eup %4743 }
 0x851   : > { %v3382_v35 = vpop.xlane.xlu1 %3381  ;;  %v3457_v27 = vmul.f32 %v4744_v21, %v6851_v16  ;;  %v6922_v16 = vpop.f32.mrf.mxu0 }
 0x852   : > { %4747 = vrcp.f32 %v3382_v35 }
 0x853   : > { %4311 = vmatmul.msk.f32.gmra.mxu3 %vm696_vm1, %v3457_v27 }
 0x854   : > { %v6913_v6 = vpop.eup %4745 }
 0x855   : > { %v3398_v10 = vsel %vm696_vm1, %v6913_v6, 0.0 }
 0x856   : > { %v3636_v49 = vpop.f32.mrf.mxu3  ;;  %3399 = vadd.xlane.f32.xlu1 %v3398_v10 }
 0x857   : > { %4336 = vmatmul.msk.f32.gmra.mxu0 %vm725_vm2, %v3636_v49 }
 0x858   : > { %v4748_v30 = vpop.eup %4747 }
 0x859   : > { %v3458_v46 = vmul.f32 %v4748_v30, %v6860_v1  ;;  %v3385_v8 = vpop.xlane.xlu2 %3384  ;;  %v6927_v17 = vpop.f32.mrf.mxu0 }
 0x85a   : > { %4749 = vrcp.f32 %v3385_v8 }
 0x85b   : > { %4312 = vmatmul.msk.f32.gmra.mxu3 %vm696_vm1, %v3458_v46 }
 0x85e   : > { %v3639_v18 = vpop.f32.mrf.mxu3 }
 0x85f   : > { %4337 = vmatmul.msk.f32.gmra.mxu0 %vm725_vm2, %v3639_v18 }
 0x860   : > { %v4750_v9 = vpop.eup %4749 }
 0x861   : > { %v3388_v15 = vpop.xlane.xlu0 %3387  ;;  %v3459_v0 = vmul.f32 %v4750_v9, %v6868_v43  ;;  %v3816_v43 = vpop.f32.mrf.mxu0 }
 0x862   : > { %4751 = vrcp.f32 %v3388_v15 }
 0x863   : > { %4313 = vmatmul.msk.f32.gmra.mxu3 %vm696_vm1, %v3459_v0 }
 0x866   : > { %v3642_v19 = vpop.f32.mrf.mxu3 }
 0x867   : > { %4338 = vmatmul.msk.f32.gmra.mxu0 %vm725_vm2, %v3642_v19 }
 0x868   : > { %v4752_v1 = vpop.eup %4751 }
 0x869   : > { %v3460_v25 = vmul.f32 %v4752_v1, %v6876_v62  ;;  %v3819_v12 = vpop.f32.mrf.mxu0 }
 0x86a   : > { %v3391_v22 = vpop.xlane.xlu1 %3390 }
 0x86b   : > { %4753 = vrcp.f32 %v3391_v22  ;;  %4314 = vmatmul.msk.f32.gmra.mxu3 %vm696_vm1, %v3460_v25 }
 0x86f   : > { %v3645_v37 = vpop.f32.mrf.mxu3 }
 0x870   : > { %4339 = vmatmul.msk.f32.gmra.mxu0 %vm725_vm2, %v3645_v37 }
 0x871   : > { %v4754_v5 = vpop.eup %4753  ;;  %v3822_v2 = vpop.f32.mrf.mxu0 }
 0x872   : > { %v3394_v48 = vpop.xlane.xlu2 %3393  ;;  %v3461_v40 = vmul.f32 %v4754_v5, %v6884_v11  ;;  %v7179_v5 = vld [vmem:[#allocation22_spill] sm:$0xff] }
 0x873   : > { %4755 = vrcp.f32 %v3394_v48  ;;  %v7180_v48 = vld [vmem:[#allocation21_spill] sm:$0xff] }
 0x874   : > { %4315 = vmatmul.msk.f32.gmra.mxu3 %vm696_vm1, %v3461_v40 }
 0x877   : > { %v3648_v38 = vpop.f32.mrf.mxu3 }
 0x878   : > { %4340 = vmatmul.msk.f32.gmra.mxu0 %vm725_vm2, %v3648_v38  ;;  %v7181_v38 = vld [vmem:[#allocation20_spill] sm:$0xff] }
 0x879   : > { %v4756_v4 = vpop.eup %4755  ;;  %v3825_v44 = vpop.f32.mrf.mxu0 }
 0x87a   : > { %v3462_v62 = vmul.f32 %v4756_v4, %v6888_v51  ;;  %v3903_v49 = vadd.f32 %v3825_v44, %v5408_v24  ;;  %v3899_v24 = vadd.f32 %v6927_v17, %v5375_v31  ;;  %v3896_v31 = vadd.f32 %v6902_v52, %v5251_v14 }
 0x87c   : > { %4316 = vmatmul.msk.f32.gmra.mxu3 %vm696_vm1, %v3462_v62  ;;  %v7182_v62 = vld [vmem:[#allocation19_spill] sm:$0xff] }
 0x881   : > { %v3828_v13 = vpop.f32.mrf.mxu0 }
 0x889   : > { %v3831_v28 = vpop.f32.mrf.mxu0 }
 0x891   : > { %v3834_v57 = vpop.f32.mrf.mxu0 }
 0x892   : > { %v3906_v27 = vadd.f32 %v3834_v57, %v5595_v45  ;;  %v7185_v57 = vld [vmem:[#allocation16_spill] sm:$0xff] }
 0x899   : > { %v3837_v55 = vpop.f32.mrf.mxu0 }
 0x89a   : > { %v3907_v21 = vadd.f32 %v3837_v55, %v5608_v20  ;;  %v3904_v20 = vadd.f32 %v3828_v13, %v5553_v33  ;;  %v3900_v33 = vadd.f32 %v3816_v43, %v5397_v34  ;;  %v3895_v34 = vadd.f32 %v6896_v42, %v5078_v58  ;;  %v7184_v13 = vld [vmem:[#allocation17_spill] sm:$0xff] }
 0x8bc   : > { %v3840_v54 = vpop.f32.mrf.mxu0 }
 0x8bd   : > { %v3908_v3 = vadd.f32 %v3840_v54, %v5865_v39  ;;  %v7186_v54 = vld [vmem:[#allocation15_spill] sm:$0xff] }
 0x8c1   : > { %v3397_v11 = vpop.xlane.xlu0 %3396 }
 0x8c2   : > { %4757 = vrcp.f32 %v3397_v11 }
 0x8c4   : > { %v3843_v63 = vpop.f32.mrf.mxu0 }
 0x8c5   : > { %v3909_v56 = vadd.f32 %v3843_v63, %v5415_v41  ;;  %v3926_v63 = vld [vmem:[%s7057_s19] sm:$0xf] }
 0x8c6   : > { %v3651_v36 = vpop.f32.mrf.mxu3 }
 0x8c7   : > { %4341 = vmatmul.msk.f32.gmra.mxu0 %vm725_vm2, %v3651_v36  ;;  %4351 = vmatpush.xpose.msk.msra.mxu1 %vm725_vm2, %v3909_v56  ;;  %v7187_v56 = vld [vmem:[#allocation14_spill] sm:$0xff] }
 0x8c8   : > { %v4758_v51 = vpop.eup %4757 }
 0x8c9   : > { %v3463_v59 = vmul.f32 %v4758_v51, %v6906_v32  ;;  %v3400_v7 = vpop.xlane.xlu1 %3399  ;;  %v3905_v32 = vadd.f32 %v3831_v28, %v5337_v60  ;;  %v3901_v60 = vadd.f32 %v3819_v12, %v5384_v26  ;;  %v3898_v26 = vadd.f32 %v6922_v16, %v5343_v53  ;;  %v3927_v51 = vld [vmem:[%s7058_s20] sm:$0xf] }
 0x8ca   : > { %4759 = vrcp.f32 %v3400_v7 }
 0x8cb   : > { %4317 = vmatmul.msk.f32.gmra.mxu3 %vm696_vm1, %v3463_v59  ;;  %4352 = vmatpush.xpose.msk.msra.mxu1 %vm725_vm2, %v3908_v3  ;;  %v4816_v3 = vmov 0   ;;  %v7188_v59 = vld [vmem:[#allocation13_spill] sm:$0xff] }
 0x8cc   : > { %v3846_v53 = vpop.f32.mrf.mxu0  ;;  %4416 = vset.pattern.permute.xlu2 %v4816_v3  ;;  %4417 = vset.pattern.permute.xlu0 %v4816_v3 }
 0x8cd   : > { %3930 = vperm.xlu2 %4416, %v3927_v51  }
 0x8ce   : > { %v3654_v35 = vpop.f32.mrf.mxu3 }
 0x8cf   : > { %4342 = vmatmul.msk.f32.gmra.mxu0 %vm725_vm2, %v3654_v35  ;;  %4353 = vmatpush.xpose.msk.msra.mxu1 %vm725_vm2, %v3907_v21  ;;  %v7189_v21 = vld [vmem:[#allocation12_spill] sm:$0xff] }
 0x8d0   : > { %v4760_v41 = vpop.eup %4759 }
 0x8d1   : > { %v3464_v39 = vmul.f32 %v4760_v41, %v6913_v6  ;;  %v3902_v6 = vadd.f32 %v3822_v2, %v5400_v47  ;;  %v3897_v47 = vadd.f32 %v6915_v29, %v5292_v61  ;;  %v3894_v61 = vadd.f32 %v6892_v23, %v5073_v50  ;;  %v7183_v2 = vld [vmem:[#allocation18_spill] sm:$0xff]  ;;  %v7190_v41 = vld [vmem:[#allocation11_spill] sm:$0xff] }
 0x8d3   : > { %4318 = vmatmul.msk.f32.gmra.mxu3 %vm696_vm1, %v3464_v39  ;;  %4354 = vmatpush.xpose.msk.msra.mxu1 %vm725_vm2, %v3906_v27  ;;  %v7191_v39 = vld [vmem:[#allocation10_spill] sm:$0xff] }
 0x8d4   : > { %v3849_v29 = vpop.f32.mrf.mxu0 }
 0x8d6   : > { %v3657_v10 = vpop.f32.mrf.mxu3 }
 0x8d7   : > { %4343 = vmatmul.msk.f32.gmra.mxu0 %vm725_vm2, %v3657_v10  ;;  %4355 = vmatpush.xpose.msk.msra.mxu1 %vm725_vm2, %v3905_v32  ;;  %v7192_v10 = vld [vmem:[#allocation9_spill] sm:$0xff] }
 0x8db   : > { %4356 = vmatpush.xpose.msk.msra.mxu1 %vm725_vm2, %v3904_v20 }
 0x8dc   : > { %v3852_v52 = vpop.f32.mrf.mxu0 }
 0x8dd   : > { %v3912_v20 = vadd.f32 %v3852_v52, %v7192_v10 }
 0x8de   : > { %v3660_v45 = vpop.f32.mrf.mxu3 }
 0x8df   : > { %4344 = vmatmul.msk.f32.gmra.mxu0 %vm725_vm2, %v3660_v45  ;;  %4357 = vmatpush.xpose.msk.msra.mxu1 %vm725_vm2, %v3903_v49  ;;  %v7193_v49 = vld [vmem:[#allocation8_spill] sm:$0xff] }
 0x8e0   : > { %v3911_v45 = vadd.f32 %v3849_v29, %v7193_v49 }
 0x8e3   : > { %4358 = vmatpush.xpose.msk.msra.mxu1 %vm725_vm2, %v3902_v6  ;;  %v7194_v6 = vld [vmem:[#allocation7_spill] sm:$0xff] }
 0x8e4   : > { %v3855_v58 = vpop.f32.mrf.mxu0 }
 0x8e5   : > { %v3913_v32 = vadd.f32 %v3855_v58, %v7191_v39 }
 0x8e6   : > { %v3663_v30 = vpop.f32.mrf.mxu3 }
 0x8e7   : > { %4359 = vmatpush.xpose.msk.msra.mxu1 %vm725_vm2, %v3901_v60  ;;  %4345 = vmatmul.msk.f32.gmra.mxu0 %vm725_vm2, %v3663_v30  ;;  %v3910_v60 = vadd.f32 %v3846_v53, %v7194_v6 }
 0x8eb   : > { %4360 = vmatpush.xpose.msk.msra.mxu1 %vm725_vm2, %v3900_v33 }
 0x8ed   : > { %v3858_v42 = vpop.f32.mrf.mxu0 }
 0x8ee   : > { %v3666_v46 = vpop.f32.mrf.mxu3  ;;  %v3914_v27 = vadd.f32 %v3858_v42, %v7190_v41 }
 0x8ef   : > { %4361 = vmatpush.xpose.msk.msra.mxu1 %vm725_vm2, %v3899_v24  ;;  %4346 = vmatmul.msk.f32.gmra.mxu0 %vm725_vm2, %v3666_v46 }
 0x8f3   : > { %4362 = vmatpush.xpose.msk.msra.mxu1 %vm725_vm2, %v3898_v26 }
 0x8f5   : > { %v3861_v9 = vpop.f32.mrf.mxu0 }
 0x8f6   : > { %v3915_v35 = vadd.f32 %v3861_v9, %v7189_v21 }
 0x8f7   : > { %v3669_v8 = vpop.f32.mrf.mxu3  ;;  %4363 = vmatpush.xpose.msk.msra.mxu1 %vm725_vm2, %v3897_v47 }
 0x8f8   : > { %4347 = vmatmul.msk.f32.gmra.mxu0 %vm725_vm2, %v3669_v8 }
 0x8fb   : > { %4364 = vmatpush.xpose.msk.msra.mxu1 %vm725_vm2, %v3896_v31 }
 0x8ff   : > { %v3672_v18 = vpop.f32.mrf.mxu3  ;;  %4365 = vmatpush.xpose.msk.msra.mxu1 %vm725_vm2, %v3895_v34 }
 0x900   : > { %4348 = vmatmul.msk.f32.gmra.mxu0 %vm725_vm2, %v3672_v18 }
 0x903   : > { %4366 = vmatpush.xpose.msk.msra.mxu1 %vm725_vm2, %v3894_v61 }
 0x906   : > { %4367 = vmatmul.msk.f32.vlgmr.msra.gmra.mxu1 %vm725_vm2, %v3926_v63 }
 0x927   : > { %v3931_v30 = vpop.permute.xlu2 %3930 }
 0x944   : > { %v3864_v15 = vpop.f32.mrf.mxu0 }
 0x945   : > { %v3916_v7 = vadd.f32 %v3864_v15, %v7188_v59 }
 0x94c   : > { %v3867_v0 = vpop.f32.mrf.mxu0 }
 0x94d   : > { %v3917_v36 = vadd.f32 %v3867_v0, %v7187_v56 }
 0x94e   : > { %v3675_v16 = vpop.f32.mrf.mxu3 }
 0x94f   : > { %4349 = vmatmul.msk.f32.gmra.mxu0 %vm725_vm2, %v3675_v16 }
 0x954   : > { %v3870_v19 = vpop.f32.mrf.mxu0 }
 0x955   : > { %v3918_v11 = vadd.f32 %v3870_v19, %v7186_v54 }
 0x956   : > { %v3678_v14 = vpop.f32.mrf.mxu3 }
 0x957   : > { %4350 = vmatmul.msk.f32.gmra.mxu0 %vm725_vm2, %v3678_v14 }
 0x95c   : > { %v3873_v17 = vpop.f32.mrf.mxu0 }
 0x95d   : > { %v3919_v55 = vadd.f32 %v3873_v17, %v7185_v57 }
 0x964   : > { %v3876_v1 = vpop.f32.mrf.mxu0 }
 0x965   : > { %v3920_v28 = vadd.f32 %v3876_v1, %v7184_v13 }
 0x96c   : > { %v3879_v50 = vpop.f32.mrf.mxu0 }
 0x96d   : > { %v3921_v44 = vadd.f32 %v3879_v50, %v7183_v2 }
 0x975   : > { %v3882_v23 = vpop.f32.mrf.mxu0 }
 0x976   : > { %v3922_v12 = vadd.f32 %v3882_v23, %v7182_v62 }
 0x97d   : > { %v3885_v22 = vpop.f32.mrf.mxu0 }
 0x97e   : > { %v3923_v4 = vadd.f32 %v3885_v22, %v7181_v38 }
 0x983   : > { %v4049_v24 = vpop.f32.mrf.mxu1 }
 0x984   : > { %v4050_v47 = vadd.f32 %v4049_v24, %v3931_v30 }
 0x9cc   : > { %v3888_v25 = vpop.f32.mrf.mxu0 }
 0x9cd   : > { %v3924_v40 = vadd.f32 %v3888_v25, %v7180_v48 }
 0x9d4   : > { %v3891_v37 = vpop.f32.mrf.mxu0 }
 0x9d5   : > { %v3925_v43 = vadd.f32 %v3891_v37, %v7179_v5 }
 0x9d7   : > { %4368 = vmatpush.xpose.msk.msra.mxu2 %vm725_vm2, %v3925_v43 }
 0x9db   : > { %4369 = vmatpush.xpose.msk.msra.mxu2 %vm725_vm2, %v3924_v40 }
 0x9df   : > { %4370 = vmatpush.xpose.msk.msra.mxu2 %vm725_vm2, %v3923_v4 }
 0x9e3   : > { %4371 = vmatpush.xpose.msk.msra.mxu2 %vm725_vm2, %v3922_v12 }
 0x9e7   : > { %4372 = vmatpush.xpose.msk.msra.mxu2 %vm725_vm2, %v3921_v44 }
 0x9eb   : > { %4373 = vmatpush.xpose.msk.msra.mxu2 %vm725_vm2, %v3920_v28 }
 0x9ef   : > { %4374 = vmatpush.xpose.msk.msra.mxu2 %vm725_vm2, %v3919_v55 }
 0x9f3   : > { %4375 = vmatpush.xpose.msk.msra.mxu2 %vm725_vm2, %v3918_v11 }
 0x9f7   : > { %4376 = vmatpush.xpose.msk.msra.mxu2 %vm725_vm2, %v3917_v36 }
 0x9fb   : > { %4377 = vmatpush.xpose.msk.msra.mxu2 %vm725_vm2, %v3916_v7 }
 0x9ff   : > { %4378 = vmatpush.xpose.msk.msra.mxu2 %vm725_vm2, %v3915_v35 }
 0xa03   : > { %4379 = vmatpush.xpose.msk.msra.mxu2 %vm725_vm2, %v3914_v27 }
 0xa07   : > { %4380 = vmatpush.xpose.msk.msra.mxu2 %vm725_vm2, %v3913_v32 }
 0xa0b   : > { %4381 = vmatpush.xpose.msk.msra.mxu2 %vm725_vm2, %v3912_v20 }
 0xa0f   : > { %4382 = vmatpush.xpose.msk.msra.mxu2 %vm725_vm2, %v3911_v45 }
 0xa13   : > { %4383 = vmatpush.xpose.msk.msra.mxu2 %vm725_vm2, %v3910_v60 }
 0xa16   : > { %4384 = vmatmul.msk.f32.vlgmr.msra.gmra.mxu2 %vm725_vm2, %v3926_v63 }
 0xa99   : > { %v4069_v33 = vpop.f32.mrf.mxu2 }
 0xa9a   : > { %v4070_v46 = vadd.f32 %v4069_v33, %v3931_v30 }
 0xa9c   : > { %v4074_v26 = vrot.slane %v4070_v46, 4 }
 0xa9e   : > { %v4075_v8 = vsel %vm700_vm0, %v4050_v47, %v4074_v26 }
 0xa9f   : > { %4077 = vst [vmem:[%s690_s25] sm:$0xff] %v4075_v8 }
 0xaa0 PF: > { %s7195_s27 = sld [smem:[#allocation6_spill]] }
 0xaa6   : > { %s32_s2 = sadd.s32 1, %s7195_s27  }
 0xaa7   : > { %p29_p7 = scmp.ge.s32.totalorder %s32_s2, 4  }
 0xaa9   :  { %31 = sbr.rel (!%p29_p7) target bundleno = 8 (0x8), region = 144 }
 0xaae   :  { %4099 = vsyncpa [#allocation4], 1 }
 0xaaf   :  { %4101 = vsyncpa [#allocation4 + $0x1], 1 }

</bundles_post_ra>
